<compile_context>
chip_gen: v5e
topology: v5e:2x2
jax: 0.10.0
libtpu: 0.0.40
codegen_flags: <defaults>
</compile_context>

<pallas_src>
import functools

import jax
import jax.numpy as jnp
from jax.experimental import pallas as pl
from jax.experimental.pallas import tpu as pltpu


_LANE = 128
_ROW_ALIGN = 16                     # safe sublane multiple for bf16 and f32 blocks
_VMEM_LIMIT = 32 * 1024 * 1024      # explicit scoped-VMEM limit, safe on v5e/v6e/v7x
_BN_SINGLE_TILE_CAP = 2048          # max rows for the fused single-pass BN kernel


def _round_up(x, m):
    return (x + m - 1) // m * m


def _balanced_tiles(M, cap):
    """Balanced M tiling: n tiles of tm rows each, tm*n >= M, waste < _ROW_ALIGN."""
    n = -(-M // cap)
    tm = _round_up(-(-M // n), _ROW_ALIGN)
    return tm, tm * n, n


# ----------------------------------------------------------------------------
# Pallas kernels
# ----------------------------------------------------------------------------
def _mm_bias_act_kernel(*refs, use_bias, use_act, slope):
    """One M-tile: (tm,K)@(K,Np) on MXU (bf16 in, f32 acc) + bias + LeakyReLU.

    Only the first N (= o_ref lane width) columns are stored (unpadded output)."""
    if use_bias:
        p_ref, w_ref, b_ref, o_ref = refs
    else:
        p_ref, w_ref, o_ref = refs
    n = o_ref.shape[-1]
    y = jnp.dot(p_ref[...], w_ref[...], preferred_element_type=jnp.float32)
    if use_bias:
        y = y + b_ref[...]
    if use_act:
        y = jnp.where(y >= 0.0, y, slope * y)
    o_ref[...] = y[:, :n]


def _mm_bn_act_single_kernel(p_ref, w_ref, g_ref, b_ref, o_ref, *,
                             m_true, slope, eps):
    """Fused single tile: conv matmul + batch statistics + BatchNorm + LeakyReLU.

    Zero-padded rows of P contribute exactly 0 to sum/sumsq (bias-free conv), so
    dividing by the true M gives exact training-mode batch statistics."""
    n = o_ref.shape[-1]
    y = jnp.dot(p_ref[...], w_ref[...],
                preferred_element_type=jnp.float32)[:, :n]       # (tm, N)
    s = jnp.sum(y, axis=0, keepdims=True)                        # (1, N)
    sq = jnp.sum(y * y, axis=0, keepdims=True)                   # (1, N)
    mean = s / m_true
    var = jnp.maximum(sq / m_true - mean * mean, 0.0)            # biased variance
    scale = g_ref[...] * jax.lax.rsqrt(var + eps)
    shift = b_ref[...] - mean * scale
    yn = y * scale + shift
    o_ref[...] = jnp.where(yn >= 0.0, yn, slope * yn)


def _mm_stats_kernel(p_ref, w_ref, y_ref, s_ref):
    """BN fallback pass 1: matmul tile + per-tile partial (sum, sumsq) per channel."""
    y = jnp.dot(p_ref[...], w_ref[...], preferred_element_type=jnp.float32)
    y_ref[...] = y
    s_ref[0, 0:1, :] = jnp.sum(y, axis=0, keepdims=True)
    s_ref[0, 1:2, :] = jnp.sum(y * y, axis=0, keepdims=True)


def _bn_act_kernel(y_ref, ss_ref, o_ref, *, slope):
    """BN fallback pass 2: folded normalization (one FMA) + LeakyReLU, unpadded store."""
    n = o_ref.shape[-1]
    yn = y_ref[...] * ss_ref[0:1, :] + ss_ref[1:2, :]
    o_ref[...] = jnp.where(yn >= 0.0, yn, slope * yn)[:, :n]


# ----------------------------------------------------------------------------
# Glue: reflect-pad + im2col (XLA, bf16), padding/casting, pallas_call wrappers.
# ----------------------------------------------------------------------------
def _im2col(x_nhwc, kh, kw, stride):
    B, H, W, C = x_nhwc.shape
    OH = (H - kh) // stride + 1
    OW = (W - kw) // stride + 1
    cols = []
    for i in range(kh):
        for j in range(kw):
            cols.append(
                x_nhwc[:, i:i + stride * (OH - 1) + 1:stride,
                          j:j + stride * (OW - 1) + 1:stride, :])
    patches = jnp.stack(cols, axis=3)                 # (B, OH, OW, kh*kw, C)
    return patches.reshape(B * OH * OW, kh * kw * C), (B, OH, OW)


def _weight_to_matrix(w_oihw):
    # (C_out, C_in, kh, kw) -> (kh*kw*C_in, C_out), matching im2col K ordering.
    co, ci, kh, kw = w_oihw.shape
    return jnp.transpose(w_oihw, (2, 3, 1, 0)).reshape(kh * kw * ci, co)


def conv_layer(x_nhwc, w_oihw, bias, gamma, beta, *, stride, pad,
               use_bn, use_act, tm_cap=1024, slope=0.2, eps=1e-5):
    # bf16 MXU feed; cast before pad / patch extraction to halve the glue traffic.
    x_b = x_nhwc.astype(jnp.bfloat16)
    if pad > 0:
        x_b = jnp.pad(x_b, ((0, 0), (pad, pad), (pad, pad), (0, 0)),
                      mode="reflect")
    kh, kw = w_oihw.shape[2], w_oihw.shape[3]
    P, (B, OH, OW) = _im2col(x_b, kh, kw, stride)     # (M, K) bf16
    Wm = _weight_to_matrix(w_oihw)
    M, K = P.shape                                    # K stays unpadded (full-dim block)
    N = Wm.shape[1]
    Np = _round_up(N, _LANE)                          # weights padded for 128-lane MXU feed

    W_b = jnp.pad(Wm, ((0, 0), (0, Np - N))).astype(jnp.bfloat16)

    cparams = pltpu.CompilerParams(
        dimension_semantics=("parallel",),            # M tiles are independent
        vmem_limit_bytes=_VMEM_LIMIT)

    if not use_bn:
        tm, Mp, n_m = _balanced_tiles(M, tm_cap)
        P_b = P if Mp == M else jnp.pad(P, ((0, Mp - M), (0, 0)))
        use_bias = bias is not None
        in_arrays = [P_b, W_b]
        in_specs = [
            pl.BlockSpec((tm, K), lambda i: (i, 0)),
            pl.BlockSpec((K, Np), lambda i: (0, 0)),
        ]
        if use_bias:
            b_p = jnp.zeros((1, Np), jnp.float32).at[0, :N].set(bias)
            in_arrays.append(b_p)
            in_specs.append(pl.BlockSpec((1, Np), lambda i: (0, 0)))
        kernel = functools.partial(_mm_bias_act_kernel, use_bias=use_bias,
                                   use_act=use_act, slope=slope)
        out = pl.pallas_call(
            kernel,
            out_shape=jax.ShapeDtypeStruct((Mp, N), jnp.float32),
            grid=(n_m,),
            in_specs=in_specs,
            out_specs=pl.BlockSpec((tm, N), lambda i: (i, 0)),
            compiler_params=cparams,
        )(*in_arrays)
        if Mp != M:
            out = out[:M]
        return out.reshape(B, OH, OW, N)

    # ---------------- BatchNorm layers ----------------
    if M <= _BN_SINGLE_TILE_CAP:
        # Whole layer fits one M tile: single fused pass (matmul + stats + BN + act).
        tm = _round_up(M, _ROW_ALIGN)
        P_b = P if tm == M else jnp.pad(P, ((0, tm - M), (0, 0)))
        g2 = gamma.reshape(1, N).astype(jnp.float32)
        be2 = beta.reshape(1, N).astype(jnp.float32)
        kernel = functools.partial(_mm_bn_act_single_kernel,
                                   m_true=float(M), slope=slope, eps=eps)
        out = pl.pallas_call(
            kernel,
            out_shape=jax.ShapeDtypeStruct((tm, N), jnp.float32),
            grid=(1,),
            in_specs=[
                pl.BlockSpec((tm, K), lambda i: (0, 0)),
                pl.BlockSpec((K, Np), lambda i: (0, 0)),
                pl.BlockSpec((1, N), lambda i: (0, 0)),
                pl.BlockSpec((1, N), lambda i: (0, 0)),
            ],
            out_specs=pl.BlockSpec((tm, N), lambda i: (0, 0)),
            compiler_params=pltpu.CompilerParams(
                dimension_semantics=("arbitrary",),
                vmem_limit_bytes=_VMEM_LIMIT),
        )(P_b, W_b, g2, be2)
        if tm != M:
            out = out[:M]
        return out.reshape(B, OH, OW, N)

    # Fallback for large M: two tiled passes (matmul+partial stats, then BN apply).
    tm, Mp, n_m = _balanced_tiles(M, tm_cap)
    P_b = P if Mp == M else jnp.pad(P, ((0, Mp - M), (0, 0)))
    y, part = pl.pallas_call(
        _mm_stats_kernel,
        out_shape=(jax.ShapeDtypeStruct((Mp, Np), jnp.float32),
                   jax.ShapeDtypeStruct((n_m, 2, Np), jnp.float32)),
        grid=(n_m,),
        in_specs=[
            pl.BlockSpec((tm, K), lambda i: (i, 0)),
            pl.BlockSpec((K, Np), lambda i: (0, 0)),
        ],
        out_specs=(pl.BlockSpec((tm, Np), lambda i: (i, 0)),
                   pl.BlockSpec((1, 2, Np), lambda i: (i, 0, 0))),
        compiler_params=cparams,
    )(P_b, W_b)

    # Tiny cross-tile reduce + folded BN affine (plain JAX; <= 128 values).
    s = jnp.sum(part[:, 0, :], axis=0)
    sq = jnp.sum(part[:, 1, :], axis=0)
    mean = s / M                                   # padded rows are exact zeros
    var = jnp.maximum(sq / M - mean * mean, 0.0)   # biased variance (training BN)
    g_p = jnp.ones((Np,), jnp.float32).at[:N].set(gamma)
    be_p = jnp.zeros((Np,), jnp.float32).at[:N].set(beta)
    scale = g_p * jax.lax.rsqrt(var + eps)
    shift = be_p - mean * scale
    ss = jnp.stack([scale, shift], axis=0)         # packed (2, Np) operand

    out = pl.pallas_call(
        functools.partial(_bn_act_kernel, slope=slope),
        out_shape=jax.ShapeDtypeStruct((Mp, N), jnp.float32),
        grid=(n_m,),
        in_specs=[
            pl.BlockSpec((tm, Np), lambda i: (i, 0)),
            pl.BlockSpec((2, Np), lambda i: (0, 0)),
        ],
        out_specs=pl.BlockSpec((tm, N), lambda i: (i, 0)),
        compiler_params=cparams,
    )(y, ss)
    if Mp != M:
        out = out[:M]
    return out.reshape(B, OH, OW, N)


def conv_layer_ref(x_nhwc, w_oihw, bias, gamma, beta, *, stride, pad,
                   use_bn, use_act, matmul_dtype=jnp.float32):
    """Pure-JAX reference (same math; matmul_dtype selects f32 or bf16 MXU feed)."""
    if pad > 0:
        x_nhwc = jnp.pad(x_nhwc, ((0, 0), (pad, pad), (pad, pad), (0, 0)),
                         mode="reflect")
    kh, kw = w_oihw.shape[2], w_oihw.shape[3]
    P, (B, OH, OW) = _im2col(x_nhwc, kh, kw, stride)
    Wm = _weight_to_matrix(w_oihw)
    N = Wm.shape[1]
    y = jnp.dot(P.astype(matmul_dtype), Wm.astype(matmul_dtype),
                preferred_element_type=jnp.float32)
    if bias is not None:
        y = y + bias.reshape(1, N)
    if use_bn:
        mean = jnp.mean(y, axis=0, keepdims=True)
        var = jnp.maximum(jnp.mean(y * y, axis=0, keepdims=True) - mean * mean, 0.0)
        scale = gamma.reshape(1, N) * jax.lax.rsqrt(var + 1e-5)
        shift = beta.reshape(1, N) - mean * scale
        y = y * scale + shift
    if use_act:
        y = jnp.where(y >= 0.0, y, 0.2 * y)
    return y.reshape(B, OH, OW, N)


# ----------------------------------------------------------------------------
# Discriminator forward
# ----------------------------------------------------------------------------
def discriminator_forward(x0_nchw, x1_nchw, params, layer_fn=conv_layer):
    x = jnp.concatenate([x0_nchw, x1_nchw], axis=1)      # (B, 4, H, W)
    x = jnp.transpose(x, (0, 2, 3, 1))                   # NCHW -> NHWC
    # input layer: Conv(4->f0, k4, s2, p1 reflect, bias=False) + LeakyReLU(0.2)
    x = layer_fn(x, params["w0"], None, None, None,
                 stride=2, pad=1, use_bn=False, use_act=True)
    # block(f0->f1): Conv(k4, s2, p0, bias=False) + BN + LeakyReLU
    x = layer_fn(x, params["w1"], None, params["g1"], params["be1"],
                 stride=2, pad=0, use_bn=True, use_act=True)
    # block(f1->f2): Conv(k4, s2, p0, bias=False) + BN + LeakyReLU
    x = layer_fn(x, params["w2"], None, params["g2"], params["be2"],
                 stride=2, pad=0, use_bn=True, use_act=True)
    # block(f2->f3, stride=1): Conv(k4, s1, p0, bias=False) + BN + LeakyReLU
    x = layer_fn(x, params["w3"], None, params["g3"], params["be3"],
                 stride=1, pad=0, use_bn=True, use_act=True)
    # final: Conv(f3->1, k4, s1, p1 reflect, bias=True), no activation
    x = layer_fn(x, params["w4"], params["b4"], None, None,
                 stride=1, pad=1, use_bn=False, use_act=False)
    return jnp.transpose(x, (0, 3, 1, 2))                # NHWC -> NCHW


def init_params(key, features):
    f0, f1, f2, f3 = features
    ks = jax.random.split(key, 12)

    def w(k, co, ci):
        return (jax.random.normal(k, (co, ci, 4, 4), jnp.float32)
                * (1.0 / jnp.sqrt(ci * 16.0)))

    def v(k, n, scale=0.1):
        return jax.random.normal(k, (n,), jnp.float32) * scale

    return {
        "w0": w(ks[0], f0, 4),
        "w1": w(ks[1], f1, f0), "g1": 1.0 + v(ks[2], f1), "be1": v(ks[3], f1),
        "w2": w(ks[4], f2, f1), "g2": 1.0 + v(ks[5], f2), "be2": v(ks[6], f2),
        "w3": w(ks[7], f3, f2), "g3": 1.0 + v(ks[8], f3), "be3": v(ks[9], f3),
        "w4": w(ks[10], 1, f3), "b4": v(ks[11], 1),
    }


if __name__ == "__main__":
    features = [8, 16, 32, 32]
    key = jax.random.PRNGKey(0)
    kp, kx0, kx1 = jax.random.split(key, 3)
    params = init_params(kp, features)

    B, H, W = 2, 64, 64
    x0 = jax.random.normal(kx0, (B, 1, H, W), jnp.float32)   # NCHW, like PyTorch
    x1 = jax.random.normal(kx1, (B, 3, H, W), jnp.float32)

    fwd = jax.jit(functools.partial(discriminator_forward, layer_fn=conv_layer))
    out = jax.block_until_ready(fwd(x0, x1, params))
    assert out.shape == (B, 1, 2, 2), out.shape

    # Check 1: same-algorithm reference (bf16 MXU feed, f32 accumulation/stats).
    ref_bf16 = discriminator_forward(
        x0, x1, params,
        layer_fn=functools.partial(conv_layer_ref, matmul_dtype=jnp.bfloat16))
    ref_bf16 = jax.block_until_ready(ref_bf16)
    assert jnp.allclose(out, ref_bf16, rtol=1e-3, atol=1e-3), (
        float(jnp.max(jnp.abs(out - ref_bf16))))

    # Check 2: full-f32 reference (exact module math); looser tolerance covers
    # the bf16 MXU feed accumulated over 5 layers.
    ref_f32 = discriminator_forward(
        x0, x1, params,
        layer_fn=functools.partial(conv_layer_ref, matmul_dtype=jnp.float32))
    ref_f32 = jax.block_until_ready(ref_f32)
    assert jnp.allclose(out, ref_f32, rtol=5e-2, atol=5e-2), (
        float(jnp.max(jnp.abs(out - ref_f32))))

    print("KERNEL_OK")
</pallas_src>

<mosaic_0001>
module attributes {stable_mosaic.version = 11 : i64} {
  func.func @_mm_bias_act_kernel(%arg0: i32, %arg1: memref<1024x64xbf16, #tpu.memory_space<vmem>>, %arg2: memref<64x128xbf16, #tpu.memory_space<vmem>>, %arg3: memref<1024x8xf32, #tpu.memory_space<vmem>>) attributes {dimension_semantics = [#tpu.dimension_semantics<parallel>], iteration_bounds = array<i64: 2>, scalar_prefetch = 0 : i64, scratch_operands = 0 : i64, tpu.core_type = #tpu.core_type<tc>, window_params = [{transform_indices = @transform_0, window_bounds = array<i64: 1024, 64>}, {pipeline_mode = #tpu.pipeline_mode<synchronous>, transform_indices = @transform_1, window_bounds = array<i64: 64, 128>}, {transform_indices = @transform_2, window_bounds = array<i64: 1024, 8>}]} {
    %c0 = arith.constant 0 : index
    %c0_0 = arith.constant 0 : index
    %0 = vector.load %arg1[%c0, %c0_0] : memref<1024x64xbf16, #tpu.memory_space<vmem>>, vector<1024x64xbf16>
    %c0_1 = arith.constant 0 : index
    %c0_2 = arith.constant 0 : index
    %1 = vector.load %arg2[%c0_1, %c0_2] : memref<64x128xbf16, #tpu.memory_space<vmem>>, vector<64x128xbf16>
    %cst = arith.constant dense<0.000000e+00> : vector<1024x128xf32>
    %2 = tpu.matmul %0, %1, %cst {dimension_numbers = #tpu.dot_dimension_numbers<[1], [0], [0], [1], [0, 0, 1, 1], [], []>} : vector<1024x64xbf16>, vector<64x128xbf16>, vector<1024x128xf32> -> vector<1024x128xf32>
    %cst_3 = arith.constant 0.000000e+00 : f32
    %3 = vector.broadcast %cst_3 : f32 to vector<1024x128xf32>
    %4 = arith.cmpf oge, %2, %3 : vector<1024x128xf32>
    %cst_4 = arith.constant 2.000000e-01 : f32
    %5 = vector.broadcast %cst_4 : f32 to vector<1024x128xf32>
    %6 = arith.mulf %5, %2 : vector<1024x128xf32>
    %7 = arith.select %4, %2, %6 : vector<1024x128xi1>, vector<1024x128xf32>
    %8 = vector.extract_strided_slice %7 {offsets = [0, 0], sizes = [1024, 8], strides = [1, 1]} : vector<1024x128xf32> to vector<1024x8xf32>
    %c0_5 = arith.constant 0 : index
    %c0_6 = arith.constant 0 : index
    %9 = vector.load %arg3[%c0_5, %c0_6] : memref<1024x8xf32, #tpu.memory_space<vmem>>, vector<1024x8xf32>
    tpu.vector_store %arg3[%c0_5, %c0_6], %8 {strides = array<i32>} : memref<1024x8xf32, #tpu.memory_space<vmem>>, vector<1024x8xf32>,
    return
  }
  func.func @transform_0(%arg0: i32) -> (i32, i32) {
    %c0_i32 = arith.constant 0 : i32
    %c0_i32_0 = arith.constant 0 : i32
    return %arg0, %c0_i32 : i32, i32
  }
  func.func @transform_1(%arg0: i32) -> (i32, i32) {
    %c0_i32 = arith.constant 0 : i32
    %c0_i32_0 = arith.constant 0 : i32
    %c0_i32_1 = arith.constant 0 : i32
    return %c0_i32, %c0_i32_0 : i32, i32
  }
  func.func @transform_2(%arg0: i32) -> (i32, i32) {
    %c0_i32 = arith.constant 0 : i32
    %c0_i32_0 = arith.constant 0 : i32
    return %arg0, %c0_i32 : i32, i32
  }
}

module attributes {stable_mosaic.version = 11 : i64} {
  func.func @_mm_bn_act_single_kernel(%arg0: i32, %arg1: memref<464x128xbf16, #tpu.memory_space<vmem>>, %arg2: memref<128x128xbf16, #tpu.memory_space<vmem>>, %arg3: memref<1x16xf32, #tpu.memory_space<vmem>>, %arg4: memref<1x16xf32, #tpu.memory_space<vmem>>, %arg5: memref<464x16xf32, #tpu.memory_space<vmem>>) attributes {dimension_semantics = [#tpu.dimension_semantics<arbitrary>], iteration_bounds = array<i64: 1>, scalar_prefetch = 0 : i64, scratch_operands = 0 : i64, tpu.core_type = #tpu.core_type<tc>, window_params = [{pipeline_mode = #tpu.pipeline_mode<synchronous>, transform_indices = @transform_0, window_bounds = array<i64: 464, 128>}, {pipeline_mode = #tpu.pipeline_mode<synchronous>, transform_indices = @transform_1, window_bounds = array<i64: 128, 128>}, {pipeline_mode = #tpu.pipeline_mode<synchronous>, transform_indices = @transform_2, window_bounds = array<i64: 1, 16>}, {pipeline_mode = #tpu.pipeline_mode<synchronous>, transform_indices = @transform_3, window_bounds = array<i64: 1, 16>}, {pipeline_mode = #tpu.pipeline_mode<synchronous>, transform_indices = @transform_4, window_bounds = array<i64: 464, 16>}]} {
    %c0 = arith.constant 0 : index
    %c0_0 = arith.constant 0 : index
    %0 = vector.load %arg1[%c0, %c0_0] : memref<464x128xbf16, #tpu.memory_space<vmem>>, vector<464x128xbf16>
    %c0_1 = arith.constant 0 : index
    %c0_2 = arith.constant 0 : index
    %1 = vector.load %arg2[%c0_1, %c0_2] : memref<128x128xbf16, #tpu.memory_space<vmem>>, vector<128x128xbf16>
    %cst = arith.constant dense<0.000000e+00> : vector<464x128xf32>
    %2 = tpu.matmul %0, %1, %cst {dimension_numbers = #tpu.dot_dimension_numbers<[1], [0], [0], [1], [0, 0, 1, 1], [], []>} : vector<464x128xbf16>, vector<128x128xbf16>, vector<464x128xf32> -> vector<464x128xf32>
    %3 = vector.extract_strided_slice %2 {offsets = [0, 0], sizes = [464, 16], strides = [1, 1]} : vector<464x128xf32> to vector<464x16xf32>
    %cst_3 = arith.constant dense<0.000000e+00> : vector<16xf32>
    %4 = vector.multi_reduction <add>, %3, %cst_3 [0] : vector<464x16xf32> to vector<16xf32>
    %5 = vector.shape_cast %4 : vector<16xf32> to vector<1x16xf32>
    %6 = arith.mulf %3, %3 : vector<464x16xf32>
    %cst_4 = arith.constant dense<0.000000e+00> : vector<16xf32>
    %7 = vector.multi_reduction <add>, %6, %cst_4 [0] : vector<464x16xf32> to vector<16xf32>
    %8 = vector.shape_cast %7 : vector<16xf32> to vector<1x16xf32>
    %cst_5 = arith.constant 4.500000e+02 : f32
    %9 = vector.broadcast %cst_5 : f32 to vector<1x16xf32>
    %10 = arith.divf %5, %9 : vector<1x16xf32>
    %cst_6 = arith.constant 4.500000e+02 : f32
    %11 = vector.broadcast %cst_6 : f32 to vector<1x16xf32>
    %12 = arith.divf %8, %11 : vector<1x16xf32>
    %13 = arith.mulf %10, %10 : vector<1x16xf32>
    %14 = arith.subf %12, %13 : vector<1x16xf32>
    %cst_7 = arith.constant 0.000000e+00 : f32
    %15 = vector.broadcast %cst_7 : f32 to vector<1x16xf32>
    %16 = arith.maximumf %14, %15 : vector<1x16xf32>
    %c0_8 = arith.constant 0 : index
    %c0_9 = arith.constant 0 : index
    %17 = vector.load %arg3[%c0_8, %c0_9] : memref<1x16xf32, #tpu.memory_space<vmem>>, vector<1x16xf32>
    %cst_10 = arith.constant 9.99999974E-6 : f32
    %18 = vector.broadcast %cst_10 : f32 to vector<1x16xf32>
    %19 = arith.addf %16, %18 : vector<1x16xf32>
    %20 = math.rsqrt %19 : vector<1x16xf32>
    %21 = arith.mulf %17, %20 : vector<1x16xf32>
    %c0_11 = arith.constant 0 : index
    %c0_12 = arith.constant 0 : index
    %22 = vector.load %arg4[%c0_11, %c0_12] : memref<1x16xf32, #tpu.memory_space<vmem>>, vector<1x16xf32>
    %23 = arith.mulf %10, %21 : vector<1x16xf32>
    %24 = arith.subf %22, %23 : vector<1x16xf32>
    %25 = vector.broadcast %21 : vector<1x16xf32> to vector<464x16xf32>
    %26 = arith.mulf %3, %25 : vector<464x16xf32>
    %27 = vector.broadcast %24 : vector<1x16xf32> to vector<464x16xf32>
    %28 = arith.addf %26, %27 : vector<464x16xf32>
    %cst_13 = arith.constant 0.000000e+00 : f32
    %29 = vector.broadcast %cst_13 : f32 to vector<464x16xf32>
    %30 = arith.cmpf oge, %28, %29 : vector<464x16xf32>
    %cst_14 = arith.constant 2.000000e-01 : f32
    %31 = vector.broadcast %cst_14 : f32 to vector<464x16xf32>
    %32 = arith.mulf %31, %28 : vector<464x16xf32>
    %33 = arith.select %30, %28, %32 : vector<464x16xi1>, vector<464x16xf32>
    %c0_15 = arith.constant 0 : index
    %c0_16 = arith.constant 0 : index
    %34 = vector.load %arg5[%c0_15, %c0_16] : memref<464x16xf32, #tpu.memory_space<vmem>>, vector<464x16xf32>
    tpu.vector_store %arg5[%c0_15, %c0_16], %33 {strides = array<i32>} : memref<464x16xf32, #tpu.memory_space<vmem>>, vector<464x16xf32>,
    return
  }
  func.func @transform_0(%arg0: i32) -> (i32, i32) {
    %c0_i32 = arith.constant 0 : i32
    %c0_i32_0 = arith.constant 0 : i32
    %c0_i32_1 = arith.constant 0 : i32
    return %c0_i32, %c0_i32_0 : i32, i32
  }
  func.func @transform_1(%arg0: i32) -> (i32, i32) {
    %c0_i32 = arith.constant 0 : i32
    %c0_i32_0 = arith.constant 0 : i32
    %c0_i32_1 = arith.constant 0 : i32
    return %c0_i32, %c0_i32_0 : i32, i32
  }
  func.func @transform_2(%arg0: i32) -> (i32, i32) {
    %c0_i32 = arith.constant 0 : i32
    %c0_i32_0 = arith.constant 0 : i32
    %c0_i32_1 = arith.constant 0 : i32
    return %c0_i32, %c0_i32_0 : i32, i32
  }
  func.func @transform_3(%arg0: i32) -> (i32, i32) {
    %c0_i32 = arith.constant 0 : i32
    %c0_i32_0 = arith.constant 0 : i32
    %c0_i32_1 = arith.constant 0 : i32
    return %c0_i32, %c0_i32_0 : i32, i32
  }
  func.func @transform_4(%arg0: i32) -> (i32, i32) {
    %c0_i32 = arith.constant 0 : i32
    %c0_i32_0 = arith.constant 0 : i32
    %c0_i32_1 = arith.constant 0 : i32
    return %c0_i32, %c0_i32_0 : i32, i32
  }
}

module attributes {stable_mosaic.version = 11 : i64} {
  func.func @_mm_bn_act_single_kernel(%arg0: i32, %arg1: memref<80x256xbf16, #tpu.memory_space<vmem>>, %arg2: memref<256x128xbf16, #tpu.memory_space<vmem>>, %arg3: memref<1x32xf32, #tpu.memory_space<vmem>>, %arg4: memref<1x32xf32, #tpu.memory_space<vmem>>, %arg5: memref<80x32xf32, #tpu.memory_space<vmem>>) attributes {dimension_semantics = [#tpu.dimension_semantics<arbitrary>], iteration_bounds = array<i64: 1>, scalar_prefetch = 0 : i64, scratch_operands = 0 : i64, tpu.core_type = #tpu.core_type<tc>, window_params = [{pipeline_mode = #tpu.pipeline_mode<synchronous>, transform_indices = @transform_0, window_bounds = array<i64: 80, 256>}, {pipeline_mode = #tpu.pipeline_mode<synchronous>, transform_indices = @transform_1, window_bounds = array<i64: 256, 128>}, {pipeline_mode = #tpu.pipeline_mode<synchronous>, transform_indices = @transform_2, window_bounds = array<i64: 1, 32>}, {pipeline_mode = #tpu.pipeline_mode<synchronous>, transform_indices = @transform_3, window_bounds = array<i64: 1, 32>}, {pipeline_mode = #tpu.pipeline_mode<synchronous>, transform_indices = @transform_4, window_bounds = array<i64: 80, 32>}]} {
    %c0 = arith.constant 0 : index
    %c0_0 = arith.constant 0 : index
    %0 = vector.load %arg1[%c0, %c0_0] : memref<80x256xbf16, #tpu.memory_space<vmem>>, vector<80x256xbf16>
    %c0_1 = arith.constant 0 : index
    %c0_2 = arith.constant 0 : index
    %1 = vector.load %arg2[%c0_1, %c0_2] : memref<256x128xbf16, #tpu.memory_space<vmem>>, vector<256x128xbf16>
    %cst = arith.constant dense<0.000000e+00> : vector<80x128xf32>
    %2 = tpu.matmul %0, %1, %cst {dimension_numbers = #tpu.dot_dimension_numbers<[1], [0], [0], [1], [0, 0, 1, 1], [], []>} : vector<80x256xbf16>, vector<256x128xbf16>, vector<80x128xf32> -> vector<80x128xf32>
    %3 = vector.extract_strided_slice %2 {offsets = [0, 0], sizes = [80, 32], strides = [1, 1]} : vector<80x128xf32> to vector<80x32xf32>
    %cst_3 = arith.constant dense<0.000000e+00> : vector<32xf32>
    %4 = vector.multi_reduction <add>, %3, %cst_3 [0] : vector<80x32xf32> to vector<32xf32>
    %5 = vector.shape_cast %4 : vector<32xf32> to vector<1x32xf32>
    %6 = arith.mulf %3, %3 : vector<80x32xf32>
    %cst_4 = arith.constant dense<0.000000e+00> : vector<32xf32>
    %7 = vector.multi_reduction <add>, %6, %cst_4 [0] : vector<80x32xf32> to vector<32xf32>
    %8 = vector.shape_cast %7 : vector<32xf32> to vector<1x32xf32>
    %cst_5 = arith.constant 7.200000e+01 : f32
    %9 = vector.broadcast %cst_5 : f32 to vector<1x32xf32>
    %10 = arith.divf %5, %9 : vector<1x32xf32>
    %cst_6 = arith.constant 7.200000e+01 : f32
    %11 = vector.broadcast %cst_6 : f32 to vector<1x32xf32>
    %12 = arith.divf %8, %11 : vector<1x32xf32>
    %13 = arith.mulf %10, %10 : vector<1x32xf32>
    %14 = arith.subf %12, %13 : vector<1x32xf32>
    %cst_7 = arith.constant 0.000000e+00 : f32
    %15 = vector.broadcast %cst_7 : f32 to vector<1x32xf32>
    %16 = arith.maximumf %14, %15 : vector<1x32xf32>
    %c0_8 = arith.constant 0 : index
    %c0_9 = arith.constant 0 : index
    %17 = vector.load %arg3[%c0_8, %c0_9] : memref<1x32xf32, #tpu.memory_space<vmem>>, vector<1x32xf32>
    %cst_10 = arith.constant 9.99999974E-6 : f32
    %18 = vector.broadcast %cst_10 : f32 to vector<1x32xf32>
    %19 = arith.addf %16, %18 : vector<1x32xf32>
    %20 = math.rsqrt %19 : vector<1x32xf32>
    %21 = arith.mulf %17, %20 : vector<1x32xf32>
    %c0_11 = arith.constant 0 : index
    %c0_12 = arith.constant 0 : index
    %22 = vector.load %arg4[%c0_11, %c0_12] : memref<1x32xf32, #tpu.memory_space<vmem>>, vector<1x32xf32>
    %23 = arith.mulf %10, %21 : vector<1x32xf32>
    %24 = arith.subf %22, %23 : vector<1x32xf32>
    %25 = vector.broadcast %21 : vector<1x32xf32> to vector<80x32xf32>
    %26 = arith.mulf %3, %25 : vector<80x32xf32>
    %27 = vector.broadcast %24 : vector<1x32xf32> to vector<80x32xf32>
    %28 = arith.addf %26, %27 : vector<80x32xf32>
    %cst_13 = arith.constant 0.000000e+00 : f32
    %29 = vector.broadcast %cst_13 : f32 to vector<80x32xf32>
    %30 = arith.cmpf oge, %28, %29 : vector<80x32xf32>
    %cst_14 = arith.constant 2.000000e-01 : f32
    %31 = vector.broadcast %cst_14 : f32 to vector<80x32xf32>
    %32 = arith.mulf %31, %28 : vector<80x32xf32>
    %33 = arith.select %30, %28, %32 : vector<80x32xi1>, vector<80x32xf32>
    %c0_15 = arith.constant 0 : index
    %c0_16 = arith.constant 0 : index
    %34 = vector.load %arg5[%c0_15, %c0_16] : memref<80x32xf32, #tpu.memory_space<vmem>>, vector<80x32xf32>
    tpu.vector_store %arg5[%c0_15, %c0_16], %33 {strides = array<i32>} : memref<80x32xf32, #tpu.memory_space<vmem>>, vector<80x32xf32>,
    return
  }
  func.func @transform_0(%arg0: i32) -> (i32, i32) {
    %c0_i32 = arith.constant 0 : i32
    %c0_i32_0 = arith.constant 0 : i32
    %c0_i32_1 = arith.constant 0 : i32
    return %c0_i32, %c0_i32_0 : i32, i32
  }
  func.func @transform_1(%arg0: i32) -> (i32, i32) {
    %c0_i32 = arith.constant 0 : i32
    %c0_i32_0 = arith.constant 0 : i32
    %c0_i32_1 = arith.constant 0 : i32
    return %c0_i32, %c0_i32_0 : i32, i32
  }
  func.func @transform_2(%arg0: i32) -> (i32, i32) {
    %c0_i32 = arith.constant 0 : i32
    %c0_i32_0 = arith.constant 0 : i32
    %c0_i32_1 = arith.constant 0 : i32
    return %c0_i32, %c0_i32_0 : i32, i32
  }
  func.func @transform_3(%arg0: i32) -> (i32, i32) {
    %c0_i32 = arith.constant 0 : i32
    %c0_i32_0 = arith.constant 0 : i32
    %c0_i32_1 = arith.constant 0 : i32
    return %c0_i32, %c0_i32_0 : i32, i32
  }
  func.func @transform_4(%arg0: i32) -> (i32, i32) {
    %c0_i32 = arith.constant 0 : i32
    %c0_i32_0 = arith.constant 0 : i32
    %c0_i32_1 = arith.constant 0 : i32
    return %c0_i32, %c0_i32_0 : i32, i32
  }
}

module attributes {stable_mosaic.version = 11 : i64} {
  func.func @_mm_bn_act_single_kernel(%arg0: i32, %arg1: memref<32x512xbf16, #tpu.memory_space<vmem>>, %arg2: memref<512x128xbf16, #tpu.memory_space<vmem>>, %arg3: memref<1x32xf32, #tpu.memory_space<vmem>>, %arg4: memref<1x32xf32, #tpu.memory_space<vmem>>, %arg5: memref<32x32xf32, #tpu.memory_space<vmem>>) attributes {dimension_semantics = [#tpu.dimension_semantics<arbitrary>], iteration_bounds = array<i64: 1>, scalar_prefetch = 0 : i64, scratch_operands = 0 : i64, tpu.core_type = #tpu.core_type<tc>, window_params = [{pipeline_mode = #tpu.pipeline_mode<synchronous>, transform_indices = @transform_0, window_bounds = array<i64: 32, 512>}, {pipeline_mode = #tpu.pipeline_mode<synchronous>, transform_indices = @transform_1, window_bounds = array<i64: 512, 128>}, {pipeline_mode = #tpu.pipeline_mode<synchronous>, transform_indices = @transform_2, window_bounds = array<i64: 1, 32>}, {pipeline_mode = #tpu.pipeline_mode<synchronous>, transform_indices = @transform_3, window_bounds = array<i64: 1, 32>}, {pipeline_mode = #tpu.pipeline_mode<synchronous>, transform_indices = @transform_4, window_bounds = array<i64: 32, 32>}]} {
    %c0 = arith.constant 0 : index
    %c0_0 = arith.constant 0 : index
    %0 = vector.load %arg1[%c0, %c0_0] : memref<32x512xbf16, #tpu.memory_space<vmem>>, vector<32x512xbf16>
    %c0_1 = arith.constant 0 : index
    %c0_2 = arith.constant 0 : index
    %1 = vector.load %arg2[%c0_1, %c0_2] : memref<512x128xbf16, #tpu.memory_space<vmem>>, vector<512x128xbf16>
    %cst = arith.constant dense<0.000000e+00> : vector<32x128xf32>
    %2 = tpu.matmul %0, %1, %cst {dimension_numbers = #tpu.dot_dimension_numbers<[1], [0], [0], [1], [0, 0, 1, 1], [], []>} : vector<32x512xbf16>, vector<512x128xbf16>, vector<32x128xf32> -> vector<32x128xf32>
    %3 = vector.extract_strided_slice %2 {offsets = [0, 0], sizes = [32, 32], strides = [1, 1]} : vector<32x128xf32> to vector<32x32xf32>
    %cst_3 = arith.constant dense<0.000000e+00> : vector<32xf32>
    %4 = vector.multi_reduction <add>, %3, %cst_3 [0] : vector<32x32xf32> to vector<32xf32>
    %5 = vector.shape_cast %4 : vector<32xf32> to vector<1x32xf32>
    %6 = arith.mulf %3, %3 : vector<32x32xf32>
    %cst_4 = arith.constant dense<0.000000e+00> : vector<32xf32>
    %7 = vector.multi_reduction <add>, %6, %cst_4 [0] : vector<32x32xf32> to vector<32xf32>
    %8 = vector.shape_cast %7 : vector<32xf32> to vector<1x32xf32>
    %cst_5 = arith.constant 1.800000e+01 : f32
    %9 = vector.broadcast %cst_5 : f32 to vector<1x32xf32>
    %10 = arith.divf %5, %9 : vector<1x32xf32>
    %cst_6 = arith.constant 1.800000e+01 : f32
    %11 = vector.broadcast %cst_6 : f32 to vector<1x32xf32>
    %12 = arith.divf %8, %11 : vector<1x32xf32>
    %13 = arith.mulf %10, %10 : vector<1x32xf32>
    %14 = arith.subf %12, %13 : vector<1x32xf32>
    %cst_7 = arith.constant 0.000000e+00 : f32
    %15 = vector.broadcast %cst_7 : f32 to vector<1x32xf32>
    %16 = arith.maximumf %14, %15 : vector<1x32xf32>
    %c0_8 = arith.constant 0 : index
    %c0_9 = arith.constant 0 : index
    %17 = vector.load %arg3[%c0_8, %c0_9] : memref<1x32xf32, #tpu.memory_space<vmem>>, vector<1x32xf32>
    %cst_10 = arith.constant 9.99999974E-6 : f32
    %18 = vector.broadcast %cst_10 : f32 to vector<1x32xf32>
    %19 = arith.addf %16, %18 : vector<1x32xf32>
    %20 = math.rsqrt %19 : vector<1x32xf32>
    %21 = arith.mulf %17, %20 : vector<1x32xf32>
    %c0_11 = arith.constant 0 : index
    %c0_12 = arith.constant 0 : index
    %22 = vector.load %arg4[%c0_11, %c0_12] : memref<1x32xf32, #tpu.memory_space<vmem>>, vector<1x32xf32>
    %23 = arith.mulf %10, %21 : vector<1x32xf32>
    %24 = arith.subf %22, %23 : vector<1x32xf32>
    %25 = vector.broadcast %21 : vector<1x32xf32> to vector<32x32xf32>
    %26 = arith.mulf %3, %25 : vector<32x32xf32>
    %27 = vector.broadcast %24 : vector<1x32xf32> to vector<32x32xf32>
    %28 = arith.addf %26, %27 : vector<32x32xf32>
    %cst_13 = arith.constant 0.000000e+00 : f32
    %29 = vector.broadcast %cst_13 : f32 to vector<32x32xf32>
    %30 = arith.cmpf oge, %28, %29 : vector<32x32xf32>
    %cst_14 = arith.constant 2.000000e-01 : f32
    %31 = vector.broadcast %cst_14 : f32 to vector<32x32xf32>
    %32 = arith.mulf %31, %28 : vector<32x32xf32>
    %33 = arith.select %30, %28, %32 : vector<32x32xi1>, vector<32x32xf32>
    %c0_15 = arith.constant 0 : index
    %c0_16 = arith.constant 0 : index
    %34 = vector.load %arg5[%c0_15, %c0_16] : memref<32x32xf32, #tpu.memory_space<vmem>>, vector<32x32xf32>
    tpu.vector_store %arg5[%c0_15, %c0_16], %33 {strides = array<i32>} : memref<32x32xf32, #tpu.memory_space<vmem>>, vector<32x32xf32>,
    return
  }
  func.func @transform_0(%arg0: i32) -> (i32, i32) {
    %c0_i32 = arith.constant 0 : i32
    %c0_i32_0 = arith.constant 0 : i32
    %c0_i32_1 = arith.constant 0 : i32
    return %c0_i32, %c0_i32_0 : i32, i32
  }
  func.func @transform_1(%arg0: i32) -> (i32, i32) {
    %c0_i32 = arith.constant 0 : i32
    %c0_i32_0 = arith.constant 0 : i32
    %c0_i32_1 = arith.constant 0 : i32
    return %c0_i32, %c0_i32_0 : i32, i32
  }
  func.func @transform_2(%arg0: i32) -> (i32, i32) {
    %c0_i32 = arith.constant 0 : i32
    %c0_i32_0 = arith.constant 0 : i32
    %c0_i32_1 = arith.constant 0 : i32
    return %c0_i32, %c0_i32_0 : i32, i32
  }
  func.func @transform_3(%arg0: i32) -> (i32, i32) {
    %c0_i32 = arith.constant 0 : i32
    %c0_i32_0 = arith.constant 0 : i32
    %c0_i32_1 = arith.constant 0 : i32
    return %c0_i32, %c0_i32_0 : i32, i32
  }
  func.func @transform_4(%arg0: i32) -> (i32, i32) {
    %c0_i32 = arith.constant 0 : i32
    %c0_i32_0 = arith.constant 0 : i32
    %c0_i32_1 = arith.constant 0 : i32
    return %c0_i32, %c0_i32_0 : i32, i32
  }
}

module attributes {stable_mosaic.version = 11 : i64} {
  func.func @_mm_bias_act_kernel(%arg0: i32, %arg1: memref<16x512xbf16, #tpu.memory_space<vmem>>, %arg2: memref<512x128xbf16, #tpu.memory_space<vmem>>, %arg3: memref<1x128xf32, #tpu.memory_space<vmem>>, %arg4: memref<16x1xf32, #tpu.memory_space<vmem>>) attributes {dimension_semantics = [#tpu.dimension_semantics<parallel>], iteration_bounds = array<i64: 1>, scalar_prefetch = 0 : i64, scratch_operands = 0 : i64, tpu.core_type = #tpu.core_type<tc>, window_params = [{transform_indices = @transform_0, window_bounds = array<i64: 16, 512>}, {pipeline_mode = #tpu.pipeline_mode<synchronous>, transform_indices = @transform_1, window_bounds = array<i64: 512, 128>}, {pipeline_mode = #tpu.pipeline_mode<synchronous>, transform_indices = @transform_2, window_bounds = array<i64: 1, 128>}, {transform_indices = @transform_3, window_bounds = array<i64: 16, 1>}]} {
    %c0 = arith.constant 0 : index
    %c0_0 = arith.constant 0 : index
    %0 = vector.load %arg1[%c0, %c0_0] : memref<16x512xbf16, #tpu.memory_space<vmem>>, vector<16x512xbf16>
    %c0_1 = arith.constant 0 : index
    %c0_2 = arith.constant 0 : index
    %1 = vector.load %arg2[%c0_1, %c0_2] : memref<512x128xbf16, #tpu.memory_space<vmem>>, vector<512x128xbf16>
    %cst = arith.constant dense<0.000000e+00> : vector<16x128xf32>
    %2 = tpu.matmul %0, %1, %cst {dimension_numbers = #tpu.dot_dimension_numbers<[1], [0], [0], [1], [0, 0, 1, 1], [], []>} : vector<16x512xbf16>, vector<512x128xbf16>, vector<16x128xf32> -> vector<16x128xf32>
    %c0_3 = arith.constant 0 : index
    %c0_4 = arith.constant 0 : index
    %3 = vector.load %arg3[%c0_3, %c0_4] : memref<1x128xf32, #tpu.memory_space<vmem>>, vector<1x128xf32>
    %4 = vector.broadcast %3 : vector<1x128xf32> to vector<16x128xf32>
    %5 = arith.addf %2, %4 : vector<16x128xf32>
    %6 = vector.extract_strided_slice %5 {offsets = [0, 0], sizes = [16, 1], strides = [1, 1]} : vector<16x128xf32> to vector<16x1xf32>
    %c0_5 = arith.constant 0 : index
    %c0_6 = arith.constant 0 : index
    %7 = vector.load %arg4[%c0_5, %c0_6] : memref<16x1xf32, #tpu.memory_space<vmem>>, vector<16x1xf32>
    tpu.vector_store %arg4[%c0_5, %c0_6], %6 {strides = array<i32>} : memref<16x1xf32, #tpu.memory_space<vmem>>, vector<16x1xf32>,
    return
  }
  func.func @transform_0(%arg0: i32) -> (i32, i32) {
    %c0_i32 = arith.constant 0 : i32
    %c0_i32_0 = arith.constant 0 : i32
    return %arg0, %c0_i32 : i32, i32
  }
  func.func @transform_1(%arg0: i32) -> (i32, i32) {
    %c0_i32 = arith.constant 0 : i32
    %c0_i32_0 = arith.constant 0 : i32
    %c0_i32_1 = arith.constant 0 : i32
    return %c0_i32, %c0_i32_0 : i32, i32
  }
  func.func @transform_2(%arg0: i32) -> (i32, i32) {
    %c0_i32 = arith.constant 0 : i32
    %c0_i32_0 = arith.constant 0 : i32
    %c0_i32_1 = arith.constant 0 : i32
    return %c0_i32, %c0_i32_0 : i32, i32
  }
  func.func @transform_3(%arg0: i32) -> (i32, i32) {
    %c0_i32 = arith.constant 0 : i32
    %c0_i32_0 = arith.constant 0 : i32
    return %arg0, %c0_i32 : i32, i32
  }
}

</mosaic_0001>

<bundles_post_ra>
// kernel: discriminator_forward.5
= control target key start
LH: loop header
LB: loop body
LE: loop exit
PB: predicated region body
PF: predicated region fallthrough
CT: control target
= control target key end

     0   :  { %s2177_s9 = smov 0   ;;  %s2598_s0 = inlined_call_operand.vmem [shape: bf16[2048,64], index: 0, kind: input, shape index: {}]   ;;  %s2599_s1 = inlined_call_operand.vmem [shape: bf16[64,128], index: 1, kind: input, shape index: {}]   ;;  %s2600_s2 = inlined_call_operand.vmem [shape: f32[2048,8], index: 2, kind: output, shape index: {}]  }
   0x1 LB: > { %s1719_s10 = sadd.s32 4294967295, %s2160_s9   ;;  %p1723_p0 = scmp.ge.s32.totalorder %s2160_s9, 1  ;;  %s2160_s9 = sphi %s2177_s9, %s12_s9  }
   0x2   : > { %p113_p1 = scmp.lt.s32.totalorder %s2160_s9, 3 }
   0x4   : > { %p114_p2 = pnand %p1723_p0, %p113_p1 }
   0x5   : > { %s1724_s13 = sshll.u32 (!%p114_p2), %s1719_s10, 7 }
   0x6   : > { %117 = sbr.rel (%p114_p2) target bundleno = 413 (0x19d), region = 28  ;;  %p136_p3 = scmp.lt.s32.totalorder (!%p114_p2), %s1724_s13, 255 }
   0xb   : > { %v2133_v0 = vld [vmem:[%s2599_s1 + $0x18] sm:$0xff]  ;;  %v2132_v1 = vld [vmem:[%s2599_s1 + $0x10] sm:$0xff]  ;;  %s2602_s13 = smov (!%p136_p3, %s1724_s13), 255  ;;  %v2131_v2 = vld [vmem:[%s2599_s1 + $0x8] sm:$0xff]  ;;  %vm628_vm0 = vcmask 523264   ;;  %vm1534_vm1 = vcmask 64512  }
   0xc   : > { %825 = vmatpush.bf16.msra.mxu0 %v2133_v0  ;;  %2134 = vmatpush.bf16.msra.mxu1 %v2133_v0  ;;  %s1725_s18 = sshll.u32 %s2602_s13, 2  ;;  %v2130_v3 = vld [vmem:[%s2599_s1] sm:$0xff]  ;;  %s1727_s24 = sshll.u32 %s2602_s13, 3 }
   0xd   : > { %2135 = vmatpush.bf16.msra.mxu2 %v2133_v0  ;;  %2136 = vmatpush.bf16.msra.mxu3 %v2133_v0  ;;  %s2203_s23 = scalar_lea.vmem %s2598_s0, %s1725_s18  ;;  %s2277_s27 = scalar_lea.vmem %s2600_s2, %s1727_s24 }
   0xe   : > { %v2066_v4 = vld [vmem:[%s2203_s23] sm:$0xff]  ;;  %v2067_v8 = vld [vmem:[%s2203_s23 + $0x8] sm:$0xff]  ;;  %v2068_v12 = vld [vmem:[%s2203_s23 + $0x10] sm:$0xff] }
   0xf   : > { %v2082_v5 = vld [vmem:[%s2203_s23 + $0x80] sm:$0xff]  ;;  %v2083_v9 = vld [vmem:[%s2203_s23 + $0x88] sm:$0xff]  ;;  %v2084_v13 = vld [vmem:[%s2203_s23 + $0x90] sm:$0xff] }
  0x10   : > { %826 = vmatpush.bf16.msra.mxu0 %v2132_v1  ;;  %2137 = vmatpush.bf16.msra.mxu1 %v2132_v1  ;;  %v2098_v6 = vld [vmem:[%s2203_s23 + $0x100] sm:$0xff]  ;;  %v2099_v10 = vld [vmem:[%s2203_s23 + $0x108] sm:$0xff]  ;;  %v2100_v14 = vld [vmem:[%s2203_s23 + $0x110] sm:$0xff] }
  0x11   : > { %2138 = vmatpush.bf16.msra.mxu2 %v2132_v1  ;;  %2139 = vmatpush.bf16.msra.mxu3 %v2132_v1  ;;  %v2114_v7 = vld [vmem:[%s2203_s23 + $0x180] sm:$0xff]  ;;  %v2115_v11 = vld [vmem:[%s2203_s23 + $0x188] sm:$0xff]  ;;  %v2116_v15 = vld [vmem:[%s2203_s23 + $0x190] sm:$0xff] }
  0x12   : > { %v2069_v16 = vld [vmem:[%s2203_s23 + $0x18] sm:$0xff]  ;;  %v2070_v20 = vld [vmem:[%s2203_s23 + $0x20] sm:$0xff]  ;;  %v2071_v24 = vld [vmem:[%s2203_s23 + $0x28] sm:$0xff] }
  0x13   : > { %v2085_v17 = vld [vmem:[%s2203_s23 + $0x98] sm:$0xff]  ;;  %v2086_v21 = vld [vmem:[%s2203_s23 + $0xa0] sm:$0xff]  ;;  %v2087_v25 = vld [vmem:[%s2203_s23 + $0xa8] sm:$0xff] }
  0x14   : > { %827 = vmatpush.bf16.msra.mxu0 %v2131_v2  ;;  %2140 = vmatpush.bf16.msra.mxu1 %v2131_v2  ;;  %v2101_v18 = vld [vmem:[%s2203_s23 + $0x118] sm:$0xff]  ;;  %v2102_v22 = vld [vmem:[%s2203_s23 + $0x120] sm:$0xff]  ;;  %v2103_v26 = vld [vmem:[%s2203_s23 + $0x128] sm:$0xff] }
  0x15   : > { %2141 = vmatpush.bf16.msra.mxu2 %v2131_v2  ;;  %2142 = vmatpush.bf16.msra.mxu3 %v2131_v2  ;;  %v2117_v19 = vld [vmem:[%s2203_s23 + $0x198] sm:$0xff]  ;;  %v2118_v23 = vld [vmem:[%s2203_s23 + $0x1a0] sm:$0xff]  ;;  %v2119_v27 = vld [vmem:[%s2203_s23 + $0x1a8] sm:$0xff] }
  0x16   : > { %v2072_v28 = vld [vmem:[%s2203_s23 + $0x30] sm:$0xff]  ;;  %v2073_v32 = vld [vmem:[%s2203_s23 + $0x38] sm:$0xff]  ;;  %v2074_v36 = vld [vmem:[%s2203_s23 + $0x40] sm:$0xff] }
  0x17   : > { %v2088_v29 = vld [vmem:[%s2203_s23 + $0xb0] sm:$0xff]  ;;  %v2089_v33 = vld [vmem:[%s2203_s23 + $0xb8] sm:$0xff]  ;;  %v2090_v37 = vld [vmem:[%s2203_s23 + $0xc0] sm:$0xff] }
  0x18   : > { %828 = vmatpush.bf16.msra.mxu0 %v2130_v3  ;;  %2143 = vmatpush.bf16.msra.mxu1 %v2130_v3  ;;  %v2104_v30 = vld [vmem:[%s2203_s23 + $0x130] sm:$0xff]  ;;  %v2105_v34 = vld [vmem:[%s2203_s23 + $0x138] sm:$0xff]  ;;  %v2106_v40 = vld [vmem:[%s2203_s23 + $0x140] sm:$0xff] }
  0x19   : > { %2144 = vmatpush.bf16.msra.mxu2 %v2130_v3  ;;  %2145 = vmatpush.bf16.msra.mxu3 %v2130_v3  ;;  %v2120_v31 = vld [vmem:[%s2203_s23 + $0x1b0] sm:$0xff]  ;;  %v2121_v35 = vld [vmem:[%s2203_s23 + $0x1b8] sm:$0xff]  ;;  %v2122_v41 = vld [vmem:[%s2203_s23 + $0x1c0] sm:$0xff] }
  0x1a   : > { %v2075_v58 = vld [vmem:[%s2203_s23 + $0x48] sm:$0xff] }
  0x1b   : > { %2000 = vmatmul.msk.bf16.vlgmr.msra.gmra.mxu0 %vm628_vm0, %v2066_v4  ;;  %2016 = vmatmul.msk.bf16.vlgmr.msra.gmra.mxu1 %vm628_vm0, %v2082_v5  ;;  %v2091_v61 = vld [vmem:[%s2203_s23 + $0xc8] sm:$0xff] }
  0x1c   : > { %2032 = vmatmul.msk.bf16.vlgmr.msra.gmra.mxu2 %vm628_vm0, %v2098_v6  ;;  %2048 = vmatmul.msk.bf16.vlgmr.msra.gmra.mxu3 %vm628_vm0, %v2114_v7  ;;  %v2107_v62 = vld [vmem:[%s2203_s23 + $0x148] sm:$0xff] }
  0x1d   : > { %v2123_v63 = vld [vmem:[%s2203_s23 + $0x1c8] sm:$0xff] }
  0x2b   : > { %2001 = vmatmul.msk.bf16.gmra.mxu0 %vm628_vm0, %v2067_v8  ;;  %2017 = vmatmul.msk.bf16.gmra.mxu1 %vm628_vm0, %v2083_v9 }
  0x2c   : > { %2033 = vmatmul.msk.bf16.gmra.mxu2 %vm628_vm0, %v2099_v10  ;;  %2049 = vmatmul.msk.bf16.gmra.mxu3 %vm628_vm0, %v2115_v11 }
  0x3b   : > { %2002 = vmatmul.msk.bf16.gmra.mxu0 %vm628_vm0, %v2068_v12  ;;  %2018 = vmatmul.msk.bf16.gmra.mxu1 %vm628_vm0, %v2084_v13 }
  0x3c   : > { %2034 = vmatmul.msk.bf16.gmra.mxu2 %vm628_vm0, %v2100_v14  ;;  %2050 = vmatmul.msk.bf16.gmra.mxu3 %vm628_vm0, %v2116_v15 }
  0x4b   : > { %2003 = vmatmul.msk.bf16.gmra.mxu0 %vm628_vm0, %v2069_v16  ;;  %2019 = vmatmul.msk.bf16.gmra.mxu1 %vm628_vm0, %v2085_v17 }
  0x4c   : > { %2035 = vmatmul.msk.bf16.gmra.mxu2 %vm628_vm0, %v2101_v18  ;;  %2051 = vmatmul.msk.bf16.gmra.mxu3 %vm628_vm0, %v2117_v19 }
  0x5b   : > { %2004 = vmatmul.msk.bf16.gmra.mxu0 %vm628_vm0, %v2070_v20  ;;  %2020 = vmatmul.msk.bf16.gmra.mxu1 %vm628_vm0, %v2086_v21 }
  0x5c   : > { %2036 = vmatmul.msk.bf16.gmra.mxu2 %vm628_vm0, %v2102_v22  ;;  %2052 = vmatmul.msk.bf16.gmra.mxu3 %vm628_vm0, %v2118_v23  ;;  %v2076_v22 = vld [vmem:[%s2203_s23 + $0x50] sm:$0xff] }
  0x6b   : > { %2005 = vmatmul.msk.bf16.gmra.mxu0 %vm628_vm0, %v2071_v24  ;;  %2021 = vmatmul.msk.bf16.gmra.mxu1 %vm628_vm0, %v2087_v25  ;;  %v2092_v25 = vld [vmem:[%s2203_s23 + $0xd0] sm:$0xff] }
  0x6c   : > { %2037 = vmatmul.msk.bf16.gmra.mxu2 %vm628_vm0, %v2103_v26  ;;  %2053 = vmatmul.msk.bf16.gmra.mxu3 %vm628_vm0, %v2119_v27  ;;  %v2108_v26 = vld [vmem:[%s2203_s23 + $0x150] sm:$0xff] }
  0x6d   : > { %v2124_v27 = vld [vmem:[%s2203_s23 + $0x1d0] sm:$0xff] }
  0x7b   : > { %2006 = vmatmul.msk.bf16.gmra.mxu0 %vm628_vm0, %v2072_v28  ;;  %2022 = vmatmul.msk.bf16.gmra.mxu1 %vm628_vm0, %v2088_v29 }
  0x7c   : > { %2038 = vmatmul.msk.bf16.gmra.mxu2 %vm628_vm0, %v2104_v30  ;;  %2054 = vmatmul.msk.bf16.gmra.mxu3 %vm628_vm0, %v2120_v31 }
  0x8b   : > { %2007 = vmatmul.msk.bf16.gmra.mxu0 %vm628_vm0, %v2073_v32  ;;  %2023 = vmatmul.msk.bf16.gmra.mxu1 %vm628_vm0, %v2089_v33 }
  0x8c   : > { %2039 = vmatmul.msk.bf16.gmra.mxu2 %vm628_vm0, %v2105_v34  ;;  %2055 = vmatmul.msk.bf16.gmra.mxu3 %vm628_vm0, %v2121_v35 }
  0x98   : > { %v830_v38 = vpop.f32.mrf.mxu0  ;;  %v910_v39 = vpop.f32.mrf.mxu1 }
  0x99   : > { %vm1150_vm2 = vcmp.ge.f32.partialorder %v830_v38, 0.0  ;;  %v1278_v42 = vmul.f32 0.2, %v830_v38  ;;  %vm1182_vm3 = vcmp.ge.f32.partialorder %v910_v39, 0.0  ;;  %v1310_v43 = vmul.f32 0.2, %v910_v39 }
  0x9b   : > { %v1406_v44 = vsel %vm1150_vm2, %v830_v38, %v1278_v42  ;;  %v1438_v45 = vsel %vm1182_vm3, %v910_v39, %v1310_v43  ;;  %2008 = vmatmul.msk.bf16.gmra.mxu0 %vm628_vm0, %v2074_v36  ;;  %2024 = vmatmul.msk.bf16.gmra.mxu1 %vm628_vm0, %v2090_v37 }
  0x9c   : > { %1535 = vst.msk [vmem:[%s2277_s27] sm:$0xff] %vm1534_vm1, %v1406_v44  ;;  %2040 = vmatmul.msk.bf16.gmra.mxu2 %vm628_vm0, %v2106_v40  ;;  %2056 = vmatmul.msk.bf16.gmra.mxu3 %vm628_vm0, %v2122_v41 }
  0x9d   : > { %1567 = vst.msk [vmem:[%s2277_s27 + $0x100] sm:$0xff] %vm1534_vm1, %v1438_v45 }
  0x9f   : > { %v990_v46 = vpop.f32.mrf.mxu2  ;;  %v1070_v47 = vpop.f32.mrf.mxu3 }
  0xa0   : > { %vm1214_vm4 = vcmp.ge.f32.partialorder %v990_v46, 0.0  ;;  %v1342_v48 = vmul.f32 0.2, %v990_v46  ;;  %vm1246_vm5 = vcmp.ge.f32.partialorder %v1070_v47, 0.0  ;;  %v1374_v49 = vmul.f32 0.2, %v1070_v47  ;;  %v832_v50 = vpop.f32.mrf.mxu0  ;;  %v912_v51 = vpop.f32.mrf.mxu1 }
  0xa1   : > { %vm1151_vm6 = vcmp.ge.f32.partialorder %v832_v50, 0.0  ;;  %v1279_v52 = vmul.f32 0.2, %v832_v50  ;;  %vm1183_vm7 = vcmp.ge.f32.partialorder %v912_v51, 0.0  ;;  %v1311_v53 = vmul.f32 0.2, %v912_v51 }
  0xa2   : > { %v1470_v54 = vsel %vm1214_vm4, %v990_v46, %v1342_v48  ;;  %v1502_v55 = vsel %vm1246_vm5, %v1070_v47, %v1374_v49 }
  0xa3   : > { %1599 = vst.msk [vmem:[%s2277_s27 + $0x200] sm:$0xff] %vm1534_vm1, %v1470_v54  ;;  %v1407_v56 = vsel %vm1151_vm6, %v832_v50, %v1279_v52  ;;  %v1439_v57 = vsel %vm1183_vm7, %v912_v51, %v1311_v53  ;;  %v2077_v50 = vld [vmem:[%s2203_s23 + $0x58] sm:$0xff] }
  0xa4   : > { %1631 = vst.msk [vmem:[%s2277_s27 + $0x300] sm:$0xff] %vm1534_vm1, %v1502_v55  ;;  %v2093_v53 = vld [vmem:[%s2203_s23 + $0xd8] sm:$0xff] }
  0xa5   : > { %1536 = vst.msk [vmem:[%s2277_s27 + $0x8] sm:$0xff] %vm1534_vm1, %v1407_v56  ;;  %v2109_v54 = vld [vmem:[%s2203_s23 + $0x158] sm:$0xff] }
  0xa6   : > { %1568 = vst.msk [vmem:[%s2277_s27 + $0x108] sm:$0xff] %vm1534_vm1, %v1439_v57  ;;  %v2125_v55 = vld [vmem:[%s2203_s23 + $0x1d8] sm:$0xff] }
  0xa7   : > { %v992_v59 = vpop.f32.mrf.mxu2  ;;  %v1072_v60 = vpop.f32.mrf.mxu3 }
  0xa8   : > { %vm1215_vm8 = vcmp.ge.f32.partialorder %v992_v59, 0.0  ;;  %v1343_v0 = vmul.f32 0.2, %v992_v59  ;;  %vm1247_vm9 = vcmp.ge.f32.partialorder %v1072_v60, 0.0  ;;  %v1375_v1 = vmul.f32 0.2, %v1072_v60  ;;  %v835_v2 = vpop.f32.mrf.mxu0  ;;  %v915_v3 = vpop.f32.mrf.mxu1 }
  0xa9   : > { %vm1152_vm10 = vcmp.ge.f32.partialorder %v835_v2, 0.0  ;;  %v1280_v4 = vmul.f32 0.2, %v835_v2  ;;  %vm1184_vm11 = vcmp.ge.f32.partialorder %v915_v3, 0.0  ;;  %v1312_v5 = vmul.f32 0.2, %v915_v3 }
  0xaa   : > { %v1471_v6 = vsel %vm1215_vm8, %v992_v59, %v1343_v0  ;;  %v1503_v7 = vsel %vm1247_vm9, %v1072_v60, %v1375_v1 }
  0xab   : > { %1600 = vst.msk [vmem:[%s2277_s27 + $0x208] sm:$0xff] %vm1534_vm1, %v1471_v6  ;;  %v1408_v8 = vsel %vm1152_vm10, %v835_v2, %v1280_v4  ;;  %v1440_v9 = vsel %vm1184_vm11, %v915_v3, %v1312_v5  ;;  %2009 = vmatmul.msk.bf16.gmra.mxu0 %vm628_vm0, %v2075_v58  ;;  %2025 = vmatmul.msk.bf16.gmra.mxu1 %vm628_vm0, %v2091_v61 }
  0xac   : > { %1632 = vst.msk [vmem:[%s2277_s27 + $0x308] sm:$0xff] %vm1534_vm1, %v1503_v7  ;;  %2041 = vmatmul.msk.bf16.gmra.mxu2 %vm628_vm0, %v2107_v62  ;;  %2057 = vmatmul.msk.bf16.gmra.mxu3 %vm628_vm0, %v2123_v63 }
  0xad   : > { %1537 = vst.msk [vmem:[%s2277_s27 + $0x10] sm:$0xff] %vm1534_vm1, %v1408_v8 }
  0xae   : > { %1569 = vst.msk [vmem:[%s2277_s27 + $0x110] sm:$0xff] %vm1534_vm1, %v1440_v9 }
  0xaf   : > { %v995_v10 = vpop.f32.mrf.mxu2  ;;  %v1075_v11 = vpop.f32.mrf.mxu3 }
  0xb0   : > { %vm1216_vm12 = vcmp.ge.f32.partialorder %v995_v10, 0.0  ;;  %v1344_v12 = vmul.f32 0.2, %v995_v10  ;;  %vm1248_vm13 = vcmp.ge.f32.partialorder %v1075_v11, 0.0  ;;  %v1376_v13 = vmul.f32 0.2, %v1075_v11  ;;  %v837_v14 = vpop.f32.mrf.mxu0  ;;  %v917_v15 = vpop.f32.mrf.mxu1 }
  0xb1   : > { %vm1153_vm14 = vcmp.ge.f32.partialorder %v837_v14, 0.0  ;;  %v1281_v16 = vmul.f32 0.2, %v837_v14  ;;  %vm1185_vm15 = vcmp.ge.f32.partialorder %v917_v15, 0.0  ;;  %v1313_v17 = vmul.f32 0.2, %v917_v15 }
  0xb2   : > { %v1472_v18 = vsel %vm1216_vm12, %v995_v10, %v1344_v12  ;;  %v1504_v19 = vsel %vm1248_vm13, %v1075_v11, %v1376_v13 }
  0xb3   : > { %1601 = vst.msk [vmem:[%s2277_s27 + $0x210] sm:$0xff] %vm1534_vm1, %v1472_v18  ;;  %v1409_v20 = vsel %vm1153_vm14, %v837_v14, %v1281_v16  ;;  %v1441_v21 = vsel %vm1185_vm15, %v917_v15, %v1313_v17  ;;  %v2078_v14 = vld [vmem:[%s2203_s23 + $0x60] sm:$0xff] }
  0xb4   : > { %1633 = vst.msk [vmem:[%s2277_s27 + $0x310] sm:$0xff] %vm1534_vm1, %v1504_v19  ;;  %v2094_v17 = vld [vmem:[%s2203_s23 + $0xe0] sm:$0xff] }
  0xb5   : > { %1538 = vst.msk [vmem:[%s2277_s27 + $0x18] sm:$0xff] %vm1534_vm1, %v1409_v20  ;;  %v2110_v18 = vld [vmem:[%s2203_s23 + $0x160] sm:$0xff] }
  0xb6   : > { %1570 = vst.msk [vmem:[%s2277_s27 + $0x118] sm:$0xff] %vm1534_vm1, %v1441_v21  ;;  %v2126_v19 = vld [vmem:[%s2203_s23 + $0x1e0] sm:$0xff] }
  0xb7   : > { %v997_v23 = vpop.f32.mrf.mxu2  ;;  %v1077_v24 = vpop.f32.mrf.mxu3 }
  0xb8   : > { %vm1217_vm2 = vcmp.ge.f32.partialorder %v997_v23, 0.0  ;;  %v1345_v28 = vmul.f32 0.2, %v997_v23  ;;  %vm1249_vm3 = vcmp.ge.f32.partialorder %v1077_v24, 0.0  ;;  %v1377_v29 = vmul.f32 0.2, %v1077_v24  ;;  %v840_v30 = vpop.f32.mrf.mxu0  ;;  %v920_v31 = vpop.f32.mrf.mxu1 }
  0xb9   : > { %vm1154_vm4 = vcmp.ge.f32.partialorder %v840_v30, 0.0  ;;  %v1282_v32 = vmul.f32 0.2, %v840_v30  ;;  %vm1186_vm5 = vcmp.ge.f32.partialorder %v920_v31, 0.0  ;;  %v1314_v33 = vmul.f32 0.2, %v920_v31 }
  0xba   : > { %v1473_v34 = vsel %vm1217_vm2, %v997_v23, %v1345_v28  ;;  %v1505_v35 = vsel %vm1249_vm3, %v1077_v24, %v1377_v29 }
  0xbb   : > { %1602 = vst.msk [vmem:[%s2277_s27 + $0x218] sm:$0xff] %vm1534_vm1, %v1473_v34  ;;  %v1410_v36 = vsel %vm1154_vm4, %v840_v30, %v1282_v32  ;;  %v1442_v37 = vsel %vm1186_vm5, %v920_v31, %v1314_v33  ;;  %2010 = vmatmul.msk.bf16.gmra.mxu0 %vm628_vm0, %v2076_v22  ;;  %2026 = vmatmul.msk.bf16.gmra.mxu1 %vm628_vm0, %v2092_v25 }
  0xbc   : > { %1634 = vst.msk [vmem:[%s2277_s27 + $0x318] sm:$0xff] %vm1534_vm1, %v1505_v35  ;;  %2042 = vmatmul.msk.bf16.gmra.mxu2 %vm628_vm0, %v2108_v26  ;;  %2058 = vmatmul.msk.bf16.gmra.mxu3 %vm628_vm0, %v2124_v27 }
  0xbd   : > { %1539 = vst.msk [vmem:[%s2277_s27 + $0x20] sm:$0xff] %vm1534_vm1, %v1410_v36 }
  0xbe   : > { %1571 = vst.msk [vmem:[%s2277_s27 + $0x120] sm:$0xff] %vm1534_vm1, %v1442_v37 }
  0xbf   : > { %v1000_v38 = vpop.f32.mrf.mxu2  ;;  %v1080_v39 = vpop.f32.mrf.mxu3 }
  0xc0   : > { %vm1218_vm6 = vcmp.ge.f32.partialorder %v1000_v38, 0.0  ;;  %v1346_v40 = vmul.f32 0.2, %v1000_v38  ;;  %vm1250_vm7 = vcmp.ge.f32.partialorder %v1080_v39, 0.0  ;;  %v1378_v41 = vmul.f32 0.2, %v1080_v39  ;;  %v842_v42 = vpop.f32.mrf.mxu0  ;;  %v922_v43 = vpop.f32.mrf.mxu1 }
  0xc1   : > { %vm1155_vm8 = vcmp.ge.f32.partialorder %v842_v42, 0.0  ;;  %v1283_v44 = vmul.f32 0.2, %v842_v42  ;;  %vm1187_vm9 = vcmp.ge.f32.partialorder %v922_v43, 0.0  ;;  %v1315_v45 = vmul.f32 0.2, %v922_v43 }
  0xc2   : > { %v1474_v46 = vsel %vm1218_vm6, %v1000_v38, %v1346_v40  ;;  %v1506_v47 = vsel %vm1250_vm7, %v1080_v39, %v1378_v41 }
  0xc3   : > { %1603 = vst.msk [vmem:[%s2277_s27 + $0x220] sm:$0xff] %vm1534_vm1, %v1474_v46  ;;  %v1411_v48 = vsel %vm1155_vm8, %v842_v42, %v1283_v44  ;;  %v1443_v49 = vsel %vm1187_vm9, %v922_v43, %v1315_v45  ;;  %v2079_v42 = vld [vmem:[%s2203_s23 + $0x68] sm:$0xff] }
  0xc4   : > { %1635 = vst.msk [vmem:[%s2277_s27 + $0x320] sm:$0xff] %vm1534_vm1, %v1506_v47  ;;  %v2095_v45 = vld [vmem:[%s2203_s23 + $0xe8] sm:$0xff] }
  0xc5   : > { %1540 = vst.msk [vmem:[%s2277_s27 + $0x28] sm:$0xff] %vm1534_vm1, %v1411_v48  ;;  %v2111_v46 = vld [vmem:[%s2203_s23 + $0x168] sm:$0xff] }
  0xc6   : > { %1572 = vst.msk [vmem:[%s2277_s27 + $0x128] sm:$0xff] %vm1534_vm1, %v1443_v49  ;;  %v2127_v47 = vld [vmem:[%s2203_s23 + $0x1e8] sm:$0xff] }
  0xc7   : > { %v1002_v51 = vpop.f32.mrf.mxu2  ;;  %v1082_v52 = vpop.f32.mrf.mxu3 }
  0xc8   : > { %vm1219_vm10 = vcmp.ge.f32.partialorder %v1002_v51, 0.0  ;;  %v1347_v56 = vmul.f32 0.2, %v1002_v51  ;;  %vm1251_vm11 = vcmp.ge.f32.partialorder %v1082_v52, 0.0  ;;  %v1379_v57 = vmul.f32 0.2, %v1082_v52  ;;  %v845_v58 = vpop.f32.mrf.mxu0  ;;  %v925_v59 = vpop.f32.mrf.mxu1 }
  0xc9   : > { %vm1156_vm12 = vcmp.ge.f32.partialorder %v845_v58, 0.0  ;;  %v1284_v60 = vmul.f32 0.2, %v845_v58  ;;  %vm1188_vm13 = vcmp.ge.f32.partialorder %v925_v59, 0.0  ;;  %v1316_v61 = vmul.f32 0.2, %v925_v59 }
  0xca   : > { %v1475_v62 = vsel %vm1219_vm10, %v1002_v51, %v1347_v56  ;;  %v1507_v63 = vsel %vm1251_vm11, %v1082_v52, %v1379_v57 }
  0xcb   : > { %1604 = vst.msk [vmem:[%s2277_s27 + $0x228] sm:$0xff] %vm1534_vm1, %v1475_v62  ;;  %v1412_v0 = vsel %vm1156_vm12, %v845_v58, %v1284_v60  ;;  %v1444_v1 = vsel %vm1188_vm13, %v925_v59, %v1316_v61  ;;  %2011 = vmatmul.msk.bf16.gmra.mxu0 %vm628_vm0, %v2077_v50  ;;  %2027 = vmatmul.msk.bf16.gmra.mxu1 %vm628_vm0, %v2093_v53 }
  0xcc   : > { %1636 = vst.msk [vmem:[%s2277_s27 + $0x328] sm:$0xff] %vm1534_vm1, %v1507_v63  ;;  %2043 = vmatmul.msk.bf16.gmra.mxu2 %vm628_vm0, %v2109_v54  ;;  %2059 = vmatmul.msk.bf16.gmra.mxu3 %vm628_vm0, %v2125_v55 }
  0xcd   : > { %1541 = vst.msk [vmem:[%s2277_s27 + $0x30] sm:$0xff] %vm1534_vm1, %v1412_v0 }
  0xce   : > { %1573 = vst.msk [vmem:[%s2277_s27 + $0x130] sm:$0xff] %vm1534_vm1, %v1444_v1 }
  0xcf   : > { %v1005_v2 = vpop.f32.mrf.mxu2  ;;  %v1085_v3 = vpop.f32.mrf.mxu3 }
  0xd0   : > { %vm1220_vm14 = vcmp.ge.f32.partialorder %v1005_v2, 0.0  ;;  %v1348_v4 = vmul.f32 0.2, %v1005_v2  ;;  %vm1252_vm15 = vcmp.ge.f32.partialorder %v1085_v3, 0.0  ;;  %v1380_v5 = vmul.f32 0.2, %v1085_v3  ;;  %v847_v6 = vpop.f32.mrf.mxu0  ;;  %v927_v7 = vpop.f32.mrf.mxu1 }
  0xd1   : > { %vm1157_vm2 = vcmp.ge.f32.partialorder %v847_v6, 0.0  ;;  %v1285_v8 = vmul.f32 0.2, %v847_v6  ;;  %vm1189_vm3 = vcmp.ge.f32.partialorder %v927_v7, 0.0  ;;  %v1317_v9 = vmul.f32 0.2, %v927_v7 }
  0xd2   : > { %v1476_v10 = vsel %vm1220_vm14, %v1005_v2, %v1348_v4  ;;  %v1508_v11 = vsel %vm1252_vm15, %v1085_v3, %v1380_v5 }
  0xd3   : > { %1605 = vst.msk [vmem:[%s2277_s27 + $0x230] sm:$0xff] %vm1534_vm1, %v1476_v10  ;;  %v1413_v12 = vsel %vm1157_vm2, %v847_v6, %v1285_v8  ;;  %v1445_v13 = vsel %vm1189_vm3, %v927_v7, %v1317_v9  ;;  %v2080_v6 = vld [vmem:[%s2203_s23 + $0x70] sm:$0xff] }
  0xd4   : > { %1637 = vst.msk [vmem:[%s2277_s27 + $0x330] sm:$0xff] %vm1534_vm1, %v1508_v11  ;;  %v2096_v9 = vld [vmem:[%s2203_s23 + $0xf0] sm:$0xff] }
  0xd5   : > { %1542 = vst.msk [vmem:[%s2277_s27 + $0x38] sm:$0xff] %vm1534_vm1, %v1413_v12  ;;  %v2112_v10 = vld [vmem:[%s2203_s23 + $0x170] sm:$0xff] }
  0xd6   : > { %1574 = vst.msk [vmem:[%s2277_s27 + $0x138] sm:$0xff] %vm1534_vm1, %v1445_v13  ;;  %v2128_v11 = vld [vmem:[%s2203_s23 + $0x1f0] sm:$0xff] }
  0xd7   : > { %v1007_v15 = vpop.f32.mrf.mxu2  ;;  %v1087_v16 = vpop.f32.mrf.mxu3 }
  0xd8   : > { %vm1221_vm4 = vcmp.ge.f32.partialorder %v1007_v15, 0.0  ;;  %v1349_v20 = vmul.f32 0.2, %v1007_v15  ;;  %vm1253_vm5 = vcmp.ge.f32.partialorder %v1087_v16, 0.0  ;;  %v1381_v21 = vmul.f32 0.2, %v1087_v16  ;;  %v850_v22 = vpop.f32.mrf.mxu0  ;;  %v930_v23 = vpop.f32.mrf.mxu1 }
  0xd9   : > { %vm1158_vm6 = vcmp.ge.f32.partialorder %v850_v22, 0.0  ;;  %v1286_v24 = vmul.f32 0.2, %v850_v22  ;;  %vm1190_vm7 = vcmp.ge.f32.partialorder %v930_v23, 0.0  ;;  %v1318_v25 = vmul.f32 0.2, %v930_v23 }
  0xda   : > { %v1477_v26 = vsel %vm1221_vm4, %v1007_v15, %v1349_v20  ;;  %v1509_v27 = vsel %vm1253_vm5, %v1087_v16, %v1381_v21 }
  0xdb   : > { %1606 = vst.msk [vmem:[%s2277_s27 + $0x238] sm:$0xff] %vm1534_vm1, %v1477_v26  ;;  %v1414_v28 = vsel %vm1158_vm6, %v850_v22, %v1286_v24  ;;  %v1446_v29 = vsel %vm1190_vm7, %v930_v23, %v1318_v25  ;;  %2012 = vmatmul.msk.bf16.gmra.mxu0 %vm628_vm0, %v2078_v14  ;;  %2028 = vmatmul.msk.bf16.gmra.mxu1 %vm628_vm0, %v2094_v17 }
  0xdc   : > { %1638 = vst.msk [vmem:[%s2277_s27 + $0x338] sm:$0xff] %vm1534_vm1, %v1509_v27  ;;  %2044 = vmatmul.msk.bf16.gmra.mxu2 %vm628_vm0, %v2110_v18  ;;  %2060 = vmatmul.msk.bf16.gmra.mxu3 %vm628_vm0, %v2126_v19 }
  0xdd   : > { %1543 = vst.msk [vmem:[%s2277_s27 + $0x40] sm:$0xff] %vm1534_vm1, %v1414_v28 }
  0xde   : > { %1575 = vst.msk [vmem:[%s2277_s27 + $0x140] sm:$0xff] %vm1534_vm1, %v1446_v29 }
  0xdf   : > { %v1010_v30 = vpop.f32.mrf.mxu2  ;;  %v1090_v31 = vpop.f32.mrf.mxu3 }
  0xe0   : > { %vm1222_vm8 = vcmp.ge.f32.partialorder %v1010_v30, 0.0  ;;  %v1350_v32 = vmul.f32 0.2, %v1010_v30  ;;  %vm1254_vm9 = vcmp.ge.f32.partialorder %v1090_v31, 0.0  ;;  %v1382_v33 = vmul.f32 0.2, %v1090_v31  ;;  %v852_v34 = vpop.f32.mrf.mxu0  ;;  %v932_v35 = vpop.f32.mrf.mxu1 }
  0xe1   : > { %vm1159_vm10 = vcmp.ge.f32.partialorder %v852_v34, 0.0  ;;  %v1287_v36 = vmul.f32 0.2, %v852_v34  ;;  %vm1191_vm11 = vcmp.ge.f32.partialorder %v932_v35, 0.0  ;;  %v1319_v37 = vmul.f32 0.2, %v932_v35 }
  0xe2   : > { %v1478_v38 = vsel %vm1222_vm8, %v1010_v30, %v1350_v32  ;;  %v1510_v39 = vsel %vm1254_vm9, %v1090_v31, %v1382_v33 }
  0xe3   : > { %1607 = vst.msk [vmem:[%s2277_s27 + $0x240] sm:$0xff] %vm1534_vm1, %v1478_v38  ;;  %v1415_v40 = vsel %vm1159_vm10, %v852_v34, %v1287_v36  ;;  %v1447_v41 = vsel %vm1191_vm11, %v932_v35, %v1319_v37  ;;  %v2081_v34 = vld [vmem:[%s2203_s23 + $0x78] sm:$0xff] }
  0xe4   : > { %1639 = vst.msk [vmem:[%s2277_s27 + $0x340] sm:$0xff] %vm1534_vm1, %v1510_v39  ;;  %v2097_v37 = vld [vmem:[%s2203_s23 + $0xf8] sm:$0xff] }
  0xe5   : > { %1544 = vst.msk [vmem:[%s2277_s27 + $0x48] sm:$0xff] %vm1534_vm1, %v1415_v40  ;;  %v2113_v38 = vld [vmem:[%s2203_s23 + $0x178] sm:$0xff] }
  0xe6   : > { %1576 = vst.msk [vmem:[%s2277_s27 + $0x148] sm:$0xff] %vm1534_vm1, %v1447_v41  ;;  %v2129_v39 = vld [vmem:[%s2203_s23 + $0x1f8] sm:$0xff] }
  0xe7   : > { %v1012_v43 = vpop.f32.mrf.mxu2  ;;  %v1092_v44 = vpop.f32.mrf.mxu3 }
  0xe8   : > { %vm1223_vm12 = vcmp.ge.f32.partialorder %v1012_v43, 0.0  ;;  %v1351_v48 = vmul.f32 0.2, %v1012_v43  ;;  %vm1255_vm13 = vcmp.ge.f32.partialorder %v1092_v44, 0.0  ;;  %v1383_v49 = vmul.f32 0.2, %v1092_v44  ;;  %v855_v50 = vpop.f32.mrf.mxu0  ;;  %v935_v51 = vpop.f32.mrf.mxu1 }
  0xe9   : > { %vm1160_vm14 = vcmp.ge.f32.partialorder %v855_v50, 0.0  ;;  %v1288_v52 = vmul.f32 0.2, %v855_v50  ;;  %vm1192_vm15 = vcmp.ge.f32.partialorder %v935_v51, 0.0  ;;  %v1320_v53 = vmul.f32 0.2, %v935_v51 }
  0xea   : > { %v1479_v54 = vsel %vm1223_vm12, %v1012_v43, %v1351_v48  ;;  %v1511_v55 = vsel %vm1255_vm13, %v1092_v44, %v1383_v49 }
  0xeb   : > { %1608 = vst.msk [vmem:[%s2277_s27 + $0x248] sm:$0xff] %vm1534_vm1, %v1479_v54  ;;  %v1416_v56 = vsel %vm1160_vm14, %v855_v50, %v1288_v52  ;;  %v1448_v57 = vsel %vm1192_vm15, %v935_v51, %v1320_v53  ;;  %2013 = vmatmul.msk.bf16.gmra.mxu0 %vm628_vm0, %v2079_v42  ;;  %2029 = vmatmul.msk.bf16.gmra.mxu1 %vm628_vm0, %v2095_v45 }
  0xec   : > { %1640 = vst.msk [vmem:[%s2277_s27 + $0x348] sm:$0xff] %vm1534_vm1, %v1511_v55  ;;  %2045 = vmatmul.msk.bf16.gmra.mxu2 %vm628_vm0, %v2111_v46  ;;  %2061 = vmatmul.msk.bf16.gmra.mxu3 %vm628_vm0, %v2127_v47 }
  0xed   : > { %1545 = vst.msk [vmem:[%s2277_s27 + $0x50] sm:$0xff] %vm1534_vm1, %v1416_v56 }
  0xee   : > { %1577 = vst.msk [vmem:[%s2277_s27 + $0x150] sm:$0xff] %vm1534_vm1, %v1448_v57 }
  0xef   : > { %v1015_v58 = vpop.f32.mrf.mxu2  ;;  %v1095_v59 = vpop.f32.mrf.mxu3 }
  0xf0   : > { %vm1224_vm2 = vcmp.ge.f32.partialorder %v1015_v58, 0.0  ;;  %v1352_v60 = vmul.f32 0.2, %v1015_v58  ;;  %vm1256_vm3 = vcmp.ge.f32.partialorder %v1095_v59, 0.0  ;;  %v1384_v61 = vmul.f32 0.2, %v1095_v59  ;;  %v857_v62 = vpop.f32.mrf.mxu0  ;;  %v937_v63 = vpop.f32.mrf.mxu1 }
  0xf1   : > { %vm1161_vm4 = vcmp.ge.f32.partialorder %v857_v62, 0.0  ;;  %v1289_v0 = vmul.f32 0.2, %v857_v62  ;;  %vm1193_vm5 = vcmp.ge.f32.partialorder %v937_v63, 0.0  ;;  %v1321_v1 = vmul.f32 0.2, %v937_v63 }
  0xf2   : > { %v1480_v2 = vsel %vm1224_vm2, %v1015_v58, %v1352_v60  ;;  %v1512_v3 = vsel %vm1256_vm3, %v1095_v59, %v1384_v61 }
  0xf3   : > { %1609 = vst.msk [vmem:[%s2277_s27 + $0x250] sm:$0xff] %vm1534_vm1, %v1480_v2  ;;  %v1417_v4 = vsel %vm1161_vm4, %v857_v62, %v1289_v0  ;;  %v1449_v5 = vsel %vm1193_vm5, %v937_v63, %v1321_v1 }
  0xf4   : > { %1641 = vst.msk [vmem:[%s2277_s27 + $0x350] sm:$0xff] %vm1534_vm1, %v1512_v3 }
  0xf5   : > { %1546 = vst.msk [vmem:[%s2277_s27 + $0x58] sm:$0xff] %vm1534_vm1, %v1417_v4 }
  0xf6   : > { %1578 = vst.msk [vmem:[%s2277_s27 + $0x158] sm:$0xff] %vm1534_vm1, %v1449_v5 }
  0xf7   : > { %v1017_v7 = vpop.f32.mrf.mxu2  ;;  %v1097_v8 = vpop.f32.mrf.mxu3 }
  0xf8   : > { %vm1225_vm6 = vcmp.ge.f32.partialorder %v1017_v7, 0.0  ;;  %v1353_v12 = vmul.f32 0.2, %v1017_v7  ;;  %vm1257_vm7 = vcmp.ge.f32.partialorder %v1097_v8, 0.0  ;;  %v1385_v13 = vmul.f32 0.2, %v1097_v8  ;;  %v860_v14 = vpop.f32.mrf.mxu0  ;;  %v940_v15 = vpop.f32.mrf.mxu1 }
  0xf9   : > { %vm1162_vm8 = vcmp.ge.f32.partialorder %v860_v14, 0.0  ;;  %v1290_v16 = vmul.f32 0.2, %v860_v14  ;;  %vm1194_vm9 = vcmp.ge.f32.partialorder %v940_v15, 0.0  ;;  %v1322_v17 = vmul.f32 0.2, %v940_v15 }
  0xfa   : > { %v1481_v18 = vsel %vm1225_vm6, %v1017_v7, %v1353_v12  ;;  %v1513_v19 = vsel %vm1257_vm7, %v1097_v8, %v1385_v13 }
  0xfb   : > { %1610 = vst.msk [vmem:[%s2277_s27 + $0x258] sm:$0xff] %vm1534_vm1, %v1481_v18  ;;  %v1418_v20 = vsel %vm1162_vm8, %v860_v14, %v1290_v16  ;;  %v1450_v21 = vsel %vm1194_vm9, %v940_v15, %v1322_v17  ;;  %2014 = vmatmul.msk.bf16.gmra.mxu0 %vm628_vm0, %v2080_v6  ;;  %2030 = vmatmul.msk.bf16.gmra.mxu1 %vm628_vm0, %v2096_v9 }
  0xfc   : > { %1642 = vst.msk [vmem:[%s2277_s27 + $0x358] sm:$0xff] %vm1534_vm1, %v1513_v19  ;;  %2046 = vmatmul.msk.bf16.gmra.mxu2 %vm628_vm0, %v2112_v10  ;;  %2062 = vmatmul.msk.bf16.gmra.mxu3 %vm628_vm0, %v2128_v11 }
  0xfd   : > { %1547 = vst.msk [vmem:[%s2277_s27 + $0x60] sm:$0xff] %vm1534_vm1, %v1418_v20 }
  0xfe   : > { %1579 = vst.msk [vmem:[%s2277_s27 + $0x160] sm:$0xff] %vm1534_vm1, %v1450_v21 }
  0xff   : > { %v1020_v22 = vpop.f32.mrf.mxu2  ;;  %v1100_v23 = vpop.f32.mrf.mxu3 }
 0x100   : > { %vm1226_vm10 = vcmp.ge.f32.partialorder %v1020_v22, 0.0  ;;  %v1354_v24 = vmul.f32 0.2, %v1020_v22  ;;  %vm1258_vm11 = vcmp.ge.f32.partialorder %v1100_v23, 0.0  ;;  %v1386_v25 = vmul.f32 0.2, %v1100_v23  ;;  %v862_v26 = vpop.f32.mrf.mxu0  ;;  %v942_v27 = vpop.f32.mrf.mxu1 }
 0x101   : > { %vm1163_vm12 = vcmp.ge.f32.partialorder %v862_v26, 0.0  ;;  %v1291_v28 = vmul.f32 0.2, %v862_v26  ;;  %vm1195_vm13 = vcmp.ge.f32.partialorder %v942_v27, 0.0  ;;  %v1323_v29 = vmul.f32 0.2, %v942_v27 }
 0x102   : > { %v1482_v30 = vsel %vm1226_vm10, %v1020_v22, %v1354_v24  ;;  %v1514_v31 = vsel %vm1258_vm11, %v1100_v23, %v1386_v25 }
 0x103   : > { %1611 = vst.msk [vmem:[%s2277_s27 + $0x260] sm:$0xff] %vm1534_vm1, %v1482_v30  ;;  %v1419_v32 = vsel %vm1163_vm12, %v862_v26, %v1291_v28  ;;  %v1451_v33 = vsel %vm1195_vm13, %v942_v27, %v1323_v29 }
 0x104   : > { %1643 = vst.msk [vmem:[%s2277_s27 + $0x360] sm:$0xff] %vm1534_vm1, %v1514_v31 }
 0x105   : > { %1548 = vst.msk [vmem:[%s2277_s27 + $0x68] sm:$0xff] %vm1534_vm1, %v1419_v32 }
 0x106   : > { %1580 = vst.msk [vmem:[%s2277_s27 + $0x168] sm:$0xff] %vm1534_vm1, %v1451_v33 }
 0x107   : > { %v1022_v35 = vpop.f32.mrf.mxu2  ;;  %v1102_v36 = vpop.f32.mrf.mxu3 }
 0x108   : > { %vm1227_vm14 = vcmp.ge.f32.partialorder %v1022_v35, 0.0  ;;  %v1355_v40 = vmul.f32 0.2, %v1022_v35  ;;  %vm1259_vm15 = vcmp.ge.f32.partialorder %v1102_v36, 0.0  ;;  %v1387_v41 = vmul.f32 0.2, %v1102_v36  ;;  %v865_v42 = vpop.f32.mrf.mxu0  ;;  %v945_v43 = vpop.f32.mrf.mxu1 }
 0x109   : > { %vm1164_vm2 = vcmp.ge.f32.partialorder %v865_v42, 0.0  ;;  %v1292_v44 = vmul.f32 0.2, %v865_v42  ;;  %vm1196_vm3 = vcmp.ge.f32.partialorder %v945_v43, 0.0  ;;  %v1324_v45 = vmul.f32 0.2, %v945_v43 }
 0x10a   : > { %v1483_v46 = vsel %vm1227_vm14, %v1022_v35, %v1355_v40  ;;  %v1515_v47 = vsel %vm1259_vm15, %v1102_v36, %v1387_v41 }
 0x10b   : > { %1612 = vst.msk [vmem:[%s2277_s27 + $0x268] sm:$0xff] %vm1534_vm1, %v1483_v46  ;;  %v1420_v48 = vsel %vm1164_vm2, %v865_v42, %v1292_v44  ;;  %v1452_v49 = vsel %vm1196_vm3, %v945_v43, %v1324_v45  ;;  %2015 = vmatmul.msk.bf16.gmra.mxu0 %vm628_vm0, %v2081_v34  ;;  %2031 = vmatmul.msk.bf16.gmra.mxu1 %vm628_vm0, %v2097_v37 }
 0x10c   : > { %1644 = vst.msk [vmem:[%s2277_s27 + $0x368] sm:$0xff] %vm1534_vm1, %v1515_v47  ;;  %2047 = vmatmul.msk.bf16.gmra.mxu2 %vm628_vm0, %v2113_v38  ;;  %2063 = vmatmul.msk.bf16.gmra.mxu3 %vm628_vm0, %v2129_v39 }
 0x10d   : > { %1549 = vst.msk [vmem:[%s2277_s27 + $0x70] sm:$0xff] %vm1534_vm1, %v1420_v48 }
 0x10e   : > { %1581 = vst.msk [vmem:[%s2277_s27 + $0x170] sm:$0xff] %vm1534_vm1, %v1452_v49 }
 0x10f   : > { %v1025_v50 = vpop.f32.mrf.mxu2  ;;  %v1105_v51 = vpop.f32.mrf.mxu3 }
 0x110   : > { %vm1228_vm4 = vcmp.ge.f32.partialorder %v1025_v50, 0.0  ;;  %v1356_v52 = vmul.f32 0.2, %v1025_v50  ;;  %vm1260_vm5 = vcmp.ge.f32.partialorder %v1105_v51, 0.0  ;;  %v1388_v53 = vmul.f32 0.2, %v1105_v51  ;;  %v867_v54 = vpop.f32.mrf.mxu0  ;;  %v947_v55 = vpop.f32.mrf.mxu1 }
 0x111   : > { %vm1165_vm6 = vcmp.ge.f32.partialorder %v867_v54, 0.0  ;;  %v1293_v56 = vmul.f32 0.2, %v867_v54  ;;  %vm1197_vm7 = vcmp.ge.f32.partialorder %v947_v55, 0.0  ;;  %v1325_v57 = vmul.f32 0.2, %v947_v55 }
 0x112   : > { %v1484_v58 = vsel %vm1228_vm4, %v1025_v50, %v1356_v52  ;;  %v1516_v59 = vsel %vm1260_vm5, %v1105_v51, %v1388_v53 }
 0x113   : > { %1613 = vst.msk [vmem:[%s2277_s27 + $0x270] sm:$0xff] %vm1534_vm1, %v1484_v58  ;;  %v1421_v60 = vsel %vm1165_vm6, %v867_v54, %v1293_v56  ;;  %v1453_v61 = vsel %vm1197_vm7, %v947_v55, %v1325_v57 }
 0x114   : > { %1645 = vst.msk [vmem:[%s2277_s27 + $0x370] sm:$0xff] %vm1534_vm1, %v1516_v59 }
 0x115   : > { %1550 = vst.msk [vmem:[%s2277_s27 + $0x78] sm:$0xff] %vm1534_vm1, %v1421_v60 }
 0x116   : > { %1582 = vst.msk [vmem:[%s2277_s27 + $0x178] sm:$0xff] %vm1534_vm1, %v1453_v61 }
 0x117   : > { %v1027_v62 = vpop.f32.mrf.mxu2  ;;  %v1107_v63 = vpop.f32.mrf.mxu3 }
 0x118   : > { %vm1229_vm0 = vcmp.ge.f32.partialorder %v1027_v62, 0.0  ;;  %v1357_v0 = vmul.f32 0.2, %v1027_v62  ;;  %vm1261_vm8 = vcmp.ge.f32.partialorder %v1107_v63, 0.0  ;;  %v1389_v1 = vmul.f32 0.2, %v1107_v63  ;;  %v870_v2 = vpop.f32.mrf.mxu0  ;;  %v950_v3 = vpop.f32.mrf.mxu1 }
 0x119   : > { %vm1166_vm9 = vcmp.ge.f32.partialorder %v870_v2, 0.0  ;;  %v1294_v4 = vmul.f32 0.2, %v870_v2  ;;  %vm1198_vm10 = vcmp.ge.f32.partialorder %v950_v3, 0.0  ;;  %v1326_v5 = vmul.f32 0.2, %v950_v3 }
 0x11a   : > { %v1485_v6 = vsel %vm1229_vm0, %v1027_v62, %v1357_v0  ;;  %v1517_v7 = vsel %vm1261_vm8, %v1107_v63, %v1389_v1 }
 0x11b   : > { %1614 = vst.msk [vmem:[%s2277_s27 + $0x278] sm:$0xff] %vm1534_vm1, %v1485_v6  ;;  %v1422_v8 = vsel %vm1166_vm9, %v870_v2, %v1294_v4  ;;  %v1454_v9 = vsel %vm1198_vm10, %v950_v3, %v1326_v5 }
 0x11c   : > { %1646 = vst.msk [vmem:[%s2277_s27 + $0x378] sm:$0xff] %vm1534_vm1, %v1517_v7 }
 0x11d   : > { %1551 = vst.msk [vmem:[%s2277_s27 + $0x80] sm:$0xff] %vm1534_vm1, %v1422_v8 }
 0x11e   : > { %1583 = vst.msk [vmem:[%s2277_s27 + $0x180] sm:$0xff] %vm1534_vm1, %v1454_v9 }
 0x11f   : > { %v1030_v10 = vpop.f32.mrf.mxu2  ;;  %v1110_v11 = vpop.f32.mrf.mxu3 }
 0x120   : > { %vm1230_vm11 = vcmp.ge.f32.partialorder %v1030_v10, 0.0  ;;  %v1358_v12 = vmul.f32 0.2, %v1030_v10  ;;  %vm1262_vm12 = vcmp.ge.f32.partialorder %v1110_v11, 0.0  ;;  %v1390_v13 = vmul.f32 0.2, %v1110_v11  ;;  %v872_v14 = vpop.f32.mrf.mxu0  ;;  %v952_v15 = vpop.f32.mrf.mxu1 }
 0x121   : > { %vm1167_vm13 = vcmp.ge.f32.partialorder %v872_v14, 0.0  ;;  %v1295_v16 = vmul.f32 0.2, %v872_v14  ;;  %vm1199_vm14 = vcmp.ge.f32.partialorder %v952_v15, 0.0  ;;  %v1327_v17 = vmul.f32 0.2, %v952_v15 }
 0x122   : > { %v1486_v18 = vsel %vm1230_vm11, %v1030_v10, %v1358_v12  ;;  %v1518_v19 = vsel %vm1262_vm12, %v1110_v11, %v1390_v13 }
 0x123   : > { %1615 = vst.msk [vmem:[%s2277_s27 + $0x280] sm:$0xff] %vm1534_vm1, %v1486_v18  ;;  %v1423_v20 = vsel %vm1167_vm13, %v872_v14, %v1295_v16  ;;  %v1455_v21 = vsel %vm1199_vm14, %v952_v15, %v1327_v17 }
 0x124   : > { %1647 = vst.msk [vmem:[%s2277_s27 + $0x380] sm:$0xff] %vm1534_vm1, %v1518_v19 }
 0x125   : > { %1552 = vst.msk [vmem:[%s2277_s27 + $0x88] sm:$0xff] %vm1534_vm1, %v1423_v20 }
 0x126   : > { %1584 = vst.msk [vmem:[%s2277_s27 + $0x188] sm:$0xff] %vm1534_vm1, %v1455_v21 }
 0x127   : > { %v1032_v22 = vpop.f32.mrf.mxu2  ;;  %v1112_v23 = vpop.f32.mrf.mxu3 }
 0x128   : > { %vm1231_vm15 = vcmp.ge.f32.partialorder %v1032_v22, 0.0  ;;  %v1359_v24 = vmul.f32 0.2, %v1032_v22  ;;  %vm1263_vm2 = vcmp.ge.f32.partialorder %v1112_v23, 0.0  ;;  %v1391_v25 = vmul.f32 0.2, %v1112_v23  ;;  %v875_v26 = vpop.f32.mrf.mxu0  ;;  %v955_v27 = vpop.f32.mrf.mxu1 }
 0x129   : > { %vm1168_vm3 = vcmp.ge.f32.partialorder %v875_v26, 0.0  ;;  %v1296_v28 = vmul.f32 0.2, %v875_v26  ;;  %vm1200_vm4 = vcmp.ge.f32.partialorder %v955_v27, 0.0  ;;  %v1328_v29 = vmul.f32 0.2, %v955_v27 }
 0x12a   : > { %v1487_v30 = vsel %vm1231_vm15, %v1032_v22, %v1359_v24  ;;  %v1519_v31 = vsel %vm1263_vm2, %v1112_v23, %v1391_v25 }
 0x12b   : > { %1616 = vst.msk [vmem:[%s2277_s27 + $0x288] sm:$0xff] %vm1534_vm1, %v1487_v30  ;;  %v1424_v32 = vsel %vm1168_vm3, %v875_v26, %v1296_v28  ;;  %v1456_v33 = vsel %vm1200_vm4, %v955_v27, %v1328_v29 }
 0x12c   : > { %1648 = vst.msk [vmem:[%s2277_s27 + $0x388] sm:$0xff] %vm1534_vm1, %v1519_v31 }
 0x12d   : > { %1553 = vst.msk [vmem:[%s2277_s27 + $0x90] sm:$0xff] %vm1534_vm1, %v1424_v32 }
 0x12e   : > { %1585 = vst.msk [vmem:[%s2277_s27 + $0x190] sm:$0xff] %vm1534_vm1, %v1456_v33 }
 0x12f   : > { %v1035_v34 = vpop.f32.mrf.mxu2  ;;  %v1115_v35 = vpop.f32.mrf.mxu3 }
 0x130   : > { %vm1232_vm5 = vcmp.ge.f32.partialorder %v1035_v34, 0.0  ;;  %v1360_v36 = vmul.f32 0.2, %v1035_v34  ;;  %vm1264_vm6 = vcmp.ge.f32.partialorder %v1115_v35, 0.0  ;;  %v1392_v37 = vmul.f32 0.2, %v1115_v35  ;;  %v877_v38 = vpop.f32.mrf.mxu0  ;;  %v957_v39 = vpop.f32.mrf.mxu1 }
 0x131   : > { %vm1169_vm7 = vcmp.ge.f32.partialorder %v877_v38, 0.0  ;;  %v1297_v40 = vmul.f32 0.2, %v877_v38  ;;  %vm1201_vm0 = vcmp.ge.f32.partialorder %v957_v39, 0.0  ;;  %v1329_v41 = vmul.f32 0.2, %v957_v39 }
 0x132   : > { %v1488_v42 = vsel %vm1232_vm5, %v1035_v34, %v1360_v36  ;;  %v1520_v43 = vsel %vm1264_vm6, %v1115_v35, %v1392_v37 }
 0x133   : > { %1617 = vst.msk [vmem:[%s2277_s27 + $0x290] sm:$0xff] %vm1534_vm1, %v1488_v42  ;;  %v1425_v44 = vsel %vm1169_vm7, %v877_v38, %v1297_v40  ;;  %v1457_v45 = vsel %vm1201_vm0, %v957_v39, %v1329_v41 }
 0x134   : > { %1649 = vst.msk [vmem:[%s2277_s27 + $0x390] sm:$0xff] %vm1534_vm1, %v1520_v43 }
 0x135   : > { %1554 = vst.msk [vmem:[%s2277_s27 + $0x98] sm:$0xff] %vm1534_vm1, %v1425_v44 }
 0x136   : > { %1586 = vst.msk [vmem:[%s2277_s27 + $0x198] sm:$0xff] %vm1534_vm1, %v1457_v45 }
 0x137   : > { %v1037_v46 = vpop.f32.mrf.mxu2  ;;  %v1117_v47 = vpop.f32.mrf.mxu3 }
 0x138   : > { %vm1233_vm8 = vcmp.ge.f32.partialorder %v1037_v46, 0.0  ;;  %v1361_v48 = vmul.f32 0.2, %v1037_v46  ;;  %vm1265_vm9 = vcmp.ge.f32.partialorder %v1117_v47, 0.0  ;;  %v1393_v49 = vmul.f32 0.2, %v1117_v47  ;;  %v880_v50 = vpop.f32.mrf.mxu0  ;;  %v960_v51 = vpop.f32.mrf.mxu1 }
 0x139   : > { %vm1170_vm10 = vcmp.ge.f32.partialorder %v880_v50, 0.0  ;;  %v1298_v52 = vmul.f32 0.2, %v880_v50  ;;  %vm1202_vm11 = vcmp.ge.f32.partialorder %v960_v51, 0.0  ;;  %v1330_v53 = vmul.f32 0.2, %v960_v51 }
 0x13a   : > { %v1489_v54 = vsel %vm1233_vm8, %v1037_v46, %v1361_v48  ;;  %v1521_v55 = vsel %vm1265_vm9, %v1117_v47, %v1393_v49 }
 0x13b   : > { %1618 = vst.msk [vmem:[%s2277_s27 + $0x298] sm:$0xff] %vm1534_vm1, %v1489_v54  ;;  %v1426_v56 = vsel %vm1170_vm10, %v880_v50, %v1298_v52  ;;  %v1458_v57 = vsel %vm1202_vm11, %v960_v51, %v1330_v53 }
 0x13c   : > { %1650 = vst.msk [vmem:[%s2277_s27 + $0x398] sm:$0xff] %vm1534_vm1, %v1521_v55 }
 0x13d   : > { %1555 = vst.msk [vmem:[%s2277_s27 + $0xa0] sm:$0xff] %vm1534_vm1, %v1426_v56 }
 0x13e   : > { %1587 = vst.msk [vmem:[%s2277_s27 + $0x1a0] sm:$0xff] %vm1534_vm1, %v1458_v57 }
 0x13f   : > { %v1040_v58 = vpop.f32.mrf.mxu2  ;;  %v1120_v59 = vpop.f32.mrf.mxu3 }
 0x140   : > { %vm1234_vm12 = vcmp.ge.f32.partialorder %v1040_v58, 0.0  ;;  %v1362_v60 = vmul.f32 0.2, %v1040_v58  ;;  %vm1266_vm13 = vcmp.ge.f32.partialorder %v1120_v59, 0.0  ;;  %v1394_v61 = vmul.f32 0.2, %v1120_v59  ;;  %v882_v62 = vpop.f32.mrf.mxu0  ;;  %v962_v63 = vpop.f32.mrf.mxu1 }
 0x141   : > { %vm1171_vm14 = vcmp.ge.f32.partialorder %v882_v62, 0.0  ;;  %v1299_v0 = vmul.f32 0.2, %v882_v62  ;;  %vm1203_vm15 = vcmp.ge.f32.partialorder %v962_v63, 0.0  ;;  %v1331_v1 = vmul.f32 0.2, %v962_v63 }
 0x142   : > { %v1490_v2 = vsel %vm1234_vm12, %v1040_v58, %v1362_v60  ;;  %v1522_v3 = vsel %vm1266_vm13, %v1120_v59, %v1394_v61 }
 0x143   : > { %1619 = vst.msk [vmem:[%s2277_s27 + $0x2a0] sm:$0xff] %vm1534_vm1, %v1490_v2  ;;  %v1427_v4 = vsel %vm1171_vm14, %v882_v62, %v1299_v0  ;;  %v1459_v5 = vsel %vm1203_vm15, %v962_v63, %v1331_v1 }
 0x144   : > { %1651 = vst.msk [vmem:[%s2277_s27 + $0x3a0] sm:$0xff] %vm1534_vm1, %v1522_v3 }
 0x145   : > { %1556 = vst.msk [vmem:[%s2277_s27 + $0xa8] sm:$0xff] %vm1534_vm1, %v1427_v4 }
 0x146   : > { %1588 = vst.msk [vmem:[%s2277_s27 + $0x1a8] sm:$0xff] %vm1534_vm1, %v1459_v5 }
 0x147   : > { %v1042_v6 = vpop.f32.mrf.mxu2  ;;  %v1122_v7 = vpop.f32.mrf.mxu3 }
 0x148   : > { %vm1235_vm2 = vcmp.ge.f32.partialorder %v1042_v6, 0.0  ;;  %v1363_v8 = vmul.f32 0.2, %v1042_v6  ;;  %vm1267_vm3 = vcmp.ge.f32.partialorder %v1122_v7, 0.0  ;;  %v1395_v9 = vmul.f32 0.2, %v1122_v7  ;;  %v885_v10 = vpop.f32.mrf.mxu0  ;;  %v965_v11 = vpop.f32.mrf.mxu1 }
 0x149   : > { %vm1172_vm4 = vcmp.ge.f32.partialorder %v885_v10, 0.0  ;;  %v1300_v12 = vmul.f32 0.2, %v885_v10  ;;  %vm1204_vm5 = vcmp.ge.f32.partialorder %v965_v11, 0.0  ;;  %v1332_v13 = vmul.f32 0.2, %v965_v11 }
 0x14a   : > { %v1491_v14 = vsel %vm1235_vm2, %v1042_v6, %v1363_v8  ;;  %v1523_v15 = vsel %vm1267_vm3, %v1122_v7, %v1395_v9 }
 0x14b   : > { %1620 = vst.msk [vmem:[%s2277_s27 + $0x2a8] sm:$0xff] %vm1534_vm1, %v1491_v14  ;;  %v1428_v16 = vsel %vm1172_vm4, %v885_v10, %v1300_v12  ;;  %v1460_v17 = vsel %vm1204_vm5, %v965_v11, %v1332_v13 }
 0x14c   : > { %1652 = vst.msk [vmem:[%s2277_s27 + $0x3a8] sm:$0xff] %vm1534_vm1, %v1523_v15 }
 0x14d   : > { %1557 = vst.msk [vmem:[%s2277_s27 + $0xb0] sm:$0xff] %vm1534_vm1, %v1428_v16 }
 0x14e   : > { %1589 = vst.msk [vmem:[%s2277_s27 + $0x1b0] sm:$0xff] %vm1534_vm1, %v1460_v17 }
 0x14f   : > { %v1045_v18 = vpop.f32.mrf.mxu2  ;;  %v1125_v19 = vpop.f32.mrf.mxu3 }
 0x150   : > { %vm1236_vm6 = vcmp.ge.f32.partialorder %v1045_v18, 0.0  ;;  %v1364_v20 = vmul.f32 0.2, %v1045_v18  ;;  %vm1268_vm7 = vcmp.ge.f32.partialorder %v1125_v19, 0.0  ;;  %v1396_v21 = vmul.f32 0.2, %v1125_v19  ;;  %v887_v22 = vpop.f32.mrf.mxu0  ;;  %v967_v23 = vpop.f32.mrf.mxu1 }
 0x151   : > { %vm1173_vm0 = vcmp.ge.f32.partialorder %v887_v22, 0.0  ;;  %v1301_v24 = vmul.f32 0.2, %v887_v22  ;;  %vm1205_vm8 = vcmp.ge.f32.partialorder %v967_v23, 0.0  ;;  %v1333_v25 = vmul.f32 0.2, %v967_v23 }
 0x152   : > { %v1492_v26 = vsel %vm1236_vm6, %v1045_v18, %v1364_v20  ;;  %v1524_v27 = vsel %vm1268_vm7, %v1125_v19, %v1396_v21 }
 0x153   : > { %1621 = vst.msk [vmem:[%s2277_s27 + $0x2b0] sm:$0xff] %vm1534_vm1, %v1492_v26  ;;  %v1429_v28 = vsel %vm1173_vm0, %v887_v22, %v1301_v24  ;;  %v1461_v29 = vsel %vm1205_vm8, %v967_v23, %v1333_v25 }
 0x154   : > { %1653 = vst.msk [vmem:[%s2277_s27 + $0x3b0] sm:$0xff] %vm1534_vm1, %v1524_v27 }
 0x155   : > { %1558 = vst.msk [vmem:[%s2277_s27 + $0xb8] sm:$0xff] %vm1534_vm1, %v1429_v28 }
 0x156   : > { %1590 = vst.msk [vmem:[%s2277_s27 + $0x1b8] sm:$0xff] %vm1534_vm1, %v1461_v29 }
 0x157   : > { %v1047_v30 = vpop.f32.mrf.mxu2  ;;  %v1127_v31 = vpop.f32.mrf.mxu3 }
 0x158   : > { %vm1237_vm9 = vcmp.ge.f32.partialorder %v1047_v30, 0.0  ;;  %v1365_v32 = vmul.f32 0.2, %v1047_v30  ;;  %vm1269_vm10 = vcmp.ge.f32.partialorder %v1127_v31, 0.0  ;;  %v1397_v33 = vmul.f32 0.2, %v1127_v31  ;;  %v890_v34 = vpop.f32.mrf.mxu0  ;;  %v970_v35 = vpop.f32.mrf.mxu1 }
 0x159   : > { %vm1174_vm11 = vcmp.ge.f32.partialorder %v890_v34, 0.0  ;;  %v1302_v36 = vmul.f32 0.2, %v890_v34  ;;  %vm1206_vm12 = vcmp.ge.f32.partialorder %v970_v35, 0.0  ;;  %v1334_v37 = vmul.f32 0.2, %v970_v35 }
 0x15a   : > { %v1493_v38 = vsel %vm1237_vm9, %v1047_v30, %v1365_v32  ;;  %v1525_v39 = vsel %vm1269_vm10, %v1127_v31, %v1397_v33 }
 0x15b   : > { %1622 = vst.msk [vmem:[%s2277_s27 + $0x2b8] sm:$0xff] %vm1534_vm1, %v1493_v38  ;;  %v1430_v40 = vsel %vm1174_vm11, %v890_v34, %v1302_v36  ;;  %v1462_v41 = vsel %vm1206_vm12, %v970_v35, %v1334_v37 }
 0x15c   : > { %1654 = vst.msk [vmem:[%s2277_s27 + $0x3b8] sm:$0xff] %vm1534_vm1, %v1525_v39 }
 0x15d   : > { %1559 = vst.msk [vmem:[%s2277_s27 + $0xc0] sm:$0xff] %vm1534_vm1, %v1430_v40 }
 0x15e   : > { %1591 = vst.msk [vmem:[%s2277_s27 + $0x1c0] sm:$0xff] %vm1534_vm1, %v1462_v41 }
 0x15f   : > { %v1050_v42 = vpop.f32.mrf.mxu2  ;;  %v1130_v43 = vpop.f32.mrf.mxu3 }
 0x160   : > { %vm1238_vm13 = vcmp.ge.f32.partialorder %v1050_v42, 0.0  ;;  %v1366_v44 = vmul.f32 0.2, %v1050_v42  ;;  %vm1270_vm14 = vcmp.ge.f32.partialorder %v1130_v43, 0.0  ;;  %v1398_v45 = vmul.f32 0.2, %v1130_v43  ;;  %v892_v46 = vpop.f32.mrf.mxu0  ;;  %v972_v47 = vpop.f32.mrf.mxu1 }
 0x161   : > { %vm1175_vm15 = vcmp.ge.f32.partialorder %v892_v46, 0.0  ;;  %v1303_v48 = vmul.f32 0.2, %v892_v46  ;;  %vm1207_vm2 = vcmp.ge.f32.partialorder %v972_v47, 0.0  ;;  %v1335_v49 = vmul.f32 0.2, %v972_v47 }
 0x162   : > { %v1494_v50 = vsel %vm1238_vm13, %v1050_v42, %v1366_v44  ;;  %v1526_v51 = vsel %vm1270_vm14, %v1130_v43, %v1398_v45 }
 0x163   : > { %1623 = vst.msk [vmem:[%s2277_s27 + $0x2c0] sm:$0xff] %vm1534_vm1, %v1494_v50  ;;  %v1431_v52 = vsel %vm1175_vm15, %v892_v46, %v1303_v48  ;;  %v1463_v53 = vsel %vm1207_vm2, %v972_v47, %v1335_v49 }
 0x164   : > { %1655 = vst.msk [vmem:[%s2277_s27 + $0x3c0] sm:$0xff] %vm1534_vm1, %v1526_v51 }
 0x165   : > { %1560 = vst.msk [vmem:[%s2277_s27 + $0xc8] sm:$0xff] %vm1534_vm1, %v1431_v52 }
 0x166   : > { %1592 = vst.msk [vmem:[%s2277_s27 + $0x1c8] sm:$0xff] %vm1534_vm1, %v1463_v53 }
 0x167   : > { %v1052_v54 = vpop.f32.mrf.mxu2  ;;  %v1132_v55 = vpop.f32.mrf.mxu3 }
 0x168   : > { %vm1239_vm3 = vcmp.ge.f32.partialorder %v1052_v54, 0.0  ;;  %v1367_v56 = vmul.f32 0.2, %v1052_v54  ;;  %vm1271_vm4 = vcmp.ge.f32.partialorder %v1132_v55, 0.0  ;;  %v1399_v57 = vmul.f32 0.2, %v1132_v55  ;;  %v895_v58 = vpop.f32.mrf.mxu0  ;;  %v975_v59 = vpop.f32.mrf.mxu1 }
 0x169   : > { %vm1176_vm5 = vcmp.ge.f32.partialorder %v895_v58, 0.0  ;;  %v1304_v60 = vmul.f32 0.2, %v895_v58  ;;  %vm1208_vm6 = vcmp.ge.f32.partialorder %v975_v59, 0.0  ;;  %v1336_v61 = vmul.f32 0.2, %v975_v59 }
 0x16a   : > { %v1495_v62 = vsel %vm1239_vm3, %v1052_v54, %v1367_v56  ;;  %v1527_v63 = vsel %vm1271_vm4, %v1132_v55, %v1399_v57 }
 0x16b   : > { %1624 = vst.msk [vmem:[%s2277_s27 + $0x2c8] sm:$0xff] %vm1534_vm1, %v1495_v62  ;;  %v1432_v0 = vsel %vm1176_vm5, %v895_v58, %v1304_v60  ;;  %v1464_v1 = vsel %vm1208_vm6, %v975_v59, %v1336_v61 }
 0x16c   : > { %1656 = vst.msk [vmem:[%s2277_s27 + $0x3c8] sm:$0xff] %vm1534_vm1, %v1527_v63 }
 0x16d   : > { %1561 = vst.msk [vmem:[%s2277_s27 + $0xd0] sm:$0xff] %vm1534_vm1, %v1432_v0 }
 0x16e   : > { %1593 = vst.msk [vmem:[%s2277_s27 + $0x1d0] sm:$0xff] %vm1534_vm1, %v1464_v1 }
 0x16f   : > { %v1055_v2 = vpop.f32.mrf.mxu2  ;;  %v1135_v3 = vpop.f32.mrf.mxu3 }
 0x170   : > { %vm1240_vm7 = vcmp.ge.f32.partialorder %v1055_v2, 0.0  ;;  %v1368_v4 = vmul.f32 0.2, %v1055_v2  ;;  %vm1272_vm0 = vcmp.ge.f32.partialorder %v1135_v3, 0.0  ;;  %v1400_v5 = vmul.f32 0.2, %v1135_v3  ;;  %v897_v6 = vpop.f32.mrf.mxu0  ;;  %v977_v7 = vpop.f32.mrf.mxu1 }
 0x171   : > { %vm1177_vm8 = vcmp.ge.f32.partialorder %v897_v6, 0.0  ;;  %v1305_v8 = vmul.f32 0.2, %v897_v6  ;;  %vm1209_vm9 = vcmp.ge.f32.partialorder %v977_v7, 0.0  ;;  %v1337_v9 = vmul.f32 0.2, %v977_v7 }
 0x172   : > { %v1496_v10 = vsel %vm1240_vm7, %v1055_v2, %v1368_v4  ;;  %v1528_v11 = vsel %vm1272_vm0, %v1135_v3, %v1400_v5 }
 0x173   : > { %1625 = vst.msk [vmem:[%s2277_s27 + $0x2d0] sm:$0xff] %vm1534_vm1, %v1496_v10  ;;  %v1433_v12 = vsel %vm1177_vm8, %v897_v6, %v1305_v8  ;;  %v1465_v13 = vsel %vm1209_vm9, %v977_v7, %v1337_v9 }
 0x174   : > { %1657 = vst.msk [vmem:[%s2277_s27 + $0x3d0] sm:$0xff] %vm1534_vm1, %v1528_v11 }
 0x175   : > { %1562 = vst.msk [vmem:[%s2277_s27 + $0xd8] sm:$0xff] %vm1534_vm1, %v1433_v12 }
 0x176   : > { %1594 = vst.msk [vmem:[%s2277_s27 + $0x1d8] sm:$0xff] %vm1534_vm1, %v1465_v13 }
 0x177   : > { %v1057_v14 = vpop.f32.mrf.mxu2  ;;  %v1137_v15 = vpop.f32.mrf.mxu3 }
 0x178   : > { %vm1241_vm10 = vcmp.ge.f32.partialorder %v1057_v14, 0.0  ;;  %v1369_v16 = vmul.f32 0.2, %v1057_v14  ;;  %vm1273_vm11 = vcmp.ge.f32.partialorder %v1137_v15, 0.0  ;;  %v1401_v17 = vmul.f32 0.2, %v1137_v15  ;;  %v900_v18 = vpop.f32.mrf.mxu0  ;;  %v980_v19 = vpop.f32.mrf.mxu1 }
 0x179   : > { %vm1178_vm12 = vcmp.ge.f32.partialorder %v900_v18, 0.0  ;;  %v1306_v20 = vmul.f32 0.2, %v900_v18  ;;  %vm1210_vm13 = vcmp.ge.f32.partialorder %v980_v19, 0.0  ;;  %v1338_v21 = vmul.f32 0.2, %v980_v19 }
 0x17a   : > { %v1497_v22 = vsel %vm1241_vm10, %v1057_v14, %v1369_v16  ;;  %v1529_v23 = vsel %vm1273_vm11, %v1137_v15, %v1401_v17 }
 0x17b   : > { %1626 = vst.msk [vmem:[%s2277_s27 + $0x2d8] sm:$0xff] %vm1534_vm1, %v1497_v22  ;;  %v1434_v24 = vsel %vm1178_vm12, %v900_v18, %v1306_v20  ;;  %v1466_v25 = vsel %vm1210_vm13, %v980_v19, %v1338_v21 }
 0x17c   : > { %1658 = vst.msk [vmem:[%s2277_s27 + $0x3d8] sm:$0xff] %vm1534_vm1, %v1529_v23 }
 0x17d   : > { %1563 = vst.msk [vmem:[%s2277_s27 + $0xe0] sm:$0xff] %vm1534_vm1, %v1434_v24 }
 0x17e   : > { %1595 = vst.msk [vmem:[%s2277_s27 + $0x1e0] sm:$0xff] %vm1534_vm1, %v1466_v25 }
 0x17f   : > { %v1060_v26 = vpop.f32.mrf.mxu2  ;;  %v1140_v27 = vpop.f32.mrf.mxu3 }
 0x180   : > { %vm1242_vm14 = vcmp.ge.f32.partialorder %v1060_v26, 0.0  ;;  %v1370_v28 = vmul.f32 0.2, %v1060_v26  ;;  %vm1274_vm15 = vcmp.ge.f32.partialorder %v1140_v27, 0.0  ;;  %v1402_v29 = vmul.f32 0.2, %v1140_v27  ;;  %v902_v30 = vpop.f32.mrf.mxu0  ;;  %v982_v31 = vpop.f32.mrf.mxu1 }
 0x181   : > { %vm1179_vm2 = vcmp.ge.f32.partialorder %v902_v30, 0.0  ;;  %v1307_v32 = vmul.f32 0.2, %v902_v30  ;;  %vm1211_vm3 = vcmp.ge.f32.partialorder %v982_v31, 0.0  ;;  %v1339_v33 = vmul.f32 0.2, %v982_v31 }
 0x182   : > { %v1498_v34 = vsel %vm1242_vm14, %v1060_v26, %v1370_v28  ;;  %v1530_v35 = vsel %vm1274_vm15, %v1140_v27, %v1402_v29 }
 0x183   : > { %1627 = vst.msk [vmem:[%s2277_s27 + $0x2e0] sm:$0xff] %vm1534_vm1, %v1498_v34  ;;  %v1435_v36 = vsel %vm1179_vm2, %v902_v30, %v1307_v32  ;;  %v1467_v37 = vsel %vm1211_vm3, %v982_v31, %v1339_v33 }
 0x184   : > { %1659 = vst.msk [vmem:[%s2277_s27 + $0x3e0] sm:$0xff] %vm1534_vm1, %v1530_v35 }
 0x185   : > { %1564 = vst.msk [vmem:[%s2277_s27 + $0xe8] sm:$0xff] %vm1534_vm1, %v1435_v36 }
 0x186   : > { %1596 = vst.msk [vmem:[%s2277_s27 + $0x1e8] sm:$0xff] %vm1534_vm1, %v1467_v37 }
 0x187   : > { %v1062_v38 = vpop.f32.mrf.mxu2  ;;  %v1142_v39 = vpop.f32.mrf.mxu3 }
 0x188   : > { %vm1243_vm4 = vcmp.ge.f32.partialorder %v1062_v38, 0.0  ;;  %v1371_v40 = vmul.f32 0.2, %v1062_v38  ;;  %vm1275_vm5 = vcmp.ge.f32.partialorder %v1142_v39, 0.0  ;;  %v1403_v41 = vmul.f32 0.2, %v1142_v39  ;;  %v905_v42 = vpop.f32.mrf.mxu0  ;;  %v985_v43 = vpop.f32.mrf.mxu1 }
 0x189   : > { %vm1180_vm6 = vcmp.ge.f32.partialorder %v905_v42, 0.0  ;;  %v1308_v44 = vmul.f32 0.2, %v905_v42  ;;  %vm1212_vm7 = vcmp.ge.f32.partialorder %v985_v43, 0.0  ;;  %v1340_v45 = vmul.f32 0.2, %v985_v43 }
 0x18a   : > { %v1499_v46 = vsel %vm1243_vm4, %v1062_v38, %v1371_v40  ;;  %v1531_v47 = vsel %vm1275_vm5, %v1142_v39, %v1403_v41 }
 0x18b   : > { %1628 = vst.msk [vmem:[%s2277_s27 + $0x2e8] sm:$0xff] %vm1534_vm1, %v1499_v46  ;;  %v1436_v48 = vsel %vm1180_vm6, %v905_v42, %v1308_v44  ;;  %v1468_v49 = vsel %vm1212_vm7, %v985_v43, %v1340_v45 }
 0x18c   : > { %1660 = vst.msk [vmem:[%s2277_s27 + $0x3e8] sm:$0xff] %vm1534_vm1, %v1531_v47 }
 0x18d   : > { %1565 = vst.msk [vmem:[%s2277_s27 + $0xf0] sm:$0xff] %vm1534_vm1, %v1436_v48 }
 0x18e   : > { %1597 = vst.msk [vmem:[%s2277_s27 + $0x1f0] sm:$0xff] %vm1534_vm1, %v1468_v49 }
 0x18f   : > { %v1065_v50 = vpop.f32.mrf.mxu2  ;;  %v1145_v51 = vpop.f32.mrf.mxu3 }
 0x190   : > { %vm1244_vm0 = vcmp.ge.f32.partialorder %v1065_v50, 0.0  ;;  %v1372_v52 = vmul.f32 0.2, %v1065_v50  ;;  %vm1276_vm8 = vcmp.ge.f32.partialorder %v1145_v51, 0.0  ;;  %v1404_v53 = vmul.f32 0.2, %v1145_v51  ;;  %v907_v54 = vpop.f32.mrf.mxu0  ;;  %v987_v55 = vpop.f32.mrf.mxu1 }
 0x191   : > { %vm1181_vm9 = vcmp.ge.f32.partialorder %v907_v54, 0.0  ;;  %v1309_v56 = vmul.f32 0.2, %v907_v54  ;;  %vm1213_vm10 = vcmp.ge.f32.partialorder %v987_v55, 0.0  ;;  %v1341_v57 = vmul.f32 0.2, %v987_v55 }
 0x192   : > { %v1500_v58 = vsel %vm1244_vm0, %v1065_v50, %v1372_v52  ;;  %v1532_v59 = vsel %vm1276_vm8, %v1145_v51, %v1404_v53 }
 0x193   : > { %1629 = vst.msk [vmem:[%s2277_s27 + $0x2f0] sm:$0xff] %vm1534_vm1, %v1500_v58  ;;  %v1437_v60 = vsel %vm1181_vm9, %v907_v54, %v1309_v56  ;;  %v1469_v61 = vsel %vm1213_vm10, %v987_v55, %v1341_v57 }
 0x194   : > { %1661 = vst.msk [vmem:[%s2277_s27 + $0x3f0] sm:$0xff] %vm1534_vm1, %v1532_v59 }
 0x195   : > { %1566 = vst.msk [vmem:[%s2277_s27 + $0xf8] sm:$0xff] %vm1534_vm1, %v1437_v60 }
 0x196   : > { %1598 = vst.msk [vmem:[%s2277_s27 + $0x1f8] sm:$0xff] %vm1534_vm1, %v1469_v61 }
 0x197   : > { %v1067_v62 = vpop.f32.mrf.mxu2  ;;  %v1147_v63 = vpop.f32.mrf.mxu3 }
 0x198   : > { %vm1245_vm11 = vcmp.ge.f32.partialorder %v1067_v62, 0.0  ;;  %v1373_v0 = vmul.f32 0.2, %v1067_v62  ;;  %vm1277_vm12 = vcmp.ge.f32.partialorder %v1147_v63, 0.0  ;;  %v1405_v1 = vmul.f32 0.2, %v1147_v63 }
 0x19a   : > { %v1501_v2 = vsel %vm1245_vm11, %v1067_v62, %v1373_v0  ;;  %v1533_v3 = vsel %vm1277_vm12, %v1147_v63, %v1405_v1 }
 0x19b   : > { %1630 = vst.msk [vmem:[%s2277_s27 + $0x2f8] sm:$0xff] %vm1534_vm1, %v1501_v2 }
 0x19c   : > { %1662 = vst.msk [vmem:[%s2277_s27 + $0x3f8] sm:$0xff] %vm1534_vm1, %v1533_v3 }
 0x19d PF: > { %s12_s9 = sadd.s32 1, %s2160_s9  }
 0x19e   : > { %p9_p4 = scmp.ge.s32.totalorder %s12_s9, 4  }
 0x1a0   :  { %11 = sbr.rel (!%p9_p4) target bundleno = 1 (0x1), region = 58 }

// kernel: discriminator_forward.6
= control target key start
LH: loop header
LB: loop body
LE: loop exit
PB: predicated region body
PF: predicated region fallthrough
CT: control target
= control target key end

     0   :  { %vm467_vm0 = vcmask 130048   ;;  %s2526_s1 = inlined_call_operand.vmem [shape: bf16[128,128], index: 1, kind: input, shape index: {}]   ;;  %s2527_s0 = inlined_call_operand.vmem [shape: bf16[464,128], index: 0, kind: input, shape index: {}]   ;;  %s2528_s2 = inlined_call_operand.vmem [shape: f32[1,16], index: 2, kind: input, shape index: {}]   ;;  %s2529_s3 = inlined_call_operand.vmem [shape: f32[1,16], index: 3, kind: input, shape index: {}]   ;;  %s2530_s4 = inlined_call_operand.vmem [shape: f32[464,16], index: 4, kind: output, shape index: {}]  }
   0x1   :  { %v1338_v0 = vld [vmem:[%s2526_s1 + $0x38] sm:$0xff]  ;;  %v1337_v1 = vld [vmem:[%s2526_s1 + $0x30] sm:$0xff]  ;;  %v1336_v2 = vld [vmem:[%s2526_s1 + $0x28] sm:$0xff] }
   0x2   :  { %313 = vmatpush.bf16.msra.mxu0 %v1338_v0  ;;  %1339 = vmatpush.bf16.msra.mxu1 %v1338_v0  ;;  %v1335_v3 = vld [vmem:[%s2526_s1 + $0x20] sm:$0xff]  ;;  %v1334_v4 = vld [vmem:[%s2526_s1 + $0x18] sm:$0xff]  ;;  %v1333_v5 = vld [vmem:[%s2526_s1 + $0x10] sm:$0xff] }
   0x3   :  { %1340 = vmatpush.bf16.msra.mxu2 %v1338_v0  ;;  %1341 = vmatpush.bf16.msra.mxu3 %v1338_v0  ;;  %v1332_v6 = vld [vmem:[%s2526_s1 + $0x8] sm:$0xff]  ;;  %v1331_v7 = vld [vmem:[%s2526_s1] sm:$0xff]  ;;  %v1309_v9 = vld [vmem:[%s2527_s0 + $0x38] sm:$0xff] }
   0x4   :  { %v1302_v8 = vld [vmem:[%s2527_s0] sm:$0xff]  ;;  %v1316_v10 = vld [vmem:[%s2527_s0 + $0x70] sm:$0xff]  ;;  %v1303_v11 = vld [vmem:[%s2527_s0 + $0x8] sm:$0xff] }
   0x5   :  { %v1310_v12 = vld [vmem:[%s2527_s0 + $0x40] sm:$0xff]  ;;  %v1317_v13 = vld [vmem:[%s2527_s0 + $0x78] sm:$0xff]  ;;  %v1304_v14 = vld [vmem:[%s2527_s0 + $0x10] sm:$0xff] }
   0x6   :  { %314 = vmatpush.bf16.msra.mxu0 %v1337_v1  ;;  %1342 = vmatpush.bf16.msra.mxu1 %v1337_v1  ;;  %v1311_v15 = vld [vmem:[%s2527_s0 + $0x48] sm:$0xff]  ;;  %v1318_v16 = vld [vmem:[%s2527_s0 + $0x80] sm:$0xff]  ;;  %v1324_v17 = vld [vmem:[%s2527_s0 + $0xb0] sm:$0xff] }
   0x7   :  { %1343 = vmatpush.bf16.msra.mxu2 %v1337_v1  ;;  %1344 = vmatpush.bf16.msra.mxu3 %v1337_v1  ;;  %v1305_v18 = vld [vmem:[%s2527_s0 + $0x18] sm:$0xff]  ;;  %v1312_v19 = vld [vmem:[%s2527_s0 + $0x50] sm:$0xff]  ;;  %v1319_v20 = vld [vmem:[%s2527_s0 + $0x88] sm:$0xff] }
   0x8   :  { %v1325_v21 = vld [vmem:[%s2527_s0 + $0xb8] sm:$0xff]  ;;  %v1306_v22 = vld [vmem:[%s2527_s0 + $0x20] sm:$0xff]  ;;  %v1320_v24 = vld [vmem:[%s2527_s0 + $0x90] sm:$0xff] }
   0x9   :  { %v1313_v23 = vld [vmem:[%s2527_s0 + $0x58] sm:$0xff]  ;;  %v1326_v25 = vld [vmem:[%s2527_s0 + $0xc0] sm:$0xff]  ;;  %v1307_v26 = vld [vmem:[%s2527_s0 + $0x28] sm:$0xff] }
   0xa   :  { %315 = vmatpush.bf16.msra.mxu0 %v1336_v2  ;;  %1345 = vmatpush.bf16.msra.mxu1 %v1336_v2  ;;  %v1314_v27 = vld [vmem:[%s2527_s0 + $0x60] sm:$0xff]  ;;  %v1321_v28 = vld [vmem:[%s2527_s0 + $0x98] sm:$0xff]  ;;  %v1327_v29 = vld [vmem:[%s2527_s0 + $0xc8] sm:$0xff] }
   0xb   :  { %1346 = vmatpush.bf16.msra.mxu2 %v1336_v2  ;;  %1347 = vmatpush.bf16.msra.mxu3 %v1336_v2  ;;  %v1308_v30 = vld [vmem:[%s2527_s0 + $0x30] sm:$0xff]  ;;  %v1315_v31 = vld [vmem:[%s2527_s0 + $0x68] sm:$0xff]  ;;  %v1322_v32 = vld [vmem:[%s2527_s0 + $0xa0] sm:$0xff] }
   0xc   :  { %v1328_v33 = vld [vmem:[%s2527_s0 + $0xd0] sm:$0xff]  ;;  %v1323_v34 = vld [vmem:[%s2527_s0 + $0xa8] sm:$0xff]  ;;  %v1329_v35 = vld [vmem:[%s2527_s0 + $0xd8] sm:$0xff] }
   0xd   :  { %v1330_v41 = vld [vmem:[%s2527_s0 + $0xe0] sm:$0xff] }
   0xe   :  { %316 = vmatpush.bf16.msra.mxu0 %v1335_v3  ;;  %1348 = vmatpush.bf16.msra.mxu1 %v1335_v3 }
   0xf   :  { %1349 = vmatpush.bf16.msra.mxu2 %v1335_v3  ;;  %1350 = vmatpush.bf16.msra.mxu3 %v1335_v3 }
  0x12   :  { %317 = vmatpush.bf16.msra.mxu0 %v1334_v4  ;;  %1351 = vmatpush.bf16.msra.mxu1 %v1334_v4 }
  0x13   :  { %1352 = vmatpush.bf16.msra.mxu2 %v1334_v4  ;;  %1353 = vmatpush.bf16.msra.mxu3 %v1334_v4 }
  0x16   :  { %318 = vmatpush.bf16.msra.mxu0 %v1333_v5  ;;  %1354 = vmatpush.bf16.msra.mxu1 %v1333_v5 }
  0x17   :  { %1355 = vmatpush.bf16.msra.mxu2 %v1333_v5  ;;  %1356 = vmatpush.bf16.msra.mxu3 %v1333_v5 }
  0x1a   :  { %319 = vmatpush.bf16.msra.mxu0 %v1332_v6  ;;  %1357 = vmatpush.bf16.msra.mxu1 %v1332_v6 }
  0x1b   :  { %1358 = vmatpush.bf16.msra.mxu2 %v1332_v6  ;;  %1359 = vmatpush.bf16.msra.mxu3 %v1332_v6 }
  0x1e   :  { %320 = vmatpush.bf16.msra.mxu0 %v1331_v7  ;;  %1360 = vmatpush.bf16.msra.mxu1 %v1331_v7 }
  0x1f   :  { %1361 = vmatpush.bf16.msra.mxu2 %v1331_v7  ;;  %1362 = vmatpush.bf16.msra.mxu3 %v1331_v7 }
  0x21   :  { %321 = vmatmul.bf16.vlgmr.msra.gmra.mxu0 %v1302_v8  ;;  %356 = vmatmul.bf16.vlgmr.msra.gmra.mxu1 %v1309_v9 }
  0x22   :  { %391 = vmatmul.bf16.vlgmr.msra.gmra.mxu2 %v1316_v10  ;;  %431 = vmatmul.bf16.vlgmr.msra.gmra.mxu3 %v1324_v17 }
  0x31   :  { %326 = vmatmul.bf16.gmra.mxu0 %v1303_v11  ;;  %361 = vmatmul.bf16.gmra.mxu1 %v1310_v12 }
  0x32   :  { %396 = vmatmul.bf16.gmra.mxu2 %v1317_v13  ;;  %436 = vmatmul.bf16.gmra.mxu3 %v1325_v21 }
  0x41   :  { %331 = vmatmul.bf16.gmra.mxu0 %v1304_v14  ;;  %366 = vmatmul.bf16.gmra.mxu1 %v1311_v15 }
  0x42   :  { %401 = vmatmul.bf16.gmra.mxu2 %v1318_v16  ;;  %441 = vmatmul.bf16.gmra.mxu3 %v1326_v25 }
  0x51   :  { %336 = vmatmul.bf16.gmra.mxu0 %v1305_v18  ;;  %371 = vmatmul.bf16.gmra.mxu1 %v1312_v19 }
  0x52   :  { %406 = vmatmul.bf16.gmra.mxu2 %v1319_v20  ;;  %446 = vmatmul.bf16.gmra.mxu3 %v1327_v29 }
  0x61   :  { %341 = vmatmul.bf16.gmra.mxu0 %v1306_v22  ;;  %376 = vmatmul.bf16.gmra.mxu1 %v1313_v23 }
  0x62   :  { %411 = vmatmul.bf16.gmra.mxu2 %v1320_v24  ;;  %451 = vmatmul.bf16.gmra.mxu3 %v1328_v33 }
  0x71   :  { %346 = vmatmul.bf16.gmra.mxu0 %v1307_v26  ;;  %381 = vmatmul.bf16.gmra.mxu1 %v1314_v27 }
  0x72   :  { %416 = vmatmul.bf16.gmra.mxu2 %v1321_v28  ;;  %456 = vmatmul.bf16.gmra.mxu3 %v1329_v35 }
  0x81   :  { %351 = vmatmul.bf16.gmra.mxu0 %v1308_v30  ;;  %386 = vmatmul.bf16.gmra.mxu1 %v1315_v31 }
  0x82   :  { %421 = vmatmul.bf16.gmra.mxu2 %v1322_v32  ;;  %461 = vmatmul.bf16.gmra.mxu3 %v1330_v41 }
  0x92   :  { %426 = vmatmul.bf16.gmra.mxu2 %v1323_v34 }
  0x9e   :  { %v1502_v36 = vpop.f32.mrf.mxu0  ;;  %v1504_v37 = vpop.f32.mrf.mxu1 }
  0x9f   :  { %v589_v2 = vmul.f32 %v1502_v36, %v1502_v36  ;;  %v468_v8 = vsel %vm467_vm0, %v1502_v36, 0.0 }
  0xa1   :  { %v647_v13 = vsel %vm467_vm0, %v589_v2, 0.0 }
  0xa5   :  { %v1510_v40 = vpop.f32.mrf.mxu2  ;;  %v1547_v58 = vpop.f32.mrf.mxu3 }
  0xa6   :  { %v1506_v38 = vpop.f32.mrf.mxu0  ;;  %v1508_v39 = vpop.f32.mrf.mxu1  ;;  %2551 = vst [vmem:[#allocation4_spill] sm:$0xff] %v1547_v58 }
  0xa7   :  { %v590_v0 = vmul.f32 %v1506_v38, %v1506_v38  ;;  %v469_v3 = vsel %vm467_vm0, %v1506_v38, 0.0 }
  0xa8   :  { %v470_v12 = vadd.f32 %v469_v3, %v468_v8 }
  0xa9   :  { %v648_v9 = vsel %vm467_vm0, %v590_v0, 0.0 }
  0xaa   :  { %v649_v17 = vadd.f32 %v648_v9, %v647_v13 }
  0xad   :  { %v1519_v44 = vpop.f32.mrf.mxu2  ;;  %v1555_v62 = vpop.f32.mrf.mxu3 }
  0xae   :  { %v1515_v42 = vpop.f32.mrf.mxu0  ;;  %v1517_v43 = vpop.f32.mrf.mxu1 }
  0xaf   :  { %v591_v4 = vmul.f32 %v1515_v42, %v1515_v42  ;;  %v471_v10 = vsel %vm467_vm0, %v1515_v42, 0.0 }
  0xb0   :  { %v472_v18 = vadd.f32 %v471_v10, %v470_v12 }
  0xb1   :  { %v650_v14 = vsel %vm467_vm0, %v591_v4, 0.0 }
  0xb2   :  { %v651_v22 = vadd.f32 %v650_v14, %v649_v17 }
  0xb5   :  { %v1525_v47 = vpop.f32.mrf.mxu2  ;;  %v1573_v7 = vpop.f32.mrf.mxu3 }
  0xb6   :  { %v1521_v45 = vpop.f32.mrf.mxu0  ;;  %v1523_v46 = vpop.f32.mrf.mxu1  ;;  %2549 = vst [vmem:[#allocation2_spill] sm:$0xff] %v1525_v47 }
  0xb7   :  { %v592_v11 = vmul.f32 %v1521_v45, %v1521_v45  ;;  %v473_v15 = vsel %vm467_vm0, %v1521_v45, 0.0 }
  0xb8   :  { %v474_v23 = vadd.f32 %v473_v15, %v472_v18 }
  0xb9   :  { %v652_v19 = vsel %vm467_vm0, %v592_v11, 0.0 }
  0xba   :  { %v653_v27 = vadd.f32 %v652_v19, %v651_v22 }
  0xbd   :  { %v1531_v50 = vpop.f32.mrf.mxu2  ;;  %v1609_v0 = vpop.f32.mrf.mxu3 }
  0xbe   :  { %v1527_v48 = vpop.f32.mrf.mxu0  ;;  %v1529_v49 = vpop.f32.mrf.mxu1  ;;  %2550 = vst [vmem:[#allocation3_spill] sm:$0xff] %v1531_v50 }
  0xbf   :  { %v593_v16 = vmul.f32 %v1527_v48, %v1527_v48  ;;  %v475_v20 = vsel %vm467_vm0, %v1527_v48, 0.0 }
  0xc0   :  { %v476_v28 = vadd.f32 %v475_v20, %v474_v23 }
  0xc1   :  { %v654_v24 = vsel %vm467_vm0, %v593_v16, 0.0 }
  0xc2   :  { %v655_v34 = vadd.f32 %v654_v24, %v653_v27 }
  0xc5   :  { %v1539_v54 = vpop.f32.mrf.mxu2 }
  0xc6   :  { %v1533_v51 = vpop.f32.mrf.mxu0  ;;  %v1537_v53 = vpop.f32.mrf.mxu1 }
  0xc7   :  { %v594_v21 = vmul.f32 %v1533_v51, %v1533_v51  ;;  %v477_v25 = vsel %vm467_vm0, %v1533_v51, 0.0 }
  0xc8   :  { %v478_v35 = vadd.f32 %v477_v25, %v476_v28 }
  0xc9   :  { %v656_v31 = vsel %vm467_vm0, %v594_v21, 0.0 }
  0xca   :  { %v657_v8 = vadd.f32 %v656_v31, %v655_v34 }
  0xcd   :  { %v1545_v57 = vpop.f32.mrf.mxu2 }
  0xce   :  { %v1535_v52 = vpop.f32.mrf.mxu0  ;;  %v1543_v56 = vpop.f32.mrf.mxu1 }
  0xcf   :  { %v595_v26 = vmul.f32 %v1535_v52, %v1535_v52  ;;  %v479_v32 = vsel %vm467_vm0, %v1535_v52, 0.0 }
  0xd0   :  { %v480_v9 = vadd.f32 %v479_v32, %v478_v35  ;;  %v1642_v35 = vpop.f32.mrf.mxu3 }
  0xd1   :  { %v658_v2 = vsel %vm467_vm0, %v595_v26, 0.0  ;;  %2554 = vst [vmem:[#allocation7_spill] sm:$0xff] %v1642_v35 }
  0xd2   :  { %v659_v13 = vadd.f32 %v658_v2, %v657_v8 }
  0xd5   :  { %v1553_v61 = vpop.f32.mrf.mxu2 }
  0xd6   :  { %v1541_v55 = vpop.f32.mrf.mxu0  ;;  %v1551_v60 = vpop.f32.mrf.mxu1 }
  0xd7   :  { %v596_v33 = vmul.f32 %v1541_v55, %v1541_v55  ;;  %v481_v3 = vsel %vm467_vm0, %v1541_v55, 0.0 }
  0xd8   :  { %v482_v14 = vadd.f32 %v481_v3, %v480_v9 }
  0xd9   :  { %v660_v10 = vsel %vm467_vm0, %v596_v33, 0.0 }
  0xda   :  { %v661_v18 = vadd.f32 %v660_v10, %v659_v13  ;;  %v603_v13 = vmul.f32 %v1504_v37, %v1504_v37 }
  0xdd   :  { %v1569_v5 = vpop.f32.mrf.mxu2 }
  0xde   :  { %v1549_v59 = vpop.f32.mrf.mxu0  ;;  %v1561_v1 = vpop.f32.mrf.mxu1  ;;  %2552 = vst [vmem:[#allocation5_spill] sm:$0xff] %v1569_v5 }
  0xdf   :  { %v597_v4 = vmul.f32 %v1549_v59, %v1549_v59  ;;  %v483_v11 = vsel %vm467_vm0, %v1549_v59, 0.0 }
  0xe0   :  { %v484_v19 = vadd.f32 %v483_v11, %v482_v14 }
  0xe1   :  { %v662_v15 = vsel %vm467_vm0, %v597_v4, 0.0 }
  0xe2   :  { %v663_v24 = vadd.f32 %v662_v15, %v661_v18  ;;  %v495_v18 = vsel %vm467_vm0, %v1504_v37, 0.0 }
  0xe5   :  { %v1607_v41 = vpop.f32.mrf.mxu2 }
  0xe6   :  { %v1557_v63 = vpop.f32.mrf.mxu0  ;;  %v1600_v30 = vpop.f32.mrf.mxu1  ;;  %2553 = vst [vmem:[#allocation6_spill] sm:$0xff] %v1607_v41 }
  0xe7   :  { %v598_v12 = vmul.f32 %v1557_v63, %v1557_v63  ;;  %v485_v16 = vsel %vm467_vm0, %v1557_v63, 0.0 }
  0xe8   :  { %v486_v25 = vadd.f32 %v485_v16, %v484_v19  ;;  %v604_v19 = vmul.f32 %v1508_v39, %v1508_v39 }
  0xe9   :  { %v664_v21 = vsel %vm467_vm0, %v598_v12, 0.0 }
  0xea   :  { %v665_v32 = vadd.f32 %v664_v21, %v663_v24 }
  0xed   :  { %v1640_v34 = vpop.f32.mrf.mxu2 }
  0xee   :  { %v1571_v6 = vpop.f32.mrf.mxu0  ;;  %v1633_v26 = vpop.f32.mrf.mxu1 }
  0xef   :  { %v599_v17 = vmul.f32 %v1571_v6, %v1571_v6  ;;  %v487_v22 = vsel %vm467_vm0, %v1571_v6, 0.0 }
  0xf0   :  { %v488_v33 = vadd.f32 %v487_v22, %v486_v25  ;;  %v674_v25 = vsel %vm467_vm0, %v603_v13, 0.0  ;;  %v501_v13 = vsel %vm467_vm0, %v1523_v46, 0.0 }
  0xf1   :  { %v666_v27 = vsel %vm467_vm0, %v599_v17, 0.0 }
  0xf2   :  { %v667_v4 = vadd.f32 %v666_v27, %v665_v32  ;;  %v497_v27 = vsel %vm467_vm0, %v1508_v39, 0.0 }
  0xf6   :  { %v1598_v29 = vpop.f32.mrf.mxu0  ;;  %v1661_v24 = vpop.f32.mrf.mxu1 }
  0xf7   :  { %v600_v23 = vmul.f32 %v1598_v29, %v1598_v29  ;;  %v489_v28 = vsel %vm467_vm0, %v1598_v29, 0.0 }
  0xf8   :  { %v490_v8 = vadd.f32 %v489_v28, %v488_v33  ;;  %v605_v28 = vmul.f32 %v1517_v43, %v1517_v43  ;;  %v1668_v33 = vpop.f32.mrf.mxu2 }
  0xf9   :  { %v668_v2 = vsel %vm467_vm0, %v600_v23, 0.0 }
  0xfa   :  { %v669_v10 = vadd.f32 %v668_v2, %v667_v4  ;;  %v1670_v2 = vpop.f32.mrf.mxu3  ;;  %v499_v4 = vsel %vm467_vm0, %v1517_v43, 0.0 }
  0xfb   :  { %2555 = vst [vmem:[#allocation8_spill] sm:$0xff] %v1670_v2 }
  0xfe   :  { %v1626_v20 = vpop.f32.mrf.mxu0 }
  0xff   :  { %v601_v31 = vmul.f32 %v1626_v20, %v1626_v20  ;;  %v491_v3 = vsel %vm467_vm0, %v1626_v20, 0.0 }
 0x100   :  { %v492_v11 = vadd.f32 %v491_v3, %v490_v8  ;;  %v676_v3 = vsel %vm467_vm0, %v604_v19, 0.0  ;;  %v606_v8 = vmul.f32 %v1523_v46, %v1523_v46  ;;  %v608_v19 = vmul.f32 %v1537_v53, %v1537_v53 }
 0x101   :  { %v670_v9 = vsel %vm467_vm0, %v601_v31, 0.0 }
 0x102   :  { %v671_v16 = vadd.f32 %v670_v9, %v669_v10 }
 0x106   :  { %v1648_v12 = vpop.f32.mrf.mxu0 }
 0x107   :  { %v493_v14 = vsel %vm467_vm0, %v1648_v12, 0.0  ;;  %v602_v15 = vmul.f32 %v1648_v12, %v1648_v12 }
 0x108   :  { %v494_v17 = vadd.f32 %v493_v14, %v492_v11  ;;  %v678_v11 = vsel %vm467_vm0, %v605_v28, 0.0  ;;  %v607_v14 = vmul.f32 %v1529_v49, %v1529_v49 }
 0x109   :  { %v672_v21 = vsel %vm467_vm0, %v602_v15, 0.0 }
 0x10a   :  { %v496_v22 = vadd.f32 %v495_v18, %v494_v17  ;;  %v673_v23 = vadd.f32 %v672_v21, %v671_v16  ;;  %v680_v17 = vsel %vm467_vm0, %v606_v8, 0.0  ;;  %v503_v18 = vsel %vm467_vm0, %v1529_v49, 0.0 }
 0x10b   :  { %v610_v8 = vmul.f32 %v1551_v60, %v1551_v60 }
 0x10c   :  { %v498_v31 = vadd.f32 %v497_v27, %v496_v22  ;;  %v675_v32 = vadd.f32 %v674_v25, %v673_v23  ;;  %v682_v23 = vsel %vm467_vm0, %v607_v14, 0.0  ;;  %v505_v25 = vsel %vm467_vm0, %v1537_v53, 0.0 }
 0x10d   :  { %v609_v27 = vmul.f32 %v1543_v56, %v1543_v56 }
 0x10e   :  { %v500_v9 = vadd.f32 %v499_v4, %v498_v31  ;;  %v677_v10 = vadd.f32 %v676_v3, %v675_v32  ;;  %v1692_v32 = vpop.f32.mrf.mxu1  ;;  %v684_v3 = vsel %vm467_vm0, %v608_v19, 0.0  ;;  %v507_v4 = vsel %vm467_vm0, %v1543_v56, 0.0 }
 0x10f   :  { %2556 = vst [vmem:[#allocation9_spill] sm:$0xff] %v1692_v32  ;;  %v686_v14 = vsel %vm467_vm0, %v609_v27, 0.0  ;;  %v688_v19 = vsel %vm467_vm0, %v610_v8, 0.0 }
 0x110   :  { %v502_v15 = vadd.f32 %v501_v13, %v500_v9  ;;  %v679_v16 = vadd.f32 %v678_v11, %v677_v10  ;;  %v1699_v11 = vpop.f32.mrf.mxu2  ;;  %v1701_v13 = vpop.f32.mrf.mxu3 }
 0x111   :  { %2557 = vst [vmem:[#allocation10_spill] sm:$0xff] %v1701_v13 }
 0x112   :  { %v504_v21 = vadd.f32 %v503_v18, %v502_v15  ;;  %v681_v22 = vadd.f32 %v680_v17, %v679_v16  ;;  %v509_v15 = vsel %vm467_vm0, %v1551_v60, 0.0  ;;  %v611_v16 = vmul.f32 %v1561_v1, %v1561_v1 }
 0x114   :  { %v506_v28 = vadd.f32 %v505_v25, %v504_v21  ;;  %v683_v31 = vadd.f32 %v682_v23, %v681_v22  ;;  %v511_v21 = vsel %vm467_vm0, %v1561_v1, 0.0  ;;  %v612_v22 = vmul.f32 %v1600_v30, %v1600_v30 }
 0x115   :  { %v690_v27 = vsel %vm467_vm0, %v611_v16, 0.0 }
 0x116   :  { %v685_v9 = vadd.f32 %v684_v3, %v683_v31  ;;  %v508_v10 = vadd.f32 %v507_v4, %v506_v28  ;;  %v513_v28 = vsel %vm467_vm0, %v1600_v30, 0.0  ;;  %v613_v31 = vmul.f32 %v1633_v26, %v1633_v26 }
 0x117   :  { %v692_v8 = vsel %vm467_vm0, %v612_v22, 0.0 }
 0x118   :  { %v510_v17 = vadd.f32 %v509_v15, %v508_v10  ;;  %v687_v18 = vadd.f32 %v686_v14, %v685_v9  ;;  %v515_v9 = vsel %vm467_vm0, %v1633_v26, 0.0  ;;  %v614_v10 = vmul.f32 %v1661_v24, %v1661_v24 }
 0x119   :  { %v694_v16 = vsel %vm467_vm0, %v613_v31, 0.0 }
 0x11a   :  { %v512_v23 = vadd.f32 %v511_v21, %v510_v17  ;;  %v689_v25 = vadd.f32 %v688_v19, %v687_v18  ;;  %v1723_v17 = vpop.f32.mrf.mxu1  ;;  %v517_v18 = vsel %vm467_vm0, %v1661_v24, 0.0  ;;  %v615_v19 = vmul.f32 %v1692_v32, %v1692_v32 }
 0x11b   :  { %v616_v31 = vmul.f32 %v1723_v17, %v1723_v17 }
 0x11c   :  { %v514_v3 = vadd.f32 %v513_v28, %v512_v23  ;;  %v691_v4 = vadd.f32 %v690_v27, %v689_v25  ;;  %v1730_v23 = vpop.f32.mrf.mxu2  ;;  %v1732_v25 = vpop.f32.mrf.mxu3  ;;  %v696_v27 = vsel %vm467_vm0, %v614_v10, 0.0  ;;  %v519_v28 = vsel %vm467_vm0, %v1692_v32, 0.0 }
 0x11d   :  { %2558 = vst [vmem:[#allocation11_spill] sm:$0xff] %v1730_v23  ;;  %v523_v10 = vsel %vm467_vm0, %v1510_v40, 0.0  ;;  %v700_v32 = vsel %vm467_vm0, %v616_v31, 0.0  ;;  %v620_v31 = vmul.f32 %v1531_v50, %v1531_v50 }
 0x11e   :  { %v516_v14 = vadd.f32 %v515_v9, %v514_v3  ;;  %v693_v15 = vadd.f32 %v692_v8, %v691_v4  ;;  %2559 = vst [vmem:[#allocation12_spill] sm:$0xff] %v1732_v25  ;;  %v617_v8 = vmul.f32 %v1510_v40, %v1510_v40  ;;  %v698_v9 = vsel %vm467_vm0, %v615_v19, 0.0 }
 0x11f   :  { %v525_v19 = vsel %vm467_vm0, %v1519_v44, 0.0 }
 0x120   :  { %v518_v21 = vadd.f32 %v517_v18, %v516_v14  ;;  %v695_v22 = vadd.f32 %v694_v16, %v693_v15  ;;  %v521_v14 = vsel %vm467_vm0, %v1723_v17, 0.0  ;;  %v618_v18 = vmul.f32 %v1519_v44, %v1519_v44 }
 0x122   :  { %v697_v3 = vadd.f32 %v696_v27, %v695_v22  ;;  %v520_v4 = vadd.f32 %v519_v28, %v518_v21  ;;  %v702_v27 = vsel %vm467_vm0, %v617_v8, 0.0  ;;  %v619_v28 = vmul.f32 %v1525_v47, %v1525_v47 }
 0x124   :  { %v699_v15 = vadd.f32 %v698_v9, %v697_v3  ;;  %v522_v16 = vadd.f32 %v521_v14, %v520_v4  ;;  %v704_v9 = vsel %vm467_vm0, %v618_v18, 0.0  ;;  %v527_v14 = vsel %vm467_vm0, %v1525_v47, 0.0  ;;  %v1761_v8 = vpop.f32.mrf.mxu3 }
 0x125   :  { %2561 = vst [vmem:[#allocation14_spill] sm:$0xff] %v1761_v8  ;;  %v621_v18 = vmul.f32 %v1539_v54, %v1539_v54  ;;  %v623_v47 = vmul.f32 %v1553_v61, %v1553_v61 }
 0x126   :  { %v524_v22 = vadd.f32 %v523_v10, %v522_v16  ;;  %v701_v21 = vadd.f32 %v700_v32, %v699_v15  ;;  %v1759_v15 = vpop.f32.mrf.mxu2  ;;  %v706_v10 = vsel %vm467_vm0, %v619_v28, 0.0 }
 0x127   :  { %2560 = vst [vmem:[#allocation13_spill] sm:$0xff] %v1759_v15  ;;  %v710_v28 = vsel %vm467_vm0, %v621_v18, 0.0  ;;  %v714_v18 = vsel %vm467_vm0, %v623_v47, 0.0  ;;  %v626_v47 = vmul.f32 %v1640_v34, %v1640_v34 }
 0x128   :  { %v526_v3 = vadd.f32 %v525_v19, %v524_v22  ;;  %v703_v4 = vadd.f32 %v702_v27, %v701_v21  ;;  %v529_v22 = vsel %vm467_vm0, %v1531_v50, 0.0  ;;  %v708_v19 = vsel %vm467_vm0, %v620_v31, 0.0 }
 0x129   :  { %v533_v50 = vsel %vm467_vm0, %v1545_v57, 0.0 }
 0x12a   :  { %v528_v16 = vadd.f32 %v527_v14, %v526_v3  ;;  %v705_v32 = vadd.f32 %v704_v9, %v703_v4  ;;  %v531_v3 = vsel %vm467_vm0, %v1539_v54, 0.0  ;;  %v622_v4 = vmul.f32 %v1545_v57, %v1545_v57 }
 0x12c   :  { %v530_v21 = vadd.f32 %v529_v22, %v528_v16  ;;  %v707_v27 = vadd.f32 %v706_v10, %v705_v32  ;;  %v712_v31 = vsel %vm467_vm0, %v622_v4, 0.0  ;;  %v535_v10 = vsel %vm467_vm0, %v1553_v61, 0.0  ;;  %v1790_v4 = vpop.f32.mrf.mxu3 }
 0x12d   :  { %v624_v22 = vmul.f32 %v1569_v5, %v1569_v5  ;;  %2562 = vst [vmem:[#allocation15_spill] sm:$0xff] %v1790_v4 }
 0x12e   :  { %v532_v9 = vadd.f32 %v531_v3, %v530_v21  ;;  %v709_v14 = vadd.f32 %v708_v19, %v707_v27  ;;  %v537_v19 = vsel %vm467_vm0, %v1569_v5, 0.0  ;;  %v625_v3 = vmul.f32 %v1607_v41, %v1607_v41 }
 0x12f   :  { %v628_v5 = vmul.f32 %v1699_v11, %v1699_v11 }
 0x130   :  { %v534_v16 = vadd.f32 %v533_v50, %v532_v9  ;;  %v711_v32 = vadd.f32 %v710_v28, %v709_v14  ;;  %v1788_v14 = vpop.f32.mrf.mxu2  ;;  %v716_v28 = vsel %vm467_vm0, %v624_v22, 0.0  ;;  %v720_v22 = vsel %vm467_vm0, %v626_v47, 0.0 }
 0x131   :  { %v724_v47 = vsel %vm467_vm0, %v628_v5, 0.0  ;;  %v631_v5 = vmul.f32 %v1788_v14, %v1788_v14 }
 0x132   :  { %v713_v21 = vadd.f32 %v712_v31, %v711_v32  ;;  %v536_v27 = vadd.f32 %v535_v10, %v534_v16  ;;  %v539_v32 = vsel %vm467_vm0, %v1607_v41, 0.0  ;;  %v718_v10 = vsel %vm467_vm0, %v625_v3, 0.0 }
 0x133   :  { %v543_v41 = vsel %vm467_vm0, %v1668_v33, 0.0 }
 0x134   :  { %v538_v50 = vadd.f32 %v537_v19, %v536_v27  ;;  %v715_v9 = vadd.f32 %v714_v18, %v713_v21  ;;  %v541_v27 = vsel %vm467_vm0, %v1640_v34, 0.0  ;;  %v627_v21 = vmul.f32 %v1668_v33, %v1668_v33 }
 0x136   :  { %v540_v16 = vadd.f32 %v539_v32, %v538_v50  ;;  %v717_v31 = vadd.f32 %v716_v28, %v715_v9  ;;  %v722_v3 = vsel %vm467_vm0, %v627_v21, 0.0  ;;  %v545_v28 = vsel %vm467_vm0, %v1699_v11, 0.0  ;;  %v1819_v21 = vpop.f32.mrf.mxu3 }
 0x137   :  { %v629_v32 = vmul.f32 %v1730_v23, %v1730_v23  ;;  %2563 = vst [vmem:[#allocation16_spill] sm:$0xff] %v1819_v21 }
 0x138   :  { %v542_v18 = vadd.f32 %v541_v27, %v540_v16  ;;  %v719_v19 = vadd.f32 %v718_v10, %v717_v31  ;;  %v547_v10 = vsel %vm467_vm0, %v1730_v23, 0.0  ;;  %v630_v27 = vmul.f32 %v1759_v15, %v1759_v15 }
 0x13a   :  { %v544_v50 = vadd.f32 %v543_v41, %v542_v18  ;;  %v721_v9 = vadd.f32 %v720_v22, %v719_v19  ;;  %v1817_v19 = vpop.f32.mrf.mxu2  ;;  %v726_v22 = vsel %vm467_vm0, %v629_v32, 0.0  ;;  %v633_v32 = vmul.f32 %v1547_v58, %v1547_v58 }
 0x13b   :  { %v553_v23 = vsel %vm467_vm0, %v1817_v19, 0.0 }
 0x13c   :  { %v546_v16 = vadd.f32 %v545_v28, %v544_v50  ;;  %v723_v31 = vadd.f32 %v722_v3, %v721_v9  ;;  %v549_v50 = vsel %vm467_vm0, %v1759_v15, 0.0  ;;  %v728_v28 = vsel %vm467_vm0, %v630_v27, 0.0 }
 0x13d   :  { %v730_v15 = vsel %vm467_vm0, %v631_v5, 0.0  ;;  %v555_v27 = vsel %vm467_vm0, %v1547_v58, 0.0  ;;  %v557_v5 = vsel %vm467_vm0, %v1555_v62, 0.0  ;;  %v559_v58 = vsel %vm467_vm0, %v1573_v7, 0.0 }
 0x13e   :  { %v725_v41 = vadd.f32 %v724_v47, %v723_v31  ;;  %v548_v18 = vadd.f32 %v547_v10, %v546_v16  ;;  %v551_v31 = vsel %vm467_vm0, %v1788_v14, 0.0  ;;  %v632_v16 = vmul.f32 %v1817_v19, %v1817_v19 }
 0x140   :  { %v727_v9 = vadd.f32 %v726_v22, %v725_v41  ;;  %v550_v3 = vadd.f32 %v549_v50, %v548_v18  ;;  %v634_v22 = vmul.f32 %v1555_v62, %v1555_v62  ;;  %v732_v50 = vsel %vm467_vm0, %v632_v16, 0.0 }
 0x141   :  { %v636_v16 = vmul.f32 %v1609_v0, %v1609_v0 }
 0x142   :  { %v729_v47 = vadd.f32 %v728_v28, %v727_v9  ;;  %v552_v10 = vadd.f32 %v551_v31, %v550_v3  ;;  %v734_v28 = vsel %vm467_vm0, %v633_v32, 0.0  ;;  %v635_v31 = vmul.f32 %v1573_v7, %v1573_v7 }
 0x144   :  { %v731_v41 = vadd.f32 %v730_v15, %v729_v47  ;;  %v554_v18 = vadd.f32 %v553_v23, %v552_v10  ;;  %v1846_v47 = vpop.f32.mrf.mxu3  ;;  %v736_v10 = vsel %vm467_vm0, %v634_v22, 0.0  ;;  %v740_v22 = vsel %vm467_vm0, %v636_v16, 0.0 }
 0x145   :  { %2564 = vst [vmem:[#allocation17_spill] sm:$0xff] %v1846_v47 }
 0x146   :  { %v556_v9 = vadd.f32 %v555_v27, %v554_v18  ;;  %v733_v3 = vadd.f32 %v732_v50, %v731_v41  ;;  %v738_v18 = vsel %vm467_vm0, %v635_v31, 0.0  ;;  %v561_v27 = vsel %vm467_vm0, %v1609_v0, 0.0 }
 0x147   :  { %v637_v50 = vmul.f32 %v1642_v35, %v1642_v35 }
 0x148   :  { %v558_v15 = vadd.f32 %v557_v5, %v556_v9  ;;  %v735_v23 = vadd.f32 %v734_v28, %v733_v3  ;;  %v563_v28 = vsel %vm467_vm0, %v1642_v35, 0.0  ;;  %v638_v5 = vmul.f32 %v1670_v2, %v1670_v2 }
 0x149   :  { %v742_v31 = vsel %vm467_vm0, %v637_v50, 0.0 }
 0x14a   :  { %v560_v41 = vadd.f32 %v559_v58, %v558_v15  ;;  %v737_v32 = vadd.f32 %v736_v10, %v735_v23  ;;  %v565_v23 = vsel %vm467_vm0, %v1670_v2, 0.0  ;;  %v639_v10 = vmul.f32 %v1701_v13, %v1701_v13 }
 0x14b   :  { %v744_v16 = vsel %vm467_vm0, %v638_v5, 0.0 }
 0x14c   :  { %v562_v9 = vadd.f32 %v561_v27, %v560_v41  ;;  %v739_v3 = vadd.f32 %v738_v18, %v737_v32  ;;  %v567_v18 = vsel %vm467_vm0, %v1701_v13, 0.0  ;;  %v640_v27 = vmul.f32 %v1732_v25, %v1732_v25 }
 0x14d   :  { %v746_v50 = vsel %vm467_vm0, %v639_v10, 0.0 }
 0x14e   :  { %v564_v58 = vadd.f32 %v563_v28, %v562_v9  ;;  %v741_v15 = vadd.f32 %v740_v22, %v739_v3  ;;  %v1873_v22 = vpop.f32.mrf.mxu3  ;;  %v569_v28 = vsel %vm467_vm0, %v1732_v25, 0.0  ;;  %v643_v25 = vmul.f32 %v1819_v21, %v1819_v21 }
 0x14f   :  { %2565 = vst [vmem:[#allocation18_spill] sm:$0xff] %v1873_v22 }
 0x150   :  { %v743_v41 = vadd.f32 %v742_v31, %v741_v15  ;;  %v566_v32 = vadd.f32 %v565_v23, %v564_v58  ;;  %v641_v58 = vmul.f32 %v1761_v8, %v1761_v8  ;;  %v748_v31 = vsel %vm467_vm0, %v640_v27, 0.0 }
 0x151   :  { %v571_v23 = vsel %vm467_vm0, %v1761_v8, 0.0 }
 0x152   :  { %v568_v9 = vadd.f32 %v567_v18, %v566_v32  ;;  %v745_v3 = vadd.f32 %v744_v16, %v743_v41  ;;  %v642_v41 = vmul.f32 %v1790_v4, %v1790_v4  ;;  %v750_v10 = vsel %vm467_vm0, %v641_v58, 0.0 }
 0x153   :  { %v573_v18 = vsel %vm467_vm0, %v1790_v4, 0.0  ;;  %v754_v58 = vsel %vm467_vm0, %v643_v25, 0.0 }
 0x154   :  { %v570_v15 = vadd.f32 %v569_v28, %v568_v9  ;;  %v747_v5 = vadd.f32 %v746_v50, %v745_v3  ;;  %v752_v27 = vsel %vm467_vm0, %v642_v41, 0.0  ;;  %v575_v50 = vsel %vm467_vm0, %v1819_v21, 0.0 }
 0x155   :  { %v644_v28 = vmul.f32 %v1846_v47, %v1846_v47 }
 0x156   :  { %v572_v32 = vadd.f32 %v571_v23, %v570_v15  ;;  %v749_v16 = vadd.f32 %v748_v31, %v747_v5  ;;  %v577_v31 = vsel %vm467_vm0, %v1846_v47, 0.0  ;;  %v645_v23 = vmul.f32 %v1873_v22, %v1873_v22 }
 0x157   :  { %v756_v41 = vsel %vm467_vm0, %v644_v28, 0.0 }
 0x158   :  { %v574_v9 = vadd.f32 %v573_v18, %v572_v32  ;;  %v751_v3 = vadd.f32 %v750_v10, %v749_v16  ;;  %v1900_v10 = vpop.f32.mrf.mxu3  ;;  %v579_v18 = vsel %vm467_vm0, %v1873_v22, 0.0 }
 0x159   :  { %2566 = vst [vmem:[#allocation19_spill] sm:$0xff] %v1900_v10  ;;  %v581_v25 = vsel %vm467_vm0, %v1900_v10, 0.0 }
 0x15a   :  { %v576_v15 = vadd.f32 %v575_v50, %v574_v9  ;;  %v753_v5 = vadd.f32 %v752_v27, %v751_v3  ;;  %v758_v3 = vsel %vm467_vm0, %v645_v23, 0.0  ;;  %v646_v27 = vmul.f32 %v1900_v10, %v1900_v10 }
 0x15c   :  { %v755_v32 = vadd.f32 %v754_v58, %v753_v5  ;;  %v578_v16 = vadd.f32 %v577_v31, %v576_v15  ;;  %v1368_v15 = vmov 450.0   ;;  %v760_v58 = vsel %vm467_vm0, %v646_v27, 0.0 }
 0x15d   :  { %1364 = vrcp.f32 %v1368_v15 }
 0x15e   :  { %v757_v21 = vadd.f32 %v756_v41, %v755_v32  ;;  %v580_v9 = vadd.f32 %v579_v18, %v578_v16 }
 0x160   :  { %v759_v50 = vadd.f32 %v758_v3, %v757_v21  ;;  %v582_v5 = vadd.f32 %v581_v25, %v580_v9 }
 0x162   :  { %v583_v28 = vrot.slane %v582_v5, 4  ;;  %v761_v31 = vadd.f32 %v760_v58, %v759_v50 }
 0x163   :  { %v1365_v47 = vpop.eup %1364 }
 0x164   :  { %v584_v22 = vadd.f32 %v583_v28, %v582_v5  ;;  %v762_v32 = vrot.slane %v761_v31, 4  ;;  %v769_v16 = vmul.f32 450.0, %v1365_v47  ;;  %vm773_vm1 = vweird.f32 %v1365_v47 }
 0x166   :  { %v585_v41 = vrot.slane %v584_v22, 2  ;;  %v763_v23 = vadd.f32 %v762_v32, %v761_v31  ;;  %v770_v18 = vsub.f32 1.0, %v769_v16 }
 0x168   :  { %v586_v4 = vadd.f32 %v585_v41, %v584_v22  ;;  %v764_v8 = vrot.slane %v763_v23, 2  ;;  %v771_v13 = vmul.f32 %v1365_v47, %v770_v18 }
 0x16a   :  { %v587_v2 = vrot.slane %v586_v4, 1  ;;  %v765_v10 = vadd.f32 %v764_v8, %v763_v23  ;;  %v772_v21 = vadd.f32 %v1365_v47, %v771_v13 }
 0x16c   :  { %v588_v9 = vadd.f32 %v587_v2, %v586_v4  ;;  %v766_v3 = vrot.slane %v765_v10, 1  ;;  %v774_v25 = vsel %vm773_vm1, %v1365_v47, %v772_v21  ;;  %v780_v2 = vld [vmem:[%s2528_s2] sm:$0x1] }
 0x16e   :  { %v767_v27 = vadd.f32 %v766_v3, %v765_v10  ;;  %v775_v15 = vmul.f32 %v774_v25, %v588_v9  ;;  %v793_v10 = vld [vmem:[%s2529_s3] sm:$0x1] }
 0x170   :  { %v776_v50 = vmul.f32 %v774_v25, %v767_v27  ;;  %v777_v58 = vmul.f32 %v775_v15, %v775_v15 }
 0x172   :  { %v778_v5 = vsub.f32 %v776_v50, %v777_v58  ;;  %v2569_v58 = vld [vmem:[#allocation3_spill] sm:$0xff] }
 0x174   :  { %v779_v28 = vmax.f32 %v778_v5, 0.0 }
 0x176   :  { %v781_v35 = vadd.f32 1e-05, %v779_v28  ;;  %v2570_v28 = vld [vmem:[#allocation5_spill] sm:$0xff] }
 0x178   :  { %1366 = vrsqrt.f32 %v781_v35  ;;  %vm788_vm3 = vweird.f32 %v781_v35 }
 0x17e   :  { %v1367_v31 = vpop.eup %1366 }
 0x17f   :  { %v783_v32 = vmul.f32 %v1367_v31, %v781_v35  ;;  %vm789_vm2 = vweird.f32 %v1367_v31 }
 0x180   :  { %vm790_vm4 = vmor %vm788_vm3, %vm789_vm2 }
 0x181   :  { %v784_v22 = vmul.f32 %v1367_v31, %v783_v32  ;;  %v2571_v32 = vld [vmem:[#allocation6_spill] sm:$0xff] }
 0x183   :  { %v785_v16 = vmul.f32 0.5, %v784_v22 }
 0x185   :  { %v786_v41 = vsub.f32 1.5, %v785_v16  ;;  %v2572_v16 = vld [vmem:[#allocation11_spill] sm:$0xff] }
 0x187   :  { %v787_v18 = vmul.f32 %v1367_v31, %v786_v41 }
 0x189   :  { %v791_v13 = vsel %vm790_vm4, %v1367_v31, %v787_v18  ;;  %v2573_v18 = vld [vmem:[#allocation13_spill] sm:$0xff] }
 0x18a   :  { %v792_v8 = vmul.f32 %v791_v13, %v780_v2 }
 0x18c   :  { %v794_v4 = vmul.f32 %v792_v8, %v775_v15  ;;  %v1914_v47 = vperm.slane %v792_v8, 0 }
 0x18e   :  { %v795_v23 = vsub.f32 %v793_v10, %v794_v4  ;;  %v799_v21 = vmul.f32 %v1914_v47, %v1502_v36  ;;  %v800_v35 = vmul.f32 %v1914_v47, %v1506_v38  ;;  %v801_v9 = vmul.f32 %v1914_v47, %v1515_v42 }
 0x18f   :  { %v802_v3 = vmul.f32 %v1914_v47, %v1521_v45  ;;  %v803_v25 = vmul.f32 %v1914_v47, %v1527_v48  ;;  %v804_v27 = vmul.f32 %v1914_v47, %v1533_v51  ;;  %v805_v15 = vmul.f32 %v1914_v47, %v1535_v52 }
 0x190   :  { %v1935_v36 = vmul.f32 %v1914_v47, %v1541_v55  ;;  %v1939_v38 = vmul.f32 %v1914_v47, %v1549_v59  ;;  %v1943_v42 = vmul.f32 %v1914_v47, %v1557_v63  ;;  %v1947_v45 = vmul.f32 %v1914_v47, %v1571_v6 }
 0x191   :  { %v1951_v48 = vmul.f32 %v1914_v47, %v1598_v29  ;;  %v1955_v51 = vmul.f32 %v1914_v47, %v1626_v20  ;;  %v1959_v52 = vmul.f32 %v1914_v47, %v1648_v12  ;;  %v1963_v55 = vmul.f32 %v1914_v47, %v1504_v37  ;;  %v2567_v20 = vld [vmem:[#allocation9_spill] sm:$0xff] }
 0x192   :  { %v1967_v59 = vmul.f32 %v1914_v47, %v1508_v39  ;;  %v1971_v63 = vmul.f32 %v1914_v47, %v1517_v43  ;;  %v1975_v6 = vmul.f32 %v1914_v47, %v1523_v46  ;;  %v1979_v29 = vmul.f32 %v1914_v47, %v1529_v49 }
 0x193   :  { %v1983_v37 = vmul.f32 %v1914_v47, %v1537_v53  ;;  %v1987_v39 = vmul.f32 %v1914_v47, %v1543_v56  ;;  %v1991_v43 = vmul.f32 %v1914_v47, %v1551_v60  ;;  %v1995_v46 = vmul.f32 %v1914_v47, %v1561_v1 }
 0x194   :  { %v1999_v49 = vmul.f32 %v1914_v47, %v1600_v30  ;;  %v2003_v53 = vmul.f32 %v1914_v47, %v1633_v26  ;;  %v2007_v56 = vmul.f32 %v1914_v47, %v1661_v24  ;;  %v2011_v60 = vmul.f32 %v1914_v47, %v2567_v20  ;;  %v2568_v24 = vld [vmem:[#allocation2_spill] sm:$0xff]  ;;  %v2577_v20 = vld [vmem:[#allocation8_spill] sm:$0xff] }
 0x195   :  { %v2015_v1 = vmul.f32 %v1914_v47, %v1723_v17  ;;  %v2019_v30 = vmul.f32 %v1914_v47, %v1510_v40  ;;  %v2021_v12 = vperm.slane %v795_v23, 0  ;;  %v2025_v26 = vmul.f32 %v1914_v47, %v1519_v44  ;;  %v2575_v23 = vld [vmem:[#allocation7_spill] sm:$0xff] }
 0x196   :  { %v2029_v50 = vmul.f32 %v1914_v47, %v2568_v24  ;;  %v2033_v5 = vmul.f32 %v1914_v47, %v2569_v58  ;;  %v2037_v17 = vmul.f32 %v1914_v47, %v1539_v54  ;;  %v2041_v40 = vmul.f32 %v1914_v47, %v1545_v57  ;;  %v2579_v58 = vld [vmem:[#allocation10_spill] sm:$0xff] }
 0x197   :  { %v2045_v44 = vmul.f32 %v1914_v47, %v1553_v61  ;;  %v2049_v31 = vmul.f32 %v1914_v47, %v2570_v28  ;;  %v2053_v22 = vmul.f32 %v1914_v47, %v2571_v32  ;;  %v2057_v54 = vmul.f32 %v1914_v47, %v1640_v34  ;;  %v2581_v28 = vld [vmem:[#allocation12_spill] sm:$0xff] }
 0x198   :  { %v2061_v57 = vmul.f32 %v1914_v47, %v1668_v33  ;;  %v2065_v61 = vmul.f32 %v1914_v47, %v1699_v11  ;;  %v2069_v41 = vmul.f32 %v1914_v47, %v2572_v16  ;;  %v2073_v2 = vmul.f32 %v1914_v47, %v2573_v18  ;;  %v2574_v11 = vld [vmem:[#allocation4_spill] sm:$0xff]  ;;  %v2585_v18 = vld [vmem:[#allocation15_spill] sm:$0xff] }
 0x199   :  { %v2077_v34 = vmul.f32 %v1914_v47, %v1788_v14  ;;  %v2081_v33 = vmul.f32 %v1914_v47, %v1817_v19  ;;  %v860_v13 = vadd.f32 %v2021_v12, %v799_v21  ;;  %v2086_v8 = vmul.f32 %v1914_v47, %v2574_v11 }
 0x19a   :  { %v2090_v4 = vmul.f32 %v1914_v47, %v1555_v62  ;;  %v2094_v10 = vmul.f32 %v1914_v47, %v1573_v7  ;;  %v861_v14 = vadd.f32 %v2021_v12, %v800_v35  ;;  %v2099_v19 = vmul.f32 %v1914_v47, %v1609_v0  ;;  %v2583_v0 = vld [vmem:[#allocation14_spill] sm:$0xff] }
 0x19b   :  { %v2103_v21 = vmul.f32 %v1914_v47, %v2575_v23  ;;  %v2107_v24 = vmul.f32 %v1914_v47, %v2577_v20  ;;  %v862_v62 = vadd.f32 %v2021_v12, %v801_v9  ;;  %v2112_v7 = vmul.f32 %v1914_v47, %v2579_v58  ;;  %v2587_v23 = vld [vmem:[#allocation16_spill] sm:$0xff] }
 0x19c   :  { %v2116_v35 = vmul.f32 %v1914_v47, %v2581_v28  ;;  %v2120_v32 = vmul.f32 %v1914_v47, %v2583_v0  ;;  %v863_v16 = vadd.f32 %v2021_v12, %v802_v3  ;;  %v2125_v11 = vmul.f32 %v1914_v47, %v2585_v18  ;;  %v2591_v3 = vld [vmem:[#allocation18_spill] sm:$0xff] }
 0x19d   :  { %2576 = vst [vmem:[#allocation9_spill] sm:$0xff] %v2103_v21  ;;  %v2129_v9 = vmul.f32 %v1914_v47, %v2587_v23  ;;  %v864_v20 = vadd.f32 %v2021_v12, %v803_v25  ;;  %v976_v58 = vmul.f32 0.2, %v860_v13  ;;  %v865_v0 = vadd.f32 %v2021_v12, %v804_v27 }
 0x19e   :  { %2578 = vst [vmem:[#allocation2_spill] sm:$0xff] %v2107_v24  ;;  %vm918_vm5 = vcmp.ge.f32.partialorder %v860_v13, 0.0  ;;  %v866_v18 = vadd.f32 %v2021_v12, %v805_v15  ;;  %vm919_vm6 = vcmp.ge.f32.partialorder %v861_v14, 0.0  ;;  %v978_v23 = vmul.f32 0.2, %v862_v62 }
 0x19f   :  { %2580 = vst [vmem:[#allocation3_spill] sm:$0xff] %v2112_v7  ;;  %v2589_v7 = vld [vmem:[#allocation17_spill] sm:$0xff]  ;;  %vm920_vm7 = vcmp.ge.f32.partialorder %v862_v62, 0.0  ;;  %v868_v27 = vadd.f32 %v2021_v12, %v1939_v38  ;;  %vm921_vm8 = vcmp.ge.f32.partialorder %v863_v16, 0.0  ;;  %v869_v15 = vadd.f32 %v2021_v12, %v1943_v42 }
 0x1a0   :  { %2582 = vst [vmem:[#allocation5_spill] sm:$0xff] %v2116_v35  ;;  %v2134_v28 = vmul.f32 %v1914_v47, %v2589_v7  ;;  %v2139_v35 = vmul.f32 %v1914_v47, %v2591_v3  ;;  %v867_v7 = vadd.f32 %v2021_v12, %v1935_v36  ;;  %v1034_v3 = vsel %vm918_vm5, %v860_v13, %v976_v58 }
 0x1a1   :  { %2584 = vst [vmem:[#allocation6_spill] sm:$0xff] %v2120_v32  ;;  %v977_v32 = vmul.f32 0.2, %v861_v14  ;;  %vm922_vm9 = vcmp.ge.f32.partialorder %v864_v20, 0.0  ;;  %vm923_vm10 = vcmp.ge.f32.partialorder %v865_v0, 0.0  ;;  %v1036_v36 = vsel %vm920_vm7, %v862_v62, %v978_v23 }
 0x1a2   :  { %2586 = vst [vmem:[#allocation11_spill] sm:$0xff] %v2125_v11  ;;  %v980_v11 = vmul.f32 0.2, %v864_v20  ;;  %vm924_vm11 = vcmp.ge.f32.partialorder %v866_v18, 0.0  ;;  %v983_v38 = vmul.f32 0.2, %v867_v7  ;;  %v872_v42 = vadd.f32 %v2021_v12, %v1955_v51 }
 0x1a3   :  { %2588 = vst [vmem:[#allocation13_spill] sm:$0xff] %v2129_v9  ;;  %v2593_v9 = vld [vmem:[#allocation19_spill] sm:$0xff]  ;;  %v1035_v24 = vsel %vm919_vm6, %v861_v14, %v977_v32  ;;  %vm925_vm12 = vcmp.ge.f32.partialorder %v867_v7, 0.0  ;;  %v984_v13 = vmul.f32 0.2, %v868_v27  ;;  %vm926_vm13 = vcmp.ge.f32.partialorder %v868_v27, 0.0 }
 0x1a4   :  { %2590 = vst [vmem:[#allocation4_spill] sm:$0xff] %v2134_v28  ;;  %v2144_v25 = vmul.f32 %v1914_v47, %v2593_v9  ;;  %v979_v28 = vmul.f32 0.2, %v863_v16  ;;  %v870_v47 = vadd.f32 %v2021_v12, %v1947_v45  ;;  %v982_v9 = vmul.f32 0.2, %v866_v18 }
 0x1a5   :  { %2592 = vst [vmem:[#allocation7_spill] sm:$0xff] %v2139_v35  ;;  %v981_v35 = vmul.f32 0.2, %v865_v0  ;;  %v1038_v45 = vsel %vm922_vm9, %v864_v20, %v980_v11  ;;  %v985_v14 = vmul.f32 0.2, %v869_v15  ;;  %v874_v51 = vadd.f32 %v2021_v12, %v1963_v55 }
 0x1a6   :  { %2594 = vst [vmem:[#allocation8_spill] sm:$0xff] %v2144_v25  ;;  %v871_v25 = vadd.f32 %v2021_v12, %v1951_v48  ;;  %v1037_v21 = vsel %vm921_vm8, %v863_v16, %v979_v28  ;;  %v873_v48 = vadd.f32 %v2021_v12, %v1959_v52  ;;  %vm927_vm14 = vcmp.ge.f32.partialorder %v869_v15, 0.0 }
 0x1a7   :  { %1092 = vst.msk [vmem:[%s2530_s4] sm:$0xff] %vm467_vm0, %v1034_v3  ;;  %v1039_v62 = vsel %vm923_vm10, %v865_v0, %v981_v35  ;;  %v986_v32 = vmul.f32 0.2, %v870_v47  ;;  %v1040_v16 = vsel %vm924_vm11, %v866_v18, %v982_v9  ;;  %v875_v52 = vadd.f32 %v2021_v12, %v1967_v59 }
 0x1a8   :  { %1093 = vst.msk [vmem:[%s2530_s4 + $0x8] sm:$0xff] %vm467_vm0, %v1035_v24  ;;  %vm928_vm15 = vcmp.ge.f32.partialorder %v870_v47, 0.0  ;;  %v987_v24 = vmul.f32 0.2, %v871_v25  ;;  %v1041_v35 = vsel %vm925_vm12, %v867_v7, %v983_v38  ;;  %v876_v55 = vadd.f32 %v2021_v12, %v1971_v63 }
 0x1a9   :  { %1094 = vst.msk [vmem:[%s2530_s4 + $0x10] sm:$0xff] %vm467_vm0, %v1036_v36  ;;  %vm929_vm1 = vcmp.ge.f32.partialorder %v871_v25, 0.0  ;;  %v988_v11 = vmul.f32 0.2, %v872_v42  ;;  %v1042_v20 = vsel %vm926_vm13, %v868_v27, %v984_v13  ;;  %v877_v59 = vadd.f32 %v2021_v12, %v1975_v6 }
 0x1aa   :  { %1095 = vst.msk [vmem:[%s2530_s4 + $0x18] sm:$0xff] %vm467_vm0, %v1037_v21  ;;  %vm930_vm2 = vcmp.ge.f32.partialorder %v872_v42, 0.0  ;;  %v989_v21 = vmul.f32 0.2, %v873_v48  ;;  %v1043_v58 = vsel %vm927_vm14, %v869_v15, %v985_v14  ;;  %v878_v63 = vadd.f32 %v2021_v12, %v1979_v29 }
 0x1ab   :  { %1096 = vst.msk [vmem:[%s2530_s4 + $0x20] sm:$0xff] %vm467_vm0, %v1038_v45  ;;  %vm931_vm3 = vcmp.ge.f32.partialorder %v873_v48, 0.0  ;;  %v990_v28 = vmul.f32 0.2, %v874_v51  ;;  %v1044_v0 = vsel %vm928_vm15, %v870_v47, %v986_v32  ;;  %v879_v6 = vadd.f32 %v2021_v12, %v1983_v37 }
 0x1ac   :  { %1097 = vst.msk [vmem:[%s2530_s4 + $0x28] sm:$0xff] %vm467_vm0, %v1039_v62  ;;  %vm932_vm4 = vcmp.ge.f32.partialorder %v874_v51, 0.0  ;;  %v991_v18 = vmul.f32 0.2, %v875_v52  ;;  %v1045_v23 = vsel %vm929_vm1, %v871_v25, %v987_v24  ;;  %v880_v29 = vadd.f32 %v2021_v12, %v1987_v39 }
 0x1ad   :  { %1098 = vst.msk [vmem:[%s2530_s4 + $0x30] sm:$0xff] %vm467_vm0, %v1040_v16  ;;  %vm933_vm5 = vcmp.ge.f32.partialorder %v875_v52, 0.0  ;;  %v992_v7 = vmul.f32 0.2, %v876_v55  ;;  %v1046_v27 = vsel %vm930_vm2, %v872_v42, %v988_v11  ;;  %v881_v37 = vadd.f32 %v2021_v12, %v1991_v43 }
 0x1ae   :  { %1099 = vst.msk [vmem:[%s2530_s4 + $0x38] sm:$0xff] %vm467_vm0, %v1041_v35  ;;  %vm934_vm6 = vcmp.ge.f32.partialorder %v876_v55, 0.0  ;;  %v993_v25 = vmul.f32 0.2, %v877_v59  ;;  %v1047_v3 = vsel %vm931_vm3, %v873_v48, %v989_v21  ;;  %v882_v39 = vadd.f32 %v2021_v12, %v1995_v46 }
 0x1af   :  { %1100 = vst.msk [vmem:[%s2530_s4 + $0x40] sm:$0xff] %vm467_vm0, %v1042_v20  ;;  %vm935_vm7 = vcmp.ge.f32.partialorder %v877_v59, 0.0  ;;  %v994_v15 = vmul.f32 0.2, %v878_v63  ;;  %v1048_v47 = vsel %vm932_vm4, %v874_v51, %v990_v28  ;;  %v883_v43 = vadd.f32 %v2021_v12, %v1999_v49 }
 0x1b0   :  { %1101 = vst.msk [vmem:[%s2530_s4 + $0x48] sm:$0xff] %vm467_vm0, %v1043_v58  ;;  %vm936_vm8 = vcmp.ge.f32.partialorder %v878_v63, 0.0  ;;  %v995_v9 = vmul.f32 0.2, %v879_v6  ;;  %v1049_v36 = vsel %vm933_vm5, %v875_v52, %v991_v18  ;;  %v884_v46 = vadd.f32 %v2021_v12, %v2003_v53 }
 0x1b1   :  { %1102 = vst.msk [vmem:[%s2530_s4 + $0x50] sm:$0xff] %vm467_vm0, %v1044_v0  ;;  %vm937_vm9 = vcmp.ge.f32.partialorder %v879_v6, 0.0  ;;  %v996_v38 = vmul.f32 0.2, %v880_v29  ;;  %v1050_v42 = vsel %vm934_vm6, %v876_v55, %v992_v7  ;;  %v885_v49 = vadd.f32 %v2021_v12, %v2007_v56 }
 0x1b2   :  { %1103 = vst.msk [vmem:[%s2530_s4 + $0x58] sm:$0xff] %vm467_vm0, %v1045_v23  ;;  %vm938_vm10 = vcmp.ge.f32.partialorder %v880_v29, 0.0  ;;  %v997_v13 = vmul.f32 0.2, %v881_v37  ;;  %v1051_v45 = vsel %vm935_vm7, %v877_v59, %v993_v25  ;;  %v886_v53 = vadd.f32 %v2021_v12, %v2011_v60 }
 0x1b3   :  { %1104 = vst.msk [vmem:[%s2530_s4 + $0x60] sm:$0xff] %vm467_vm0, %v1046_v27  ;;  %vm939_vm11 = vcmp.ge.f32.partialorder %v881_v37, 0.0  ;;  %v998_v48 = vmul.f32 0.2, %v882_v39  ;;  %v1052_v14 = vsel %vm936_vm8, %v878_v63, %v994_v15  ;;  %v887_v56 = vadd.f32 %v2021_v12, %v2015_v1 }
 0x1b4   :  { %1105 = vst.msk [vmem:[%s2530_s4 + $0x68] sm:$0xff] %vm467_vm0, %v1047_v3  ;;  %vm940_vm12 = vcmp.ge.f32.partialorder %v882_v39, 0.0  ;;  %v999_v62 = vmul.f32 0.2, %v883_v43  ;;  %v1053_v51 = vsel %vm937_vm9, %v879_v6, %v995_v9  ;;  %v888_v60 = vadd.f32 %v2021_v12, %v2019_v30 }
 0x1b5   :  { %1106 = vst.msk [vmem:[%s2530_s4 + $0x70] sm:$0xff] %vm467_vm0, %v1048_v47  ;;  %vm941_vm13 = vcmp.ge.f32.partialorder %v883_v43, 0.0  ;;  %v1000_v32 = vmul.f32 0.2, %v884_v46  ;;  %v1054_v16 = vsel %vm938_vm10, %v880_v29, %v996_v38  ;;  %v889_v1 = vadd.f32 %v2021_v12, %v2025_v26 }
 0x1b6   :  { %1107 = vst.msk [vmem:[%s2530_s4 + $0x78] sm:$0xff] %vm467_vm0, %v1049_v36  ;;  %vm942_vm14 = vcmp.ge.f32.partialorder %v884_v46, 0.0  ;;  %v1001_v52 = vmul.f32 0.2, %v885_v49  ;;  %v1055_v24 = vsel %vm939_vm11, %v881_v37, %v997_v13  ;;  %v890_v30 = vadd.f32 %v2021_v12, %v2029_v50 }
 0x1b7   :  { %1108 = vst.msk [vmem:[%s2530_s4 + $0x80] sm:$0xff] %vm467_vm0, %v1050_v42  ;;  %vm943_vm15 = vcmp.ge.f32.partialorder %v885_v49, 0.0  ;;  %v1002_v35 = vmul.f32 0.2, %v886_v53  ;;  %v1056_v55 = vsel %vm940_vm12, %v882_v39, %v998_v48  ;;  %v891_v26 = vadd.f32 %v2021_v12, %v2033_v5 }
 0x1b8   :  { %1109 = vst.msk [vmem:[%s2530_s4 + $0x88] sm:$0xff] %vm467_vm0, %v1051_v45  ;;  %vm944_vm1 = vcmp.ge.f32.partialorder %v886_v53, 0.0  ;;  %v1003_v11 = vmul.f32 0.2, %v887_v56  ;;  %v1057_v20 = vsel %vm941_vm13, %v883_v43, %v999_v62  ;;  %v892_v50 = vadd.f32 %v2021_v12, %v2037_v17 }
 0x1b9   :  { %1110 = vst.msk [vmem:[%s2530_s4 + $0x90] sm:$0xff] %vm467_vm0, %v1052_v14  ;;  %vm945_vm2 = vcmp.ge.f32.partialorder %v887_v56, 0.0  ;;  %v1004_v59 = vmul.f32 0.2, %v888_v60  ;;  %v1058_v21 = vsel %vm942_vm14, %v884_v46, %v1000_v32  ;;  %v893_v5 = vadd.f32 %v2021_v12, %v2041_v40 }
 0x1ba   :  { %1111 = vst.msk [vmem:[%s2530_s4 + $0x98] sm:$0xff] %vm467_vm0, %v1053_v51  ;;  %vm946_vm3 = vcmp.ge.f32.partialorder %v888_v60, 0.0  ;;  %v1005_v58 = vmul.f32 0.2, %v889_v1  ;;  %v1059_v63 = vsel %vm943_vm15, %v885_v49, %v1001_v52  ;;  %v894_v17 = vadd.f32 %v2021_v12, %v2045_v44 }
 0x1bb   :  { %1112 = vst.msk [vmem:[%s2530_s4 + $0xa0] sm:$0xff] %vm467_vm0, %v1054_v16  ;;  %vm947_vm4 = vcmp.ge.f32.partialorder %v889_v1, 0.0  ;;  %v1006_v28 = vmul.f32 0.2, %v890_v30  ;;  %v1060_v0 = vsel %vm944_vm1, %v886_v53, %v1002_v35  ;;  %v895_v40 = vadd.f32 %v2021_v12, %v2049_v31 }
 0x1bc   :  { %1113 = vst.msk [vmem:[%s2530_s4 + $0xa8] sm:$0xff] %vm467_vm0, %v1055_v24  ;;  %vm948_vm5 = vcmp.ge.f32.partialorder %v890_v30, 0.0  ;;  %v1007_v6 = vmul.f32 0.2, %v891_v26  ;;  %v1061_v18 = vsel %vm945_vm2, %v887_v56, %v1003_v11  ;;  %v896_v44 = vadd.f32 %v2021_v12, %v2053_v22  ;;  %v2597_v24 = vld [vmem:[#allocation3_spill] sm:$0xff] }
 0x1bd   :  { %1114 = vst.msk [vmem:[%s2530_s4 + $0xb0] sm:$0xff] %vm467_vm0, %v1056_v55  ;;  %vm949_vm6 = vcmp.ge.f32.partialorder %v891_v26, 0.0  ;;  %v1008_v23 = vmul.f32 0.2, %v892_v50  ;;  %v1062_v29 = vsel %vm946_vm3, %v888_v60, %v1004_v59  ;;  %v897_v31 = vadd.f32 %v2021_v12, %v2057_v54  ;;  %v2599_v59 = vld [vmem:[#allocation6_spill] sm:$0xff] }
 0x1be   :  { %1115 = vst.msk [vmem:[%s2530_s4 + $0xb8] sm:$0xff] %vm467_vm0, %v1057_v20  ;;  %vm950_vm7 = vcmp.ge.f32.partialorder %v892_v50, 0.0  ;;  %v1009_v7 = vmul.f32 0.2, %v893_v5  ;;  %v1063_v27 = vsel %vm947_vm4, %v889_v1, %v1005_v58  ;;  %v898_v22 = vadd.f32 %v2021_v12, %v2061_v57 }
 0x1bf   :  { %1116 = vst.msk [vmem:[%s2530_s4 + $0xc0] sm:$0xff] %vm467_vm0, %v1058_v21  ;;  %vm951_vm8 = vcmp.ge.f32.partialorder %v893_v5, 0.0  ;;  %v1010_v37 = vmul.f32 0.2, %v894_v17  ;;  %v1064_v25 = vsel %vm948_vm5, %v890_v30, %v1006_v28  ;;  %v899_v54 = vadd.f32 %v2021_v12, %v2065_v61 }
 0x1c0   :  { %1117 = vst.msk [vmem:[%s2530_s4 + $0xc8] sm:$0xff] %vm467_vm0, %v1059_v63  ;;  %vm952_vm9 = vcmp.ge.f32.partialorder %v894_v17, 0.0  ;;  %v1011_v3 = vmul.f32 0.2, %v895_v40  ;;  %v1065_v39 = vsel %vm949_vm6, %v891_v26, %v1007_v6  ;;  %v900_v57 = vadd.f32 %v2021_v12, %v2069_v41  ;;  %v2598_v26 = vld [vmem:[#allocation5_spill] sm:$0xff]  ;;  %v2600_v63 = vld [vmem:[#allocation11_spill] sm:$0xff] }
 0x1c1   :  { %1118 = vst.msk [vmem:[%s2530_s4 + $0xd0] sm:$0xff] %vm467_vm0, %v1060_v0  ;;  %vm953_vm10 = vcmp.ge.f32.partialorder %v895_v40, 0.0  ;;  %v1012_v15 = vmul.f32 0.2, %v896_v44  ;;  %v1066_v47 = vsel %vm950_vm7, %v892_v50, %v1008_v23  ;;  %v901_v61 = vadd.f32 %v2021_v12, %v2073_v2  ;;  %v2602_v23 = vld [vmem:[#allocation4_spill] sm:$0xff] }
 0x1c2   :  { %1119 = vst.msk [vmem:[%s2530_s4 + $0xd8] sm:$0xff] %vm467_vm0, %v1061_v18  ;;  %vm954_vm11 = vcmp.ge.f32.partialorder %v896_v44, 0.0  ;;  %v1013_v43 = vmul.f32 0.2, %v897_v31  ;;  %v1067_v9 = vsel %vm951_vm8, %v893_v5, %v1009_v7  ;;  %v902_v41 = vadd.f32 %v2021_v12, %v2077_v34 }
 0x1c3   :  { %1120 = vst.msk [vmem:[%s2530_s4 + $0xe0] sm:$0xff] %vm467_vm0, %v1062_v29  ;;  %vm955_vm12 = vcmp.ge.f32.partialorder %v897_v31, 0.0  ;;  %v1014_v36 = vmul.f32 0.2, %v898_v22  ;;  %v1068_v46 = vsel %vm952_vm9, %v894_v17, %v1010_v37  ;;  %v903_v2 = vadd.f32 %v2021_v12, %v2081_v33 }
 0x1c4   :  { %1121 = vst.msk [vmem:[%s2530_s4 + $0xe8] sm:$0xff] %vm467_vm0, %v1063_v27  ;;  %vm956_vm13 = vcmp.ge.f32.partialorder %v898_v22, 0.0  ;;  %v1015_v38 = vmul.f32 0.2, %v899_v54  ;;  %v1069_v42 = vsel %vm953_vm10, %v895_v40, %v1011_v3  ;;  %v904_v34 = vadd.f32 %v2021_v12, %v2086_v8  ;;  %v2601_v40 = vld [vmem:[#allocation13_spill] sm:$0xff]  ;;  %v2603_v27 = vld [vmem:[#allocation7_spill] sm:$0xff] }
 0x1c5   :  { %1122 = vst.msk [vmem:[%s2530_s4 + $0xf0] sm:$0xff] %vm467_vm0, %v1064_v25  ;;  %vm957_vm14 = vcmp.ge.f32.partialorder %v899_v54, 0.0  ;;  %v1016_v49 = vmul.f32 0.2, %v900_v57  ;;  %v1070_v13 = vsel %vm954_vm11, %v896_v44, %v1012_v15  ;;  %v905_v33 = vadd.f32 %v2021_v12, %v2090_v4 }
 0x1c6   :  { %1123 = vst.msk [vmem:[%s2530_s4 + $0xf8] sm:$0xff] %vm467_vm0, %v1065_v39  ;;  %vm958_vm15 = vcmp.ge.f32.partialorder %v900_v57, 0.0  ;;  %v1017_v45 = vmul.f32 0.2, %v901_v61  ;;  %v1071_v53 = vsel %vm955_vm12, %v897_v31, %v1013_v43  ;;  %v906_v8 = vadd.f32 %v2021_v12, %v2094_v10  ;;  %v2595_v10 = vld [vmem:[#allocation9_spill] sm:$0xff] }
 0x1c7   :  { %1124 = vst.msk [vmem:[%s2530_s4 + $0x100] sm:$0xff] %vm467_vm0, %v1066_v47  ;;  %vm959_vm1 = vcmp.ge.f32.partialorder %v901_v61, 0.0  ;;  %v1018_v48 = vmul.f32 0.2, %v902_v41  ;;  %v1072_v14 = vsel %vm956_vm13, %v898_v22, %v1014_v36  ;;  %v907_v4 = vadd.f32 %v2021_v12, %v2099_v19  ;;  %v2596_v19 = vld [vmem:[#allocation2_spill] sm:$0xff] }
 0x1c8   :  { %1125 = vst.msk [vmem:[%s2530_s4 + $0x108] sm:$0xff] %vm467_vm0, %v1067_v9  ;;  %vm960_vm2 = vcmp.ge.f32.partialorder %v902_v41, 0.0  ;;  %v1019_v56 = vmul.f32 0.2, %v903_v2  ;;  %v1073_v62 = vsel %vm957_vm14, %v899_v54, %v1015_v38  ;;  %v908_v51 = vadd.f32 %v2021_v12, %v2595_v10  ;;  %v2604_v54 = vld [vmem:[#allocation8_spill] sm:$0xff] }
 0x1c9   :  { %1126 = vst.msk [vmem:[%s2530_s4 + $0x110] sm:$0xff] %vm467_vm0, %v1068_v46  ;;  %vm961_vm3 = vcmp.ge.f32.partialorder %v903_v2, 0.0  ;;  %v1020_v60 = vmul.f32 0.2, %v904_v34  ;;  %v1074_v32 = vsel %vm958_vm15, %v900_v57, %v1016_v49  ;;  %v909_v16 = vadd.f32 %v2021_v12, %v2596_v19 }
 0x1ca   :  { %1127 = vst.msk [vmem:[%s2530_s4 + $0x118] sm:$0xff] %vm467_vm0, %v1069_v42  ;;  %vm962_vm4 = vcmp.ge.f32.partialorder %v904_v34, 0.0  ;;  %v1021_v1 = vmul.f32 0.2, %v905_v33  ;;  %v1075_v52 = vsel %vm959_vm1, %v901_v61, %v1017_v45  ;;  %v910_v30 = vadd.f32 %v2021_v12, %v2597_v24 }
 0x1cb   :  { %1128 = vst.msk [vmem:[%s2530_s4 + $0x120] sm:$0xff] %vm467_vm0, %v1070_v13  ;;  %vm963_vm5 = vcmp.ge.f32.partialorder %v905_v33, 0.0  ;;  %v1022_v35 = vmul.f32 0.2, %v906_v8  ;;  %v1076_v55 = vsel %vm960_vm2, %v902_v41, %v1018_v48  ;;  %v911_v11 = vadd.f32 %v2021_v12, %v2598_v26 }
 0x1cc   :  { %1129 = vst.msk [vmem:[%s2530_s4 + $0x128] sm:$0xff] %vm467_vm0, %v1071_v53  ;;  %vm964_vm6 = vcmp.ge.f32.partialorder %v906_v8, 0.0  ;;  %v1023_v20 = vmul.f32 0.2, %v907_v4  ;;  %v1077_v50 = vsel %vm961_vm3, %v903_v2, %v1019_v56  ;;  %v912_v21 = vadd.f32 %v2021_v12, %v2599_v59 }
 0x1cd   :  { %1130 = vst.msk [vmem:[%s2530_s4 + $0x130] sm:$0xff] %vm467_vm0, %v1072_v14  ;;  %vm965_vm7 = vcmp.ge.f32.partialorder %v907_v4, 0.0  ;;  %v1024_v5 = vmul.f32 0.2, %v908_v51  ;;  %v1078_v58 = vsel %vm962_vm4, %v904_v34, %v1020_v60  ;;  %v913_v17 = vadd.f32 %v2021_v12, %v2600_v63 }
 0x1ce   :  { %1131 = vst.msk [vmem:[%s2530_s4 + $0x138] sm:$0xff] %vm467_vm0, %v1073_v62  ;;  %vm966_vm8 = vcmp.ge.f32.partialorder %v908_v51, 0.0  ;;  %v1025_v28 = vmul.f32 0.2, %v909_v16  ;;  %v1079_v0 = vsel %vm963_vm5, %v905_v33, %v1021_v1  ;;  %v914_v6 = vadd.f32 %v2021_v12, %v2601_v40 }
 0x1cf   :  { %1132 = vst.msk [vmem:[%s2530_s4 + $0x140] sm:$0xff] %vm467_vm0, %v1074_v32  ;;  %vm967_vm9 = vcmp.ge.f32.partialorder %v909_v16, 0.0  ;;  %v1026_v18 = vmul.f32 0.2, %v910_v30  ;;  %v1080_v44 = vsel %vm964_vm6, %v906_v8, %v1022_v35  ;;  %v915_v29 = vadd.f32 %v2021_v12, %v2602_v23 }
 0x1d0   :  { %1133 = vst.msk [vmem:[%s2530_s4 + $0x148] sm:$0xff] %vm467_vm0, %v1075_v52  ;;  %vm968_vm10 = vcmp.ge.f32.partialorder %v910_v30, 0.0  ;;  %v1027_v31 = vmul.f32 0.2, %v911_v11  ;;  %v1081_v7 = vsel %vm965_vm7, %v907_v4, %v1023_v20  ;;  %v916_v22 = vadd.f32 %v2021_v12, %v2603_v27 }
 0x1d1   :  { %1134 = vst.msk [vmem:[%s2530_s4 + $0x150] sm:$0xff] %vm467_vm0, %v1076_v55  ;;  %vm969_vm11 = vcmp.ge.f32.partialorder %v911_v11, 0.0  ;;  %v1028_v37 = vmul.f32 0.2, %v912_v21  ;;  %v1082_v25 = vsel %vm966_vm8, %v908_v51, %v1024_v5  ;;  %v917_v3 = vadd.f32 %v2021_v12, %v2604_v54 }
 0x1d2   :  { %1135 = vst.msk [vmem:[%s2530_s4 + $0x158] sm:$0xff] %vm467_vm0, %v1077_v50  ;;  %vm970_vm12 = vcmp.ge.f32.partialorder %v912_v21, 0.0  ;;  %v1029_v39 = vmul.f32 0.2, %v913_v17  ;;  %v1083_v57 = vsel %vm967_vm9, %v909_v16, %v1025_v28  ;;  %vm971_vm13 = vcmp.ge.f32.partialorder %v913_v17, 0.0 }
 0x1d3   :  { %1136 = vst.msk [vmem:[%s2530_s4 + $0x160] sm:$0xff] %vm467_vm0, %v1078_v58  ;;  %v1030_v15 = vmul.f32 0.2, %v914_v6  ;;  %v1084_v47 = vsel %vm968_vm10, %v910_v30, %v1026_v18  ;;  %vm972_vm14 = vcmp.ge.f32.partialorder %v914_v6, 0.0  ;;  %v1031_v12 = vmul.f32 0.2, %v915_v29 }
 0x1d4   :  { %1137 = vst.msk [vmem:[%s2530_s4 + $0x168] sm:$0xff] %vm467_vm0, %v1079_v0  ;;  %v1085_v61 = vsel %vm969_vm11, %v911_v11, %v1027_v31  ;;  %vm973_vm15 = vcmp.ge.f32.partialorder %v915_v29, 0.0  ;;  %v1032_v43 = vmul.f32 0.2, %v916_v22  ;;  %v1086_v9 = vsel %vm970_vm12, %v912_v21, %v1028_v37 }
 0x1d5   :  { %1138 = vst.msk [vmem:[%s2530_s4 + $0x170] sm:$0xff] %vm467_vm0, %v1080_v44  ;;  %vm974_vm1 = vcmp.ge.f32.partialorder %v916_v22, 0.0  ;;  %v1033_v41 = vmul.f32 0.2, %v917_v3  ;;  %v1087_v36 = vsel %vm971_vm13, %v913_v17, %v1029_v39  ;;  %vm975_vm2 = vcmp.ge.f32.partialorder %v917_v3, 0.0 }
 0x1d6   :  { %1139 = vst.msk [vmem:[%s2530_s4 + $0x178] sm:$0xff] %vm467_vm0, %v1081_v7  ;;  %v1088_v46 = vsel %vm972_vm14, %v914_v6, %v1030_v15  ;;  %v1089_v2 = vsel %vm973_vm15, %v915_v29, %v1031_v12  ;;  %v1090_v38 = vsel %vm974_vm1, %v916_v22, %v1032_v43 }
 0x1d7   :  { %1140 = vst.msk [vmem:[%s2530_s4 + $0x180] sm:$0xff] %vm467_vm0, %v1082_v25  ;;  %v1091_v42 = vsel %vm975_vm2, %v917_v3, %v1033_v41 }
 0x1d8   :  { %1141 = vst.msk [vmem:[%s2530_s4 + $0x188] sm:$0xff] %vm467_vm0, %v1083_v57 }
 0x1d9   :  { %1142 = vst.msk [vmem:[%s2530_s4 + $0x190] sm:$0xff] %vm467_vm0, %v1084_v47 }
 0x1da   :  { %1143 = vst.msk [vmem:[%s2530_s4 + $0x198] sm:$0xff] %vm467_vm0, %v1085_v61 }
 0x1db   :  { %1144 = vst.msk [vmem:[%s2530_s4 + $0x1a0] sm:$0xff] %vm467_vm0, %v1086_v9 }
 0x1dc   :  { %1145 = vst.msk [vmem:[%s2530_s4 + $0x1a8] sm:$0xff] %vm467_vm0, %v1087_v36 }
 0x1dd   :  { %1146 = vst.msk [vmem:[%s2530_s4 + $0x1b0] sm:$0xff] %vm467_vm0, %v1088_v46 }
 0x1de   :  { %1147 = vst.msk [vmem:[%s2530_s4 + $0x1b8] sm:$0xff] %vm467_vm0, %v1089_v2 }
 0x1df   :  { %1148 = vst.msk [vmem:[%s2530_s4 + $0x1c0] sm:$0xff] %vm467_vm0, %v1090_v38 }
 0x1e0   :  { %1149 = vst.msk [vmem:[%s2530_s4 + $0x1c8] sm:$0xff] %vm467_vm0, %v1091_v42 }

// kernel: discriminator_forward.7
= control target key start
LH: loop header
LB: loop body
LE: loop exit
PB: predicated region body
PF: predicated region fallthrough
CT: control target
= control target key end

     0   :  { %vm273_vm0 = vcmask 261120   ;;  %s849_s1 = inlined_call_operand.vmem [shape: bf16[256,128], index: 1, kind: input, shape index: {}]   ;;  %s850_s0 = inlined_call_operand.vmem [shape: bf16[80,256], index: 0, kind: input, shape index: {}]   ;;  %s851_s2 = inlined_call_operand.vmem [shape: f32[1,32], index: 2, kind: input, shape index: {}]   ;;  %s852_s3 = inlined_call_operand.vmem [shape: f32[1,32], index: 3, kind: input, shape index: {}]   ;;  %s853_s4 = inlined_call_operand.vmem [shape: f32[80,32], index: 4, kind: output, shape index: {}]  }
   0x1   :  { %v553_v0 = vld [vmem:[%s849_s1 + $0x38] sm:$0xff]  ;;  %v552_v2 = vld [vmem:[%s849_s1 + $0x30] sm:$0xff]  ;;  %v551_v4 = vld [vmem:[%s849_s1 + $0x28] sm:$0xff] }
   0x2   :  { %v561_v1 = vld [vmem:[%s849_s1 + $0x78] sm:$0xff]  ;;  %205 = vmatpush.bf16.msra.mxu0 %v553_v0  ;;  %562 = vmatpush.bf16.msra.mxu2 %v553_v0  ;;  %v560_v3 = vld [vmem:[%s849_s1 + $0x70] sm:$0xff]  ;;  %v559_v5 = vld [vmem:[%s849_s1 + $0x68] sm:$0xff] }
   0x3   :  { %239 = vmatpush.bf16.msra.mxu1 %v561_v1  ;;  %570 = vmatpush.bf16.msra.mxu3 %v561_v1  ;;  %v550_v6 = vld [vmem:[%s849_s1 + $0x20] sm:$0xff]  ;;  %v549_v8 = vld [vmem:[%s849_s1 + $0x18] sm:$0xff]  ;;  %v548_v10 = vld [vmem:[%s849_s1 + $0x10] sm:$0xff] }
   0x4   :  { %v558_v7 = vld [vmem:[%s849_s1 + $0x60] sm:$0xff]  ;;  %v557_v9 = vld [vmem:[%s849_s1 + $0x58] sm:$0xff]  ;;  %v556_v11 = vld [vmem:[%s849_s1 + $0x50] sm:$0xff] }
   0x5   :  { %v547_v12 = vld [vmem:[%s849_s1 + $0x8] sm:$0xff]  ;;  %v546_v14 = vld [vmem:[%s849_s1] sm:$0xff]  ;;  %v542_v22 = vld [vmem:[%s850_s0 + $0x34] sm:$0xf] }
   0x6   :  { %206 = vmatpush.bf16.msra.mxu0 %v552_v2  ;;  %563 = vmatpush.bf16.msra.mxu2 %v552_v2  ;;  %v555_v13 = vld [vmem:[%s849_s1 + $0x48] sm:$0xff]  ;;  %v554_v15 = vld [vmem:[%s849_s1 + $0x40] sm:$0xff]  ;;  %v460_v23 = vld [vmem:[%s850_s0 + $0x38] sm:$0xf0] }
   0x7   :  { %240 = vmatpush.bf16.msra.mxu1 %v560_v3  ;;  %571 = vmatpush.bf16.msra.mxu3 %v560_v3  ;;  %v434_v16 = vld [vmem:[%s850_s0] sm:$0xf]  ;;  %v537_v17 = vld [vmem:[%s850_s0 + $0x4] sm:$0xf0]  ;;  %v536_v20 = vld [vmem:[%s850_s0 + $0x4] sm:$0xf]  ;;  %v463_v27 = vor.u32 %v542_v22, %v460_v23 }
   0x8   :  { %v450_v18 = vld [vmem:[%s850_s0 + $0x20] sm:$0xf]  ;;  %v541_v19 = vld [vmem:[%s850_s0 + $0x24] sm:$0xf0]  ;;  %v436_v21 = vld [vmem:[%s850_s0 + $0x8] sm:$0xf0]  ;;  %v435_v24 = vor.u32 %v537_v17, %v434_v16 }
   0x9   :  { %v451_v25 = vor.u32 %v541_v19, %v450_v18  ;;  %v439_v26 = vor.u32 %v536_v20, %v436_v21  ;;  %v442_v28 = vld [vmem:[%s850_s0 + $0x10] sm:$0xf]  ;;  %v539_v29 = vld [vmem:[%s850_s0 + $0x14] sm:$0xf0]  ;;  %v538_v32 = vld [vmem:[%s850_s0 + $0x14] sm:$0xf] }
   0xa   :  { %207 = vmatpush.bf16.msra.mxu0 %v551_v4  ;;  %564 = vmatpush.bf16.msra.mxu2 %v551_v4  ;;  %v458_v30 = vld [vmem:[%s850_s0 + $0x30] sm:$0xf]  ;;  %v543_v31 = vld [vmem:[%s850_s0 + $0x34] sm:$0xf0]  ;;  %v444_v33 = vld [vmem:[%s850_s0 + $0x18] sm:$0xf0]  ;;  %v443_v36 = vor.u32 %v539_v29, %v442_v28 }
   0xb   :  { %241 = vmatpush.bf16.msra.mxu1 %v559_v5  ;;  %572 = vmatpush.bf16.msra.mxu3 %v559_v5  ;;  %v544_v34 = vld [vmem:[%s850_s0 + $0x44] sm:$0xf]  ;;  %v468_v35 = vld [vmem:[%s850_s0 + $0x48] sm:$0xf0]  ;;  %v459_v37 = vor.u32 %v543_v31, %v458_v30  ;;  %v447_v38 = vor.u32 %v538_v32, %v444_v33  ;;  %v466_v40 = vld [vmem:[%s850_s0 + $0x40] sm:$0xf] }
   0xc   :  { %v471_v39 = vor.u32 %v544_v34, %v468_v35  ;;  %v545_v41 = vld [vmem:[%s850_s0 + $0x44] sm:$0xf0]  ;;  %v540_v42 = vld [vmem:[%s850_s0 + $0x24] sm:$0xf]  ;;  %v452_v43 = vld [vmem:[%s850_s0 + $0x28] sm:$0xf0] }
   0xd   :  { %v467_v44 = vor.u32 %v545_v41, %v466_v40  ;;  %v455_v45 = vor.u32 %v540_v42, %v452_v43  ;;  %v583_v19 = vmov 72.0  }
   0xe   :  { %208 = vmatpush.bf16.msra.mxu0 %v550_v6  ;;  %565 = vmatpush.bf16.msra.mxu2 %v550_v6  ;;  %579 = vrcp.f32 %v583_v19 }
   0xf   :  { %242 = vmatpush.bf16.msra.mxu1 %v558_v7  ;;  %573 = vmatpush.bf16.msra.mxu3 %v558_v7 }
  0x12   :  { %209 = vmatpush.bf16.msra.mxu0 %v549_v8  ;;  %566 = vmatpush.bf16.msra.mxu2 %v549_v8 }
  0x13   :  { %243 = vmatpush.bf16.msra.mxu1 %v557_v9  ;;  %574 = vmatpush.bf16.msra.mxu3 %v557_v9 }
  0x14   :  { %v580_v35 = vpop.eup %579 }
  0x15   :  { %vm339_vm1 = vweird.f32 %v580_v35 }
  0x16   :  { %210 = vmatpush.bf16.msra.mxu0 %v548_v10  ;;  %567 = vmatpush.bf16.msra.mxu2 %v548_v10 }
  0x17   :  { %244 = vmatpush.bf16.msra.mxu1 %v556_v11  ;;  %575 = vmatpush.bf16.msra.mxu3 %v556_v11 }
  0x1a   :  { %211 = vmatpush.bf16.msra.mxu0 %v547_v12  ;;  %568 = vmatpush.bf16.msra.mxu2 %v547_v12 }
  0x1b   :  { %245 = vmatpush.bf16.msra.mxu1 %v555_v13  ;;  %576 = vmatpush.bf16.msra.mxu3 %v555_v13 }
  0x1e   :  { %212 = vmatpush.bf16.msra.mxu0 %v546_v14  ;;  %569 = vmatpush.bf16.msra.mxu2 %v546_v14 }
  0x1f   :  { %246 = vmatpush.bf16.msra.mxu1 %v554_v15  ;;  %577 = vmatpush.bf16.msra.mxu3 %v554_v15 }
  0x21   :  { %213 = vmatmul.bf16.vlgmr.msra.gmra.mxu0 %v435_v24  ;;  %223 = vmatmul.bf16.vlgmr.msra.gmra.mxu2 %v451_v25 }
  0x22   :  { %247 = vmatmul.bf16.vlgmr.msra.gmra.mxu1 %v439_v26  ;;  %262 = vmatmul.bf16.vlgmr.msra.gmra.mxu3 %v463_v27 }
  0x31   :  { %218 = vmatmul.bf16.gmra.mxu0 %v443_v36  ;;  %228 = vmatmul.bf16.gmra.mxu2 %v459_v37 }
  0x32   :  { %252 = vmatmul.bf16.gmra.mxu1 %v447_v38  ;;  %267 = vmatmul.bf16.gmra.mxu3 %v471_v39 }
  0x41   :  { %233 = vmatmul.bf16.gmra.mxu2 %v467_v44 }
  0x42   :  { %257 = vmatmul.bf16.gmra.mxu1 %v455_v45 }
  0x9e   :  { %v214_v46 = vpop.f32.mrf.mxu0 }
  0x9f   :  { %v248_v47 = vpop.f32.mrf.mxu1 }
  0xa0   :  { %v719_v60 = vadd.f32 %v248_v47, %v214_v46 }
  0xa2   :  { %v299_v2 = vmul.f32 %v719_v60, %v719_v60  ;;  %v274_v6 = vsel %vm273_vm0, %v719_v60, 0.0 }
  0xa4   :  { %v224_v48 = vpop.f32.mrf.mxu2  ;;  %v309_v12 = vsel %vm273_vm0, %v299_v2, 0.0 }
  0xa5   :  { %v263_v52 = vpop.f32.mrf.mxu3 }
  0xa6   :  { %v216_v49 = vpop.f32.mrf.mxu0 }
  0xa7   :  { %v250_v50 = vpop.f32.mrf.mxu1 }
  0xa8   :  { %v717_v58 = vadd.f32 %v250_v50, %v216_v49  ;;  %v335_v49 = vmul.f32 72.0, %v580_v35 }
  0xaa   :  { %v300_v63 = vmul.f32 %v717_v58, %v717_v58  ;;  %v275_v3 = vsel %vm273_vm0, %v717_v58, 0.0 }
  0xab   :  { %v276_v11 = vadd.f32 %v275_v3, %v274_v6 }
  0xac   :  { %v226_v51 = vpop.f32.mrf.mxu2  ;;  %v310_v7 = vsel %vm273_vm0, %v300_v63, 0.0 }
  0xad   :  { %v265_v57 = vpop.f32.mrf.mxu3  ;;  %v311_v17 = vadd.f32 %v310_v7, %v309_v12 }
  0xae   :  { %v219_v54 = vpop.f32.mrf.mxu0 }
  0xaf   :  { %v253_v53 = vpop.f32.mrf.mxu1 }
  0xb0   :  { %v721_v61 = vadd.f32 %v253_v53, %v219_v54 }
  0xb2   :  { %v301_v4 = vmul.f32 %v721_v61, %v721_v61  ;;  %v277_v8 = vsel %vm273_vm0, %v721_v61, 0.0 }
  0xb3   :  { %v278_v18 = vadd.f32 %v277_v8, %v276_v11 }
  0xb4   :  { %v229_v55 = vpop.f32.mrf.mxu2  ;;  %v312_v13 = vsel %vm273_vm0, %v301_v4, 0.0 }
  0xb5   :  { %v268_v10 = vpop.f32.mrf.mxu3  ;;  %v748_v20 = vadd.f32 %v263_v52, %v229_v55  ;;  %v313_v23 = vadd.f32 %v312_v13, %v311_v17 }
  0xb6   :  { %v221_v59 = vpop.f32.mrf.mxu0 }
  0xb7   :  { %v255_v56 = vpop.f32.mrf.mxu1  ;;  %v305_v31 = vmul.f32 %v748_v20, %v748_v20  ;;  %v285_v38 = vsel %vm273_vm0, %v748_v20, 0.0 }
  0xb8   :  { %v725_v0 = vadd.f32 %v255_v56, %v221_v59 }
  0xb9   :  { %v320_v46 = vsel %vm273_vm0, %v305_v31, 0.0 }
  0xba   :  { %v302_v9 = vmul.f32 %v725_v0, %v725_v0  ;;  %v279_v14 = vsel %vm273_vm0, %v725_v0, 0.0 }
  0xbb   :  { %v280_v24 = vadd.f32 %v279_v14, %v278_v18 }
  0xbc   :  { %v231_v62 = vpop.f32.mrf.mxu2  ;;  %v314_v21 = vsel %vm273_vm0, %v302_v9, 0.0 }
  0xbd   :  { %v753_v26 = vadd.f32 %v265_v57, %v231_v62  ;;  %v315_v29 = vadd.f32 %v314_v21, %v313_v23  ;;  %v270_v41 = vpop.f32.mrf.mxu3  ;;  %v336_v62 = vsub.f32 1.0, %v335_v49 }
  0xbf   :  { %v258_v1 = vpop.f32.mrf.mxu1  ;;  %v306_v39 = vmul.f32 %v753_v26, %v753_v26  ;;  %v287_v47 = vsel %vm273_vm0, %v753_v26, 0.0  ;;  %v337_v6 = vmul.f32 %v580_v35, %v336_v62 }
  0xc0   :  { %v733_v5 = vadd.f32 %v258_v1, %v224_v48 }
  0xc1   :  { %v322_v52 = vsel %vm273_vm0, %v306_v39, 0.0  ;;  %v338_v11 = vadd.f32 %v580_v35, %v337_v6  ;;  %v359_v39 = vld [vmem:[%s852_s3] sm:$0x1] }
  0xc2   :  { %v303_v15 = vmul.f32 %v733_v5, %v733_v5  ;;  %v281_v22 = vsel %vm273_vm0, %v733_v5, 0.0 }
  0xc3   :  { %v282_v30 = vadd.f32 %v281_v22, %v280_v24 }
  0xc4   :  { %v234_v16 = vpop.f32.mrf.mxu2  ;;  %v316_v27 = vsel %vm273_vm0, %v303_v15, 0.0 }
  0xc5   :  { %v760_v32 = vadd.f32 %v268_v10, %v234_v16  ;;  %v317_v36 = vadd.f32 %v316_v27, %v315_v29  ;;  %v340_v16 = vsel %vm339_vm1, %v580_v35, %v338_v11  ;;  %v346_v35 = vld [vmem:[%s851_s2] sm:$0x1] }
  0xc7   :  { %v260_v25 = vpop.f32.mrf.mxu1  ;;  %v307_v48 = vmul.f32 %v760_v32, %v760_v32  ;;  %v289_v53 = vsel %vm273_vm0, %v760_v32, 0.0 }
  0xc8   :  { %v756_v28 = vadd.f32 %v260_v25, %v226_v51 }
  0xc9   :  { %v324_v57 = vsel %vm273_vm0, %v307_v48, 0.0 }
  0xca   :  { %v283_v33 = vsel %vm273_vm0, %v756_v28, 0.0  ;;  %v304_v34 = vmul.f32 %v756_v28, %v756_v28 }
  0xcb   :  { %v284_v37 = vadd.f32 %v283_v33, %v282_v30 }
  0xcc   :  { %v318_v40 = vsel %vm273_vm0, %v304_v34, 0.0  ;;  %v236_v42 = vpop.f32.mrf.mxu2 }
  0xcd   :  { %v286_v43 = vadd.f32 %v285_v38, %v284_v37  ;;  %v319_v44 = vadd.f32 %v318_v40, %v317_v36  ;;  %v771_v45 = vadd.f32 %v270_v41, %v236_v42 }
  0xcf   :  { %v321_v50 = vadd.f32 %v320_v46, %v319_v44  ;;  %v288_v51 = vadd.f32 %v287_v47, %v286_v43  ;;  %v308_v54 = vmul.f32 %v771_v45, %v771_v45  ;;  %v291_v59 = vsel %vm273_vm0, %v771_v45, 0.0 }
  0xd1   :  { %v290_v55 = vadd.f32 %v289_v53, %v288_v51  ;;  %v323_v56 = vadd.f32 %v322_v52, %v321_v50  ;;  %v326_v2 = vsel %vm273_vm0, %v308_v54, 0.0 }
  0xd3   :  { %v292_v63 = vadd.f32 %v291_v59, %v290_v55  ;;  %v325_v1 = vadd.f32 %v324_v57, %v323_v56 }
  0xd5   :  { %v293_v3 = vrot.slane %v292_v63, 4  ;;  %v327_v4 = vadd.f32 %v326_v2, %v325_v1 }
  0xd7   :  { %v294_v7 = vadd.f32 %v293_v3, %v292_v63  ;;  %v328_v8 = vrot.slane %v327_v4, 4 }
  0xd9   :  { %v295_v9 = vrot.slane %v294_v7, 2  ;;  %v329_v10 = vadd.f32 %v328_v8, %v327_v4 }
  0xdb   :  { %v296_v12 = vadd.f32 %v295_v9, %v294_v7  ;;  %v330_v13 = vrot.slane %v329_v10, 2 }
  0xdd   :  { %v297_v14 = vrot.slane %v296_v12, 1  ;;  %v331_v15 = vadd.f32 %v330_v13, %v329_v10 }
  0xdf   :  { %v298_v17 = vadd.f32 %v297_v14, %v296_v12  ;;  %v332_v18 = vrot.slane %v331_v15, 1 }
  0xe1   :  { %v333_v19 = vadd.f32 %v332_v18, %v331_v15  ;;  %v341_v21 = vmul.f32 %v340_v16, %v298_v17 }
  0xe3   :  { %v342_v22 = vmul.f32 %v340_v16, %v333_v19  ;;  %v343_v23 = vmul.f32 %v341_v21, %v341_v21 }
  0xe5   :  { %v344_v24 = vsub.f32 %v342_v22, %v343_v23 }
  0xe7   :  { %v345_v25 = vmax.f32 %v344_v24, 0.0 }
  0xe9   :  { %v347_v27 = vadd.f32 1e-05, %v345_v25 }
  0xeb   :  { %581 = vrsqrt.f32 %v347_v27  ;;  %vm354_vm3 = vweird.f32 %v347_v27 }
  0xf1   :  { %v582_v29 = vpop.eup %581 }
  0xf2   :  { %v349_v30 = vmul.f32 %v582_v29, %v347_v27  ;;  %vm355_vm2 = vweird.f32 %v582_v29 }
  0xf3   :  { %vm356_vm4 = vmor %vm354_vm3, %vm355_vm2 }
  0xf4   :  { %v350_v31 = vmul.f32 %v582_v29, %v349_v30 }
  0xf6   :  { %v351_v33 = vmul.f32 0.5, %v350_v31 }
  0xf8   :  { %v352_v34 = vsub.f32 1.5, %v351_v33 }
  0xfa   :  { %v353_v36 = vmul.f32 %v582_v29, %v352_v34 }
  0xfc   :  { %v357_v37 = vsel %vm356_vm4, %v582_v29, %v353_v36 }
  0xfd   :  { %v358_v38 = vmul.f32 %v357_v37, %v346_v35 }
  0xff   :  { %v360_v40 = vmul.f32 %v358_v38, %v341_v21  ;;  %v363_v41 = vperm.slane %v358_v38, 0 }
 0x101   :  { %v361_v42 = vsub.f32 %v359_v39, %v360_v40  ;;  %v365_v43 = vmul.f32 %v363_v41, %v719_v60  ;;  %v366_v44 = vmul.f32 %v363_v41, %v717_v58  ;;  %v367_v46 = vmul.f32 %v363_v41, %v721_v61 }
 0x102   :  { %v368_v47 = vmul.f32 %v363_v41, %v725_v0  ;;  %v369_v49 = vmul.f32 %v363_v41, %v733_v5  ;;  %v370_v50 = vmul.f32 %v363_v41, %v756_v28  ;;  %v371_v55 = vmul.f32 %v363_v41, %v748_v20 }
 0x103   :  { %v376_v48 = vperm.slane %v361_v42, 0  ;;  %v372_v56 = vmul.f32 %v363_v41, %v753_v26  ;;  %v373_v58 = vmul.f32 %v363_v41, %v760_v32  ;;  %v374_v61 = vmul.f32 %v363_v41, %v771_v45 }
 0x105   :  { %v378_v51 = vadd.f32 %v376_v48, %v365_v43  ;;  %v379_v52 = vadd.f32 %v376_v48, %v366_v44  ;;  %v380_v53 = vadd.f32 %v376_v48, %v367_v46  ;;  %v381_v54 = vadd.f32 %v376_v48, %v368_v47 }
 0x106   :  { %v382_v60 = vadd.f32 %v376_v48, %v369_v49  ;;  %v383_v57 = vadd.f32 %v376_v48, %v370_v50  ;;  %v384_v0 = vadd.f32 %v376_v48, %v371_v55  ;;  %v385_v59 = vadd.f32 %v376_v48, %v372_v56 }
 0x107   :  { %vm388_vm5 = vcmp.ge.f32.partialorder %v378_v51, 0.0  ;;  %vm389_vm6 = vcmp.ge.f32.partialorder %v379_v52, 0.0  ;;  %vm390_vm7 = vcmp.ge.f32.partialorder %v380_v53, 0.0  ;;  %vm391_vm8 = vcmp.ge.f32.partialorder %v381_v54, 0.0 }
 0x108   :  { %vm392_vm9 = vcmp.ge.f32.partialorder %v382_v60, 0.0  ;;  %v386_v5 = vadd.f32 %v376_v48, %v373_v58  ;;  %v398_v28 = vmul.f32 0.2, %v378_v51  ;;  %v399_v62 = vmul.f32 0.2, %v379_v52 }
 0x109   :  { %v400_v63 = vmul.f32 0.2, %v380_v53  ;;  %v387_v20 = vadd.f32 %v376_v48, %v374_v61  ;;  %v401_v1 = vmul.f32 0.2, %v381_v54  ;;  %v402_v26 = vmul.f32 0.2, %v382_v60 }
 0x10a   :  { %v403_v2 = vmul.f32 0.2, %v383_v57  ;;  %vm393_vm10 = vcmp.ge.f32.partialorder %v383_v57, 0.0  ;;  %vm394_vm11 = vcmp.ge.f32.partialorder %v384_v0, 0.0  ;;  %v404_v32 = vmul.f32 0.2, %v384_v0 }
 0x10b   :  { %v408_v45 = vsel %vm388_vm5, %v378_v51, %v398_v28  ;;  %v405_v3 = vmul.f32 0.2, %v385_v59  ;;  %v409_v4 = vsel %vm389_vm6, %v379_v52, %v399_v62  ;;  %v410_v6 = vsel %vm390_vm7, %v380_v53, %v400_v63 }
 0x10c   :  { %v411_v7 = vsel %vm391_vm8, %v381_v54, %v401_v1  ;;  %418 = vst.msk [vmem:[%s853_s4] sm:$0xff] %vm273_vm0, %v408_v45  ;;  %vm395_vm12 = vcmp.ge.f32.partialorder %v385_v59, 0.0  ;;  %v406_v8 = vmul.f32 0.2, %v386_v5  ;;  %v412_v9 = vsel %vm392_vm9, %v382_v60, %v402_v26 }
 0x10d   :  { %419 = vst.msk [vmem:[%s853_s4 + $0x8] sm:$0xff] %vm273_vm0, %v409_v4  ;;  %vm396_vm13 = vcmp.ge.f32.partialorder %v386_v5, 0.0  ;;  %v407_v10 = vmul.f32 0.2, %v387_v20  ;;  %v413_v11 = vsel %vm393_vm10, %v383_v57, %v403_v2  ;;  %vm397_vm14 = vcmp.ge.f32.partialorder %v387_v20, 0.0 }
 0x10e   :  { %420 = vst.msk [vmem:[%s853_s4 + $0x10] sm:$0xff] %vm273_vm0, %v410_v6  ;;  %v414_v12 = vsel %vm394_vm11, %v384_v0, %v404_v32  ;;  %v415_v13 = vsel %vm395_vm12, %v385_v59, %v405_v3  ;;  %v416_v14 = vsel %vm396_vm13, %v386_v5, %v406_v8 }
 0x10f   :  { %421 = vst.msk [vmem:[%s853_s4 + $0x18] sm:$0xff] %vm273_vm0, %v411_v7  ;;  %v417_v15 = vsel %vm397_vm14, %v387_v20, %v407_v10 }
 0x110   :  { %422 = vst.msk [vmem:[%s853_s4 + $0x20] sm:$0xff] %vm273_vm0, %v412_v9 }
 0x111   :  { %423 = vst.msk [vmem:[%s853_s4 + $0x28] sm:$0xff] %vm273_vm0, %v413_v11 }
 0x112   :  { %424 = vst.msk [vmem:[%s853_s4 + $0x30] sm:$0xff] %vm273_vm0, %v414_v12 }
 0x113   :  { %425 = vst.msk [vmem:[%s853_s4 + $0x38] sm:$0xff] %vm273_vm0, %v415_v13 }
 0x114   :  { %426 = vst.msk [vmem:[%s853_s4 + $0x40] sm:$0xff] %vm273_vm0, %v416_v14 }
 0x115   :  { %427 = vst.msk [vmem:[%s853_s4 + $0x48] sm:$0xff] %vm273_vm0, %v417_v15 }

// kernel: discriminator_forward.8
= control target key start
LH: loop header
LB: loop body
LE: loop exit
PB: predicated region body
PF: predicated region fallthrough
CT: control target
= control target key end

     0   :  { %vm397_vm0 = vcmask 261120   ;;  %s913_s1 = inlined_call_operand.vmem [shape: bf16[512,128], index: 1, kind: input, shape index: {}]   ;;  %s914_s0 = inlined_call_operand.vmem [shape: bf16[32,512], index: 0, kind: input, shape index: {}]   ;;  %s915_s2 = inlined_call_operand.vmem [shape: f32[1,32], index: 2, kind: input, shape index: {}]   ;;  %s916_s3 = inlined_call_operand.vmem [shape: f32[1,32], index: 3, kind: input, shape index: {}]   ;;  %s917_s4 = inlined_call_operand.vmem [shape: f32[32,32], index: 4, kind: output, shape index: {}]  }
   0x1   :  { %v665_v0 = vld [vmem:[%s913_s1 + $0x38] sm:$0xff]  ;;  %v664_v4 = vld [vmem:[%s913_s1 + $0x30] sm:$0xff]  ;;  %v663_v8 = vld [vmem:[%s913_s1 + $0x28] sm:$0xff] }
   0x2   :  { %v673_v1 = vld [vmem:[%s913_s1 + $0x78] sm:$0xff]  ;;  %321 = vmatpush.bf16.msra.mxu0 %v665_v0  ;;  %v672_v5 = vld [vmem:[%s913_s1 + $0x70] sm:$0xff]  ;;  %v671_v9 = vld [vmem:[%s913_s1 + $0x68] sm:$0xff] }
   0x3   :  { %v681_v2 = vld [vmem:[%s913_s1 + $0xb8] sm:$0xff]  ;;  %340 = vmatpush.bf16.msra.mxu1 %v673_v1  ;;  %v680_v6 = vld [vmem:[%s913_s1 + $0xb0] sm:$0xff]  ;;  %v679_v10 = vld [vmem:[%s913_s1 + $0xa8] sm:$0xff] }
   0x4   :  { %v689_v3 = vld [vmem:[%s913_s1 + $0xf8] sm:$0xff]  ;;  %359 = vmatpush.bf16.msra.mxu2 %v681_v2  ;;  %v688_v7 = vld [vmem:[%s913_s1 + $0xf0] sm:$0xff]  ;;  %v687_v11 = vld [vmem:[%s913_s1 + $0xe8] sm:$0xff] }
   0x5   :  { %378 = vmatpush.bf16.msra.mxu3 %v689_v3  ;;  %v662_v12 = vld [vmem:[%s913_s1 + $0x20] sm:$0xff]  ;;  %v661_v16 = vld [vmem:[%s913_s1 + $0x18] sm:$0xff]  ;;  %v660_v20 = vld [vmem:[%s913_s1 + $0x10] sm:$0xff] }
   0x6   :  { %322 = vmatpush.bf16.msra.mxu0 %v664_v4  ;;  %v670_v13 = vld [vmem:[%s913_s1 + $0x60] sm:$0xff]  ;;  %v669_v17 = vld [vmem:[%s913_s1 + $0x58] sm:$0xff]  ;;  %v668_v21 = vld [vmem:[%s913_s1 + $0x50] sm:$0xff] }
   0x7   :  { %341 = vmatpush.bf16.msra.mxu1 %v672_v5  ;;  %v678_v14 = vld [vmem:[%s913_s1 + $0xa0] sm:$0xff]  ;;  %v677_v18 = vld [vmem:[%s913_s1 + $0x98] sm:$0xff]  ;;  %v676_v22 = vld [vmem:[%s913_s1 + $0x90] sm:$0xff] }
   0x8   :  { %360 = vmatpush.bf16.msra.mxu2 %v680_v6  ;;  %v686_v15 = vld [vmem:[%s913_s1 + $0xe0] sm:$0xff]  ;;  %v685_v19 = vld [vmem:[%s913_s1 + $0xd8] sm:$0xff]  ;;  %v684_v23 = vld [vmem:[%s913_s1 + $0xd0] sm:$0xff] }
   0x9   :  { %379 = vmatpush.bf16.msra.mxu3 %v688_v7  ;;  %v659_v24 = vld [vmem:[%s913_s1 + $0x8] sm:$0xff]  ;;  %v658_v28 = vld [vmem:[%s913_s1] sm:$0xff]  ;;  %v652_v33 = vld [vmem:[%s914_s0 + $0xc] sm:$0xf0]  ;;  %v695_v7 = vmov 18.0  }
   0xa   :  { %323 = vmatpush.bf16.msra.mxu0 %v663_v8  ;;  %v667_v25 = vld [vmem:[%s913_s1 + $0x48] sm:$0xff]  ;;  %v666_v29 = vld [vmem:[%s913_s1 + $0x40] sm:$0xff]  ;;  %v494_v35 = vld [vmem:[%s914_s0 + $0x10] sm:$0xf0]  ;;  %691 = vrcp.f32 %v695_v7 }
   0xb   :  { %342 = vmatpush.bf16.msra.mxu1 %v671_v9  ;;  %v675_v26 = vld [vmem:[%s913_s1 + $0x88] sm:$0xff]  ;;  %v674_v30 = vld [vmem:[%s913_s1 + $0x80] sm:$0xff]  ;;  %v653_v37 = vld [vmem:[%s914_s0 + $0x14] sm:$0xf0] }
   0xc   :  { %361 = vmatpush.bf16.msra.mxu2 %v679_v10  ;;  %v683_v27 = vld [vmem:[%s913_s1 + $0xc8] sm:$0xff]  ;;  %v682_v31 = vld [vmem:[%s913_s1 + $0xc0] sm:$0xff]  ;;  %v502_v39 = vld [vmem:[%s914_s0 + $0x18] sm:$0xf0] }
   0xd   :  { %380 = vmatpush.bf16.msra.mxu3 %v687_v11  ;;  %v492_v32 = vld [vmem:[%s914_s0] sm:$0xf]  ;;  %v650_v34 = vld [vmem:[%s914_s0 + $0x4] sm:$0xf]  ;;  %v500_v36 = vld [vmem:[%s914_s0 + $0x8] sm:$0xf] }
   0xe   :  { %324 = vmatpush.bf16.msra.mxu0 %v662_v12  ;;  %v651_v38 = vld [vmem:[%s914_s0 + $0xc] sm:$0xf]  ;;  %v493_v40 = vor.u32 %v652_v33, %v492_v32  ;;  %v497_v41 = vor.u32 %v650_v34, %v494_v35  ;;  %v501_v42 = vor.u32 %v653_v37, %v500_v36  ;;  %v508_v44 = vld [vmem:[%s914_s0 + $0x20] sm:$0xf]  ;;  %v656_v45 = vld [vmem:[%s914_s0 + $0x2c] sm:$0xf0] }
   0xf   :  { %343 = vmatpush.bf16.msra.mxu1 %v670_v13  ;;  %v505_v43 = vor.u32 %v651_v38, %v502_v39  ;;  %v654_v46 = vld [vmem:[%s914_s0 + $0x24] sm:$0xf]  ;;  %v510_v47 = vld [vmem:[%s914_s0 + $0x30] sm:$0xf0]  ;;  %v516_v48 = vld [vmem:[%s914_s0 + $0x28] sm:$0xf]  ;;  %v509_v52 = vor.u32 %v656_v45, %v508_v44 }
  0x10   :  { %362 = vmatpush.bf16.msra.mxu2 %v678_v14  ;;  %v657_v49 = vld [vmem:[%s914_s0 + $0x34] sm:$0xf0]  ;;  %v655_v50 = vld [vmem:[%s914_s0 + $0x2c] sm:$0xf]  ;;  %v518_v51 = vld [vmem:[%s914_s0 + $0x38] sm:$0xf0]  ;;  %v513_v53 = vor.u32 %v654_v46, %v510_v47 }
  0x11   :  { %381 = vmatpush.bf16.msra.mxu3 %v686_v15  ;;  %v517_v54 = vor.u32 %v657_v49, %v516_v48  ;;  %v521_v55 = vor.u32 %v655_v50, %v518_v51 }
  0x12   :  { %325 = vmatpush.bf16.msra.mxu0 %v661_v16  ;;  %v692_v16 = vpop.eup %691 }
  0x13   :  { %344 = vmatpush.bf16.msra.mxu1 %v669_v17  ;;  %vm433_vm1 = vweird.f32 %v692_v16 }
  0x14   :  { %363 = vmatpush.bf16.msra.mxu2 %v677_v18 }
  0x15   :  { %382 = vmatpush.bf16.msra.mxu3 %v685_v19 }
  0x16   :  { %326 = vmatpush.bf16.msra.mxu0 %v660_v20 }
  0x17   :  { %345 = vmatpush.bf16.msra.mxu1 %v668_v21 }
  0x18   :  { %364 = vmatpush.bf16.msra.mxu2 %v676_v22 }
  0x19   :  { %383 = vmatpush.bf16.msra.mxu3 %v684_v23  ;;  %v429_v23 = vmul.f32 18.0, %v692_v16 }
  0x1a   :  { %327 = vmatpush.bf16.msra.mxu0 %v659_v24 }
  0x1b   :  { %346 = vmatpush.bf16.msra.mxu1 %v667_v25  ;;  %v430_v37 = vsub.f32 1.0, %v429_v23 }
  0x1c   :  { %365 = vmatpush.bf16.msra.mxu2 %v675_v26 }
  0x1d   :  { %384 = vmatpush.bf16.msra.mxu3 %v683_v27 }
  0x1e   :  { %328 = vmatpush.bf16.msra.mxu0 %v658_v28 }
  0x1f   :  { %347 = vmatpush.bf16.msra.mxu1 %v666_v29 }
  0x20   :  { %366 = vmatpush.bf16.msra.mxu2 %v674_v30 }
  0x21   :  { %385 = vmatpush.bf16.msra.mxu3 %v682_v31  ;;  %329 = vmatmul.bf16.vlgmr.msra.gmra.mxu0 %v493_v40 }
  0x22   :  { %348 = vmatmul.bf16.vlgmr.msra.gmra.mxu1 %v497_v41 }
  0x23   :  { %367 = vmatmul.bf16.vlgmr.msra.gmra.mxu2 %v501_v42 }
  0x24   :  { %386 = vmatmul.bf16.vlgmr.msra.gmra.mxu3 %v505_v43  ;;  %v431_v43 = vmul.f32 %v692_v16, %v430_v37 }
  0x26   :  { %v432_v48 = vadd.f32 %v692_v16, %v431_v43 }
  0x31   :  { %334 = vmatmul.bf16.gmra.mxu0 %v509_v52 }
  0x32   :  { %353 = vmatmul.bf16.gmra.mxu1 %v513_v53  ;;  %v434_v53 = vsel %vm433_vm1, %v692_v16, %v432_v48 }
  0x33   :  { %372 = vmatmul.bf16.gmra.mxu2 %v517_v54 }
  0x34   :  { %391 = vmatmul.bf16.gmra.mxu3 %v521_v55 }
  0x9e   :  { %v330_v56 = vpop.f32.mrf.mxu0 }
  0x9f   :  { %v349_v57 = vpop.f32.mrf.mxu1 }
  0xa0   :  { %v350_v2 = vadd.f32 %v349_v57, %v330_v56 }
  0xa6   :  { %v368_v58 = vpop.f32.mrf.mxu2  ;;  %v332_v60 = vpop.f32.mrf.mxu0 }
  0xa7   :  { %v387_v59 = vpop.f32.mrf.mxu3  ;;  %v351_v61 = vpop.f32.mrf.mxu1  ;;  %v369_v6 = vadd.f32 %v368_v58, %v350_v2 }
  0xa8   :  { %v352_v3 = vadd.f32 %v351_v61, %v332_v60 }
  0xa9   :  { %v867_v12 = vadd.f32 %v387_v59, %v369_v6 }
  0xab   :  { %v411_v18 = vmul.f32 %v867_v12, %v867_v12  ;;  %v398_v24 = vsel %vm397_vm0, %v867_v12, 0.0 }
  0xad   :  { %v415_v30 = vsel %vm397_vm0, %v411_v18, 0.0 }
  0xae   :  { %v370_v62 = vpop.f32.mrf.mxu2  ;;  %v335_v0 = vpop.f32.mrf.mxu0 }
  0xaf   :  { %v389_v63 = vpop.f32.mrf.mxu3  ;;  %v354_v1 = vpop.f32.mrf.mxu1  ;;  %v371_v4 = vadd.f32 %v370_v62, %v352_v3 }
  0xb0   :  { %v355_v5 = vadd.f32 %v354_v1, %v335_v0 }
  0xb1   :  { %v865_v10 = vadd.f32 %v389_v63, %v371_v4  ;;  %v440_v4 = vld [vmem:[%s915_s2] sm:$0x1] }
  0xb3   :  { %v412_v17 = vmul.f32 %v865_v10, %v865_v10  ;;  %v399_v19 = vsel %vm397_vm0, %v865_v10, 0.0 }
  0xb4   :  { %v400_v28 = vadd.f32 %v399_v19, %v398_v24 }
  0xb5   :  { %v416_v25 = vsel %vm397_vm0, %v412_v17, 0.0 }
  0xb6   :  { %v373_v8 = vpop.f32.mrf.mxu2  ;;  %v337_v14 = vpop.f32.mrf.mxu0  ;;  %v417_v33 = vadd.f32 %v416_v25, %v415_v30 }
  0xb7   :  { %v392_v9 = vpop.f32.mrf.mxu3  ;;  %v374_v11 = vadd.f32 %v373_v8, %v355_v5  ;;  %v356_v15 = vpop.f32.mrf.mxu1  ;;  %v453_v8 = vld [vmem:[%s916_s3] sm:$0x1] }
  0xb8   :  { %v357_v21 = vadd.f32 %v356_v15, %v337_v14 }
  0xb9   :  { %v869_v13 = vadd.f32 %v392_v9, %v374_v11 }
  0xbb   :  { %v413_v20 = vmul.f32 %v869_v13, %v869_v13  ;;  %v401_v26 = vsel %vm397_vm0, %v869_v13, 0.0 }
  0xbc   :  { %v402_v34 = vadd.f32 %v401_v26, %v400_v28 }
  0xbd   :  { %v418_v31 = vsel %vm397_vm0, %v413_v20, 0.0 }
  0xbe   :  { %v375_v22 = vpop.f32.mrf.mxu2  ;;  %v419_v38 = vadd.f32 %v418_v31, %v417_v33 }
  0xbf   :  { %v376_v27 = vadd.f32 %v375_v22, %v357_v21  ;;  %v394_v29 = vpop.f32.mrf.mxu3 }
  0xc1   :  { %v395_v32 = vadd.f32 %v394_v29, %v376_v27 }
  0xc3   :  { %v403_v35 = vsel %vm397_vm0, %v395_v32, 0.0  ;;  %v414_v36 = vmul.f32 %v395_v32, %v395_v32 }
  0xc4   :  { %v404_v39 = vadd.f32 %v403_v35, %v402_v34 }
  0xc5   :  { %v420_v40 = vsel %vm397_vm0, %v414_v36, 0.0 }
  0xc6   :  { %v405_v41 = vrot.slane %v404_v39, 4  ;;  %v421_v42 = vadd.f32 %v420_v40, %v419_v38 }
  0xc8   :  { %v406_v44 = vadd.f32 %v405_v41, %v404_v39  ;;  %v422_v45 = vrot.slane %v421_v42, 4 }
  0xca   :  { %v407_v46 = vrot.slane %v406_v44, 2  ;;  %v423_v47 = vadd.f32 %v422_v45, %v421_v42 }
  0xcc   :  { %v408_v49 = vadd.f32 %v407_v46, %v406_v44  ;;  %v424_v50 = vrot.slane %v423_v47, 2 }
  0xce   :  { %v409_v51 = vrot.slane %v408_v49, 1  ;;  %v425_v52 = vadd.f32 %v424_v50, %v423_v47 }
  0xd0   :  { %v410_v54 = vadd.f32 %v409_v51, %v408_v49  ;;  %v426_v55 = vrot.slane %v425_v52, 1 }
  0xd2   :  { %v427_v56 = vadd.f32 %v426_v55, %v425_v52  ;;  %v435_v57 = vmul.f32 %v434_v53, %v410_v54 }
  0xd4   :  { %v436_v58 = vmul.f32 %v434_v53, %v427_v56  ;;  %v437_v59 = vmul.f32 %v435_v57, %v435_v57 }
  0xd6   :  { %v438_v60 = vsub.f32 %v436_v58, %v437_v59 }
  0xd8   :  { %v439_v61 = vmax.f32 %v438_v60, 0.0 }
  0xda   :  { %v441_v62 = vadd.f32 1e-05, %v439_v61 }
  0xdc   :  { %693 = vrsqrt.f32 %v441_v62  ;;  %vm448_vm3 = vweird.f32 %v441_v62 }
  0xe2   :  { %v694_v63 = vpop.eup %693 }
  0xe3   :  { %v443_v0 = vmul.f32 %v694_v63, %v441_v62  ;;  %vm449_vm2 = vweird.f32 %v694_v63 }
  0xe4   :  { %vm450_vm4 = vmor %vm448_vm3, %vm449_vm2 }
  0xe5   :  { %v444_v1 = vmul.f32 %v694_v63, %v443_v0 }
  0xe7   :  { %v445_v2 = vmul.f32 0.5, %v444_v1 }
  0xe9   :  { %v446_v3 = vsub.f32 1.5, %v445_v2 }
  0xeb   :  { %v447_v5 = vmul.f32 %v694_v63, %v446_v3 }
  0xed   :  { %v451_v6 = vsel %vm450_vm4, %v694_v63, %v447_v5 }
  0xee   :  { %v452_v7 = vmul.f32 %v451_v6, %v440_v4 }
  0xf0   :  { %v454_v9 = vmul.f32 %v452_v7, %v435_v57  ;;  %v457_v11 = vperm.slane %v452_v7, 0 }
  0xf2   :  { %v455_v14 = vsub.f32 %v453_v8, %v454_v9  ;;  %v459_v15 = vmul.f32 %v457_v11, %v867_v12  ;;  %v460_v16 = vmul.f32 %v457_v11, %v865_v10  ;;  %v461_v17 = vmul.f32 %v457_v11, %v869_v13 }
  0xf3   :  { %v462_v18 = vmul.f32 %v457_v11, %v395_v32 }
  0xf4   :  { %v464_v19 = vperm.slane %v455_v14, 0 }
  0xf6   :  { %v466_v20 = vadd.f32 %v464_v19, %v459_v15  ;;  %v467_v21 = vadd.f32 %v464_v19, %v460_v16  ;;  %v468_v22 = vadd.f32 %v464_v19, %v461_v17  ;;  %v469_v23 = vadd.f32 %v464_v19, %v462_v18 }
  0xf8   :  { %vm470_vm5 = vcmp.ge.f32.partialorder %v466_v20, 0.0  ;;  %vm471_vm6 = vcmp.ge.f32.partialorder %v467_v21, 0.0  ;;  %vm472_vm7 = vcmp.ge.f32.partialorder %v468_v22, 0.0  ;;  %vm473_vm8 = vcmp.ge.f32.partialorder %v469_v23, 0.0 }
  0xf9   :  { %v474_v24 = vmul.f32 0.2, %v466_v20  ;;  %v475_v25 = vmul.f32 0.2, %v467_v21  ;;  %v476_v26 = vmul.f32 0.2, %v468_v22 }
  0xfa   :  { %v477_v27 = vmul.f32 0.2, %v469_v23 }
  0xfb   :  { %v478_v28 = vsel %vm470_vm5, %v466_v20, %v474_v24  ;;  %v479_v12 = vsel %vm471_vm6, %v467_v21, %v475_v25  ;;  %v480_v29 = vsel %vm472_vm7, %v468_v22, %v476_v26 }
  0xfc   :  { %v481_v10 = vsel %vm473_vm8, %v469_v23, %v477_v27  ;;  %482 = vst.msk [vmem:[%s917_s4] sm:$0xff] %vm397_vm0, %v478_v28 }
  0xfd   :  { %483 = vst.msk [vmem:[%s917_s4 + $0x8] sm:$0xff] %vm397_vm0, %v479_v12 }
  0xfe   :  { %484 = vst.msk [vmem:[%s917_s4 + $0x10] sm:$0xff] %vm397_vm0, %v480_v29 }
  0xff   :  { %485 = vst.msk [vmem:[%s917_s4 + $0x18] sm:$0xff] %vm397_vm0, %v481_v10 }

// kernel: discriminator_forward.9
= control target key start
LH: loop header
LB: loop body
LE: loop exit
PB: predicated region body
PF: predicated region fallthrough
CT: control target
= control target key end

     0   :  { %vm354_vm0 = vcmask 7168   ;;  %s691_s1 = inlined_call_operand.vmem [shape: bf16[512,128], index: 1, kind: input, shape index: {}]   ;;  %s692_s2 = inlined_call_operand.vmem [shape: f32[1,128], index: 2, kind: input, shape index: {}]   ;;  %s693_s0 = inlined_call_operand.vmem [shape: bf16[16,512], index: 0, kind: input, shape index: {}]   ;;  %s694_s3 = inlined_call_operand.vmem [shape: f32[16,1], index: 3, kind: output, shape index: {}]  }
   0x1   :  { %v516_v0 = vld [vmem:[%s691_s1 + $0x38] sm:$0xff]  ;;  %v515_v4 = vld [vmem:[%s691_s1 + $0x30] sm:$0xff]  ;;  %v514_v8 = vld [vmem:[%s691_s1 + $0x28] sm:$0xff] }
   0x2   :  { %v524_v1 = vld [vmem:[%s691_s1 + $0x78] sm:$0xff]  ;;  %298 = vmatpush.bf16.msra.mxu0 %v516_v0  ;;  %v523_v5 = vld [vmem:[%s691_s1 + $0x70] sm:$0xff]  ;;  %v522_v9 = vld [vmem:[%s691_s1 + $0x68] sm:$0xff] }
   0x3   :  { %v532_v2 = vld [vmem:[%s691_s1 + $0xb8] sm:$0xff]  ;;  %312 = vmatpush.bf16.msra.mxu1 %v524_v1  ;;  %v531_v6 = vld [vmem:[%s691_s1 + $0xb0] sm:$0xff]  ;;  %v530_v10 = vld [vmem:[%s691_s1 + $0xa8] sm:$0xff] }
   0x4   :  { %v540_v3 = vld [vmem:[%s691_s1 + $0xf8] sm:$0xff]  ;;  %326 = vmatpush.bf16.msra.mxu2 %v532_v2  ;;  %v539_v7 = vld [vmem:[%s691_s1 + $0xf0] sm:$0xff]  ;;  %v538_v11 = vld [vmem:[%s691_s1 + $0xe8] sm:$0xff] }
   0x5   :  { %340 = vmatpush.bf16.msra.mxu3 %v540_v3  ;;  %v513_v12 = vld [vmem:[%s691_s1 + $0x20] sm:$0xff]  ;;  %v512_v16 = vld [vmem:[%s691_s1 + $0x18] sm:$0xff]  ;;  %v511_v20 = vld [vmem:[%s691_s1 + $0x10] sm:$0xff] }
   0x6   :  { %299 = vmatpush.bf16.msra.mxu0 %v515_v4  ;;  %v521_v13 = vld [vmem:[%s691_s1 + $0x60] sm:$0xff]  ;;  %v520_v17 = vld [vmem:[%s691_s1 + $0x58] sm:$0xff]  ;;  %v519_v21 = vld [vmem:[%s691_s1 + $0x50] sm:$0xff] }
   0x7   :  { %313 = vmatpush.bf16.msra.mxu1 %v523_v5  ;;  %v529_v14 = vld [vmem:[%s691_s1 + $0xa0] sm:$0xff]  ;;  %v528_v18 = vld [vmem:[%s691_s1 + $0x98] sm:$0xff]  ;;  %v527_v22 = vld [vmem:[%s691_s1 + $0x90] sm:$0xff] }
   0x8   :  { %327 = vmatpush.bf16.msra.mxu2 %v531_v6  ;;  %v537_v15 = vld [vmem:[%s691_s1 + $0xe0] sm:$0xff]  ;;  %v536_v19 = vld [vmem:[%s691_s1 + $0xd8] sm:$0xff]  ;;  %v535_v23 = vld [vmem:[%s691_s1 + $0xd0] sm:$0xff] }
   0x9   :  { %341 = vmatpush.bf16.msra.mxu3 %v539_v7  ;;  %v510_v24 = vld [vmem:[%s691_s1 + $0x8] sm:$0xff]  ;;  %v509_v28 = vld [vmem:[%s691_s1] sm:$0xff]  ;;  %v507_v33 = vld [vmem:[%s693_s0 + $0xc] sm:$0xf0] }
   0xa   :  { %300 = vmatpush.bf16.msra.mxu0 %v514_v8  ;;  %v518_v25 = vld [vmem:[%s691_s1 + $0x48] sm:$0xff]  ;;  %v517_v29 = vld [vmem:[%s691_s1 + $0x40] sm:$0xff]  ;;  %v365_v35 = vld [vmem:[%s693_s0 + $0x10] sm:$0xf0] }
   0xb   :  { %314 = vmatpush.bf16.msra.mxu1 %v522_v9  ;;  %v526_v26 = vld [vmem:[%s691_s1 + $0x88] sm:$0xff]  ;;  %v525_v30 = vld [vmem:[%s691_s1 + $0x80] sm:$0xff]  ;;  %v508_v37 = vld [vmem:[%s693_s0 + $0x14] sm:$0xf0] }
   0xc   :  { %328 = vmatpush.bf16.msra.mxu2 %v530_v10  ;;  %v534_v27 = vld [vmem:[%s691_s1 + $0xc8] sm:$0xff]  ;;  %v533_v31 = vld [vmem:[%s691_s1 + $0xc0] sm:$0xff]  ;;  %v373_v39 = vld [vmem:[%s693_s0 + $0x18] sm:$0xf0] }
   0xd   :  { %342 = vmatpush.bf16.msra.mxu3 %v538_v11  ;;  %v363_v32 = vld [vmem:[%s693_s0] sm:$0xf]  ;;  %v505_v34 = vld [vmem:[%s693_s0 + $0x4] sm:$0xf]  ;;  %v371_v36 = vld [vmem:[%s693_s0 + $0x8] sm:$0xf] }
   0xe   :  { %301 = vmatpush.bf16.msra.mxu0 %v513_v12  ;;  %v506_v38 = vld [vmem:[%s693_s0 + $0xc] sm:$0xf]  ;;  %v364_v40 = vor.u32 %v507_v33, %v363_v32  ;;  %v368_v41 = vor.u32 %v505_v34, %v365_v35  ;;  %v372_v42 = vor.u32 %v508_v37, %v371_v36  ;;  %v541_v44 = vld [vmem:[%s692_s2] ss:$0 sm:$0xff] }
   0xf   :  { %315 = vmatpush.bf16.msra.mxu1 %v521_v13  ;;  %v376_v43 = vor.u32 %v506_v38, %v373_v39 }
  0x10   :  { %329 = vmatpush.bf16.msra.mxu2 %v529_v14 }
  0x11   :  { %343 = vmatpush.bf16.msra.mxu3 %v537_v15 }
  0x12   :  { %302 = vmatpush.bf16.msra.mxu0 %v512_v16 }
  0x13   :  { %316 = vmatpush.bf16.msra.mxu1 %v520_v17 }
  0x14   :  { %330 = vmatpush.bf16.msra.mxu2 %v528_v18 }
  0x15   :  { %344 = vmatpush.bf16.msra.mxu3 %v536_v19 }
  0x16   :  { %303 = vmatpush.bf16.msra.mxu0 %v511_v20 }
  0x17   :  { %317 = vmatpush.bf16.msra.mxu1 %v519_v21 }
  0x18   :  { %331 = vmatpush.bf16.msra.mxu2 %v527_v22 }
  0x19   :  { %345 = vmatpush.bf16.msra.mxu3 %v535_v23 }
  0x1a   :  { %304 = vmatpush.bf16.msra.mxu0 %v510_v24 }
  0x1b   :  { %318 = vmatpush.bf16.msra.mxu1 %v518_v25 }
  0x1c   :  { %332 = vmatpush.bf16.msra.mxu2 %v526_v26 }
  0x1d   :  { %346 = vmatpush.bf16.msra.mxu3 %v534_v27 }
  0x1e   :  { %305 = vmatpush.bf16.msra.mxu0 %v509_v28 }
  0x1f   :  { %319 = vmatpush.bf16.msra.mxu1 %v517_v29 }
  0x20   :  { %333 = vmatpush.bf16.msra.mxu2 %v525_v30 }
  0x21   :  { %347 = vmatpush.bf16.msra.mxu3 %v533_v31  ;;  %306 = vmatmul.bf16.vlgmr.msra.gmra.mxu0 %v364_v40 }
  0x22   :  { %320 = vmatmul.bf16.vlgmr.msra.gmra.mxu1 %v368_v41 }
  0x23   :  { %334 = vmatmul.bf16.vlgmr.msra.gmra.mxu2 %v372_v42 }
  0x24   :  { %348 = vmatmul.bf16.vlgmr.msra.gmra.mxu3 %v376_v43 }
  0x9e   :  { %v307_v45 = vpop.f32.mrf.mxu0 }
  0x9f   :  { %v308_v46 = vadd.f32 %v541_v44, %v307_v45  ;;  %v321_v47 = vpop.f32.mrf.mxu1 }
  0xa1   :  { %v322_v48 = vadd.f32 %v321_v47, %v308_v46 }
  0xa6   :  { %v335_v49 = vpop.f32.mrf.mxu2  ;;  %v309_v52 = vpop.f32.mrf.mxu0 }
  0xa7   :  { %v349_v50 = vpop.f32.mrf.mxu3  ;;  %v336_v51 = vadd.f32 %v335_v49, %v322_v48  ;;  %v310_v54 = vadd.f32 %v541_v44, %v309_v52  ;;  %v323_v55 = vpop.f32.mrf.mxu1 }
  0xa9   :  { %v350_v53 = vadd.f32 %v349_v50, %v336_v51  ;;  %v324_v56 = vadd.f32 %v323_v55, %v310_v54 }
  0xab   :  { %355 = vst.msk [vmem:[%s694_s3] sm:$0xff] %vm354_vm0, %v350_v53 }
  0xae   :  { %v337_v57 = vpop.f32.mrf.mxu2 }
  0xaf   :  { %v338_v58 = vadd.f32 %v337_v57, %v324_v56  ;;  %v351_v59 = vpop.f32.mrf.mxu3 }
  0xb1   :  { %v352_v60 = vadd.f32 %v351_v59, %v338_v58 }
  0xb3   :  { %356 = vst.msk [vmem:[%s694_s3 + $0x8] sm:$0xff] %vm354_vm0, %v352_v60 }

</bundles_post_ra>
